<compile_context>
chip_gen: v5e
topology: v5e:2x2
jax: 0.10.0
libtpu: 0.0.40
codegen_flags: <defaults>
</compile_context>

<pallas_src>
import functools

import jax
import jax.numpy as jnp
from jax import lax
from jax.experimental import pallas as pl
from jax.experimental.pallas import tpu as pltpu


# ----------------------------- helpers ---------------------------------------
def _round_up(x, m):
    return (x + m - 1) // m * m


def _pad_gates_last(w, h, h_pad):
    """Pad the 4H gate axis (last) so each of the i,f,g,o blocks is h_pad wide."""
    if h == h_pad:
        return w
    parts = jnp.split(w, 4, axis=-1)
    pad = [(0, 0)] * (w.ndim - 1) + [(0, h_pad - h)]
    return jnp.concatenate([jnp.pad(p, pad) for p in parts], axis=-1)


def _pad_axis(w, axis, new_size):
    if w.shape[axis] == new_size:
        return w
    pad = [(0, 0)] * w.ndim
    pad[axis] = (0, new_size - w.shape[axis])
    return jnp.pad(w, pad)


# ----------------------------- Pallas kernel ---------------------------------
def _lstm_decoder_kernel(n_layers, T, B_pad, H_pad,
                         x_ref,      # (T*B_pad, D_pad)   embedded seq, time-major, flattened
                         wih_ref,    # (L, D_pad, 4*H_pad)
                         whh_ref,    # (L, H_pad, 4*H_pad)
                         b_ref,      # (L, 1, 4*H_pad)     combined b_ih + b_hh
                         wdec_ref,   # (H_pad, O_pad)
                         bdec_ref,   # (1, O_pad)
                         out_ref,    # (T*B_pad, O_pad)    decoder logits
                         gates_buf,  # VMEM (T*B_pad, 4*H_pad)  per-layer input projection
                         hseq_buf):  # VMEM (T*B_pad, H_pad)    per-layer hidden outputs
    for l in range(n_layers):   # n_layers is a static Python int
        # --- batched input projection: one big MXU matmul per layer -----------
        if l == 0:
            inp = x_ref[...]                         # (T*B, D_pad)
            w_in = wih_ref[0]                        # (D_pad, 4H_pad)
        else:
            inp = hseq_buf[...]                      # (T*B, H_pad)  prev layer's h
            w_in = wih_ref[l, 0:H_pad, :]            # (H_pad, 4H_pad)
        gates_buf[...] = (
            jnp.dot(inp, w_in, preferred_element_type=jnp.float32) + b_ref[l]
        )

        # --- sequential recurrence: only h @ W_hh stays on the critical path --
        def step(t, carry, l=l):
            h, c = carry
            row = pl.multiple_of(t * B_pad, B_pad)
            g = gates_buf[pl.ds(row, B_pad), :] + jnp.dot(
                h, whh_ref[l], preferred_element_type=jnp.float32)
            # PyTorch gate order i, f, g, o — each block is a full 128-lane slice.
            i = jax.nn.sigmoid(g[:, 0 * H_pad:1 * H_pad])
            f = jax.nn.sigmoid(g[:, 1 * H_pad:2 * H_pad])
            gg = jnp.tanh(g[:, 2 * H_pad:3 * H_pad])
            o = jax.nn.sigmoid(g[:, 3 * H_pad:4 * H_pad])
            c = f * c + i * gg
            h = o * jnp.tanh(c)
            hseq_buf[pl.ds(row, B_pad), :] = h
            return h, c

        zeros = jnp.zeros((B_pad, H_pad), jnp.float32)
        lax.fori_loop(0, T, step, (zeros, zeros), unroll=(T <= 32))

    # --- decoder over all timesteps at once: one lane-dense matmul + store ----
    out_ref[...] = (
        jnp.dot(hseq_buf[...], wdec_ref[...], preferred_element_type=jnp.float32)
        + bdec_ref[...]
    )


# ----------------------------- wrapper ----------------------------------------
def next_character_lstm_forward(tokens, params, *, n_layers):
    """tokens: (B, T) int32 -> logits (B, output_size, T), like the PyTorch module."""
    emb = params["embedding"]                        # (vocab, E)
    B, T = tokens.shape
    E = emb.shape[1]
    H = params["whh0"].shape[0]
    O = params["wdec"].shape[1]

    B_pad = _round_up(B, 8)                          # f32 sublane count
    H_pad = _round_up(H, 128)                        # each gate = full lane blocks
    E_pad = _round_up(E, 128)
    D_pad = max(E_pad, H_pad)                        # unified per-layer input width
    O_pad = _round_up(O, 128)                        # lane-dense output store
    G = 4 * H_pad

    # ---- glue (plain JAX): embedding gather + time-major layout + padding ----
    embedded = jnp.take(emb, tokens, axis=0)         # (B, T, E)
    x = jnp.transpose(embedded, (1, 0, 2))           # (T, B, E)
    x = _pad_axis(_pad_axis(x, 1, B_pad), 2, D_pad)  # (T, B_pad, D_pad)
    x_flat = x.reshape(T * B_pad, D_pad)

    # ---- pack / pad weights into stacked, lane-aligned arrays ----------------
    wih_layers = [_pad_axis(_pad_gates_last(params["wih0"], H, H_pad), 0, D_pad)]
    whh_layers = [_pad_axis(_pad_gates_last(params["whh0"], H, H_pad), 0, H_pad)]
    b_layers = [_pad_gates_last(params["b0"], H, H_pad)]
    for l in range(n_layers - 1):
        wih_layers.append(
            _pad_axis(_pad_gates_last(params["wih_rest"][l], H, H_pad), 0, D_pad))
        whh_layers.append(
            _pad_axis(_pad_gates_last(params["whh_rest"][l], H, H_pad), 0, H_pad))
        b_layers.append(_pad_gates_last(params["b_rest"][l], H, H_pad))
    wih_all = jnp.stack(wih_layers)                  # (L, D_pad, 4*H_pad)
    whh_all = jnp.stack(whh_layers)                  # (L, H_pad, 4*H_pad)
    b_all = jnp.stack(b_layers)                      # (L, 1, 4*H_pad)

    wdec_p = _pad_axis(_pad_axis(params["wdec"], 0, H_pad), 1, O_pad)  # (H_pad, O_pad)
    bdec_p = _pad_axis(params["bdec"], 1, O_pad)                       # (1, O_pad)

    kernel = functools.partial(_lstm_decoder_kernel, n_layers, T, B_pad, H_pad)

    out_flat = pl.pallas_call(
        kernel,
        out_shape=jax.ShapeDtypeStruct((T * B_pad, O_pad), jnp.float32),
        grid_spec=pltpu.PrefetchScalarGridSpec(
            num_scalar_prefetch=0,
            grid=(1,),                                # whole sequence in one step
            in_specs=[
                pl.BlockSpec((T * B_pad, D_pad), lambda i: (0, 0)),
                pl.BlockSpec((n_layers, D_pad, G), lambda i: (0, 0, 0)),
                pl.BlockSpec((n_layers, H_pad, G), lambda i: (0, 0, 0)),
                pl.BlockSpec((n_layers, 1, G), lambda i: (0, 0, 0)),
                pl.BlockSpec((H_pad, O_pad), lambda i: (0, 0)),
                pl.BlockSpec((1, O_pad), lambda i: (0, 0)),
            ],
            out_specs=pl.BlockSpec((T * B_pad, O_pad), lambda i: (0, 0)),
            scratch_shapes=[
                pltpu.VMEM((T * B_pad, G), jnp.float32),       # per-layer gates
                pltpu.VMEM((T * B_pad, H_pad), jnp.float32),   # per-layer hidden seq
            ],
        ),
        compiler_params=pltpu.CompilerParams(
            dimension_semantics=("arbitrary",),
        ),
    )(x_flat, wih_all, whh_all, b_all, wdec_p, bdec_p)

    # (T*B_pad, O_pad) -> (T, B, O) -> (B, O, T)  == PyTorch output.permute(0, 2, 1)
    out = out_flat.reshape(T, B_pad, O_pad)[:, :B, :O]
    return jnp.transpose(out, (1, 2, 0))


# ----------------------------- Pure-JAX reference ----------------------------
def reference_forward(tokens, params, *, n_layers):
    emb = params["embedding"]
    embedded = jnp.take(emb, tokens, axis=0)     # (B, T, E)
    B, T, E = embedded.shape
    H = params["whh0"].shape[0]

    wihs = [params["wih0"]] + [params["wih_rest"][l] for l in range(n_layers - 1)]
    whhs = [params["whh0"]] + [params["whh_rest"][l] for l in range(n_layers - 1)]
    bs = [params["b0"]] + [params["b_rest"][l] for l in range(n_layers - 1)]

    h = [jnp.zeros((B, H), jnp.float32) for _ in range(n_layers)]
    c = [jnp.zeros((B, H), jnp.float32) for _ in range(n_layers)]
    outs = []
    for t in range(T):
        x = embedded[:, t, :]
        for l in range(n_layers):
            gates = x @ wihs[l] + h[l] @ whhs[l] + bs[l]
            i, f, g, o = jnp.split(gates, 4, axis=-1)
            i, f, g, o = jax.nn.sigmoid(i), jax.nn.sigmoid(f), jnp.tanh(g), jax.nn.sigmoid(o)
            c[l] = f * c[l] + i * g
            h[l] = o * jnp.tanh(c[l])
            x = h[l]
        outs.append(x @ params["wdec"] + params["bdec"])
    out = jnp.stack(outs, axis=1)                # (B, T, O)
    return jnp.transpose(out, (0, 2, 1))         # (B, O, T)


# ----------------------------- Parameter init --------------------------------
def init_params(key, vocab, embed, hidden, output, n_layers):
    ks = jax.random.split(key, 16)
    s = 1.0 / jnp.sqrt(hidden)
    u = lambda k, shape: jax.random.uniform(k, shape, jnp.float32, -s, s)
    params = {
        "embedding": jax.random.normal(ks[0], (vocab, embed), jnp.float32),
        # Layer 0 (input size = embed); weights stored transposed for x @ W.
        "wih0": u(ks[1], (embed, 4 * hidden)),
        "whh0": u(ks[2], (hidden, 4 * hidden)),
        "b0":   u(ks[3], (1, 4 * hidden)) + u(ks[4], (1, 4 * hidden)),   # b_ih + b_hh
        # Layers 1..L-1 (input size = hidden), stacked.
        "wih_rest": u(ks[5], (n_layers - 1, hidden, 4 * hidden)),
        "whh_rest": u(ks[6], (n_layers - 1, hidden, 4 * hidden)),
        "b_rest":   u(ks[7], (n_layers - 1, 1, 4 * hidden))
                    + u(ks[8], (n_layers - 1, 1, 4 * hidden)),
        # Decoder
        "wdec": u(ks[9], (hidden, output)),
        "bdec": u(ks[10], (1, output)),
    }
    return params


# ----------------------------- Main -------------------------------------------
if __name__ == "__main__":
    # Small, forward-consistent sizes.
    vocab_size = 32     # input_size
    embed_size = 32
    hidden_size = 32
    output_size = 32
    n_layers = 2
    B, T = 2, 8

    key = jax.random.PRNGKey(0)
    kp, kt = jax.random.split(key)
    params = init_params(kp, vocab_size, embed_size, hidden_size, output_size, n_layers)
    tokens = jax.random.randint(kt, (B, T), 0, vocab_size, dtype=jnp.int32)

    out = next_character_lstm_forward(tokens, params, n_layers=n_layers)
    out = jax.block_until_ready(out)
    assert out.shape == (B, output_size, T), out.shape

    ref = reference_forward(tokens, params, n_layers=n_layers)
    assert jnp.allclose(out, ref, atol=2e-4, rtol=2e-4), float(jnp.max(jnp.abs(out - ref)))

    print("KERNEL_OK")
</pallas_src>

<mosaic_0001>
module attributes {stable_mosaic.version = 11 : i64} {
  func.func @_lstm_decoder_kernel(%arg0: i32, %arg1: memref<64x128xf32, #tpu.memory_space<vmem>>, %arg2: memref<2x128x512xf32, #tpu.memory_space<vmem>>, %arg3: memref<2x128x512xf32, #tpu.memory_space<vmem>>, %arg4: memref<2x1x512xf32, #tpu.memory_space<vmem>>, %arg5: memref<128x128xf32, #tpu.memory_space<vmem>>, %arg6: memref<1x128xf32, #tpu.memory_space<vmem>>, %arg7: memref<64x128xf32, #tpu.memory_space<vmem>>, %arg8: memref<64x512xf32, #tpu.memory_space<vmem>>, %arg9: memref<64x128xf32, #tpu.memory_space<vmem>>) attributes {dimension_semantics = [#tpu.dimension_semantics<arbitrary>], iteration_bounds = array<i64: 1>, scalar_prefetch = 0 : i64, scratch_operands = 2 : i64, tpu.core_type = #tpu.core_type<tc>, window_params = [{pipeline_mode = #tpu.pipeline_mode<synchronous>, transform_indices = @transform_0, window_bounds = array<i64: 64, 128>}, {pipeline_mode = #tpu.pipeline_mode<synchronous>, transform_indices = @transform_1, window_bounds = array<i64: 2, 128, 512>}, {pipeline_mode = #tpu.pipeline_mode<synchronous>, transform_indices = @transform_2, window_bounds = array<i64: 2, 128, 512>}, {pipeline_mode = #tpu.pipeline_mode<synchronous>, transform_indices = @transform_3, window_bounds = array<i64: 2, 1, 512>}, {pipeline_mode = #tpu.pipeline_mode<synchronous>, transform_indices = @transform_4, window_bounds = array<i64: 128, 128>}, {pipeline_mode = #tpu.pipeline_mode<synchronous>, transform_indices = @transform_5, window_bounds = array<i64: 1, 128>}, {pipeline_mode = #tpu.pipeline_mode<synchronous>, transform_indices = @transform_6, window_bounds = array<i64: 64, 128>}]} {
    %c0 = arith.constant 0 : index
    %c0_0 = arith.constant 0 : index
    %0 = vector.load %arg1[%c0, %c0_0] : memref<64x128xf32, #tpu.memory_space<vmem>>, vector<64x128xf32>
    %c0_1 = arith.constant 0 : index
    %c0_2 = arith.constant 0 : index
    %c0_3 = arith.constant 0 : index
    %1 = vector.load %arg2[%c0_1, %c0_2, %c0_3] : memref<2x128x512xf32, #tpu.memory_space<vmem>>, vector<1x128x512xf32>
    %2 = vector.shape_cast %1 : vector<1x128x512xf32> to vector<128x512xf32>
    %cst = arith.constant dense<0.000000e+00> : vector<64x512xf32>
    %3 = tpu.matmul %0, %2, %cst {dimension_numbers = #tpu.dot_dimension_numbers<[1], [0], [0], [1], [0, 0, 1, 1], [], []>} : vector<64x128xf32>, vector<128x512xf32>, vector<64x512xf32> -> vector<64x512xf32>
    %c0_4 = arith.constant 0 : index
    %c0_5 = arith.constant 0 : index
    %c0_6 = arith.constant 0 : index
    %4 = vector.load %arg4[%c0_4, %c0_5, %c0_6] : memref<2x1x512xf32, #tpu.memory_space<vmem>>, vector<1x1x512xf32>
    %5 = vector.shape_cast %4 : vector<1x1x512xf32> to vector<1x512xf32>
    %6 = vector.broadcast %5 : vector<1x512xf32> to vector<64x512xf32>
    %7 = arith.addf %3, %6 : vector<64x512xf32>
    %c0_7 = arith.constant 0 : index
    %c0_8 = arith.constant 0 : index
    %8 = vector.load %arg8[%c0_7, %c0_8] : memref<64x512xf32, #tpu.memory_space<vmem>>, vector<64x512xf32>
    tpu.vector_store %arg8[%c0_7, %c0_8], %7 {strides = array<i32>} : memref<64x512xf32, #tpu.memory_space<vmem>>, vector<64x512xf32>,
    %cst_9 = arith.constant 0.000000e+00 : f32
    %9 = vector.broadcast %cst_9 : f32 to vector<8x128xf32>
    %c0_i32 = arith.constant 0 : i32
    %c8_i32 = arith.constant 8 : i32
    %10 = arith.muli %c0_i32, %c8_i32 : i32
    %11 = tpu.assume_multiple %10, 8 : i32
    %12 = arith.index_cast %11 : i32 to index
    %c0_10 = arith.constant 0 : index
    %13 = vector.load %arg8[%12, %c0_10] : memref<64x512xf32, #tpu.memory_space<vmem>>, vector<8x512xf32>
    %c0_11 = arith.constant 0 : index
    %c0_12 = arith.constant 0 : index
    %c0_13 = arith.constant 0 : index
    %14 = vector.load %arg3[%c0_11, %c0_12, %c0_13] : memref<2x128x512xf32, #tpu.memory_space<vmem>>, vector<1x128x512xf32>
    %15 = vector.shape_cast %14 : vector<1x128x512xf32> to vector<128x512xf32>
    %cst_14 = arith.constant dense<0.000000e+00> : vector<8x512xf32>
    %16 = tpu.matmul %9, %15, %cst_14 {dimension_numbers = #tpu.dot_dimension_numbers<[1], [0], [0], [1], [0, 0, 1, 1], [], []>} : vector<8x128xf32>, vector<128x512xf32>, vector<8x512xf32> -> vector<8x512xf32>
    %17 = arith.addf %13, %16 : vector<8x512xf32>
    %18 = vector.extract_strided_slice %17 {offsets = [0, 0], sizes = [8, 128], strides = [1, 1]} : vector<8x512xf32> to vector<8x128xf32>
    %19 = arith.negf %18 : vector<8x128xf32>
    %20 = math.exp %19 : vector<8x128xf32>
    %cst_15 = arith.constant 1.000000e+00 : f32
    %21 = vector.broadcast %cst_15 : f32 to vector<8x128xf32>
    %22 = arith.addf %21, %20 : vector<8x128xf32>
    %23 = arith.divf %21, %22 : vector<8x128xf32>
    %24 = vector.extract_strided_slice %17 {offsets = [0, 128], sizes = [8, 128], strides = [1, 1]} : vector<8x512xf32> to vector<8x128xf32>
    %25 = arith.negf %24 : vector<8x128xf32>
    %26 = math.exp %25 : vector<8x128xf32>
    %cst_16 = arith.constant 1.000000e+00 : f32
    %27 = vector.broadcast %cst_16 : f32 to vector<8x128xf32>
    %28 = arith.addf %27, %26 : vector<8x128xf32>
    %29 = arith.divf %27, %28 : vector<8x128xf32>
    %30 = vector.extract_strided_slice %17 {offsets = [0, 256], sizes = [8, 128], strides = [1, 1]} : vector<8x512xf32> to vector<8x128xf32>
    %31 = math.tanh %30 : vector<8x128xf32>
    %32 = vector.extract_strided_slice %17 {offsets = [0, 384], sizes = [8, 128], strides = [1, 1]} : vector<8x512xf32> to vector<8x128xf32>
    %33 = arith.negf %32 : vector<8x128xf32>
    %34 = math.exp %33 : vector<8x128xf32>
    %cst_17 = arith.constant 1.000000e+00 : f32
    %35 = vector.broadcast %cst_17 : f32 to vector<8x128xf32>
    %36 = arith.addf %35, %34 : vector<8x128xf32>
    %37 = arith.divf %35, %36 : vector<8x128xf32>
    %38 = arith.mulf %29, %9 : vector<8x128xf32>
    %39 = arith.mulf %23, %31 : vector<8x128xf32>
    %40 = arith.addf %38, %39 : vector<8x128xf32>
    %41 = math.tanh %40 : vector<8x128xf32>
    %42 = arith.mulf %37, %41 : vector<8x128xf32>
    %43 = arith.index_cast %11 : i32 to index
    %c0_18 = arith.constant 0 : index
    %44 = vector.load %arg9[%43, %c0_18] : memref<64x128xf32, #tpu.memory_space<vmem>>, vector<8x128xf32>
    tpu.vector_store %arg9[%43, %c0_18], %42 {strides = array<i32>} : memref<64x128xf32, #tpu.memory_space<vmem>>, vector<8x128xf32>,
    %c1_i32 = arith.constant 1 : i32
    %c8_i32_19 = arith.constant 8 : i32
    %45 = arith.muli %c1_i32, %c8_i32_19 : i32
    %46 = tpu.assume_multiple %45, 8 : i32
    %47 = arith.index_cast %46 : i32 to index
    %c0_20 = arith.constant 0 : index
    %48 = vector.load %arg8[%47, %c0_20] : memref<64x512xf32, #tpu.memory_space<vmem>>, vector<8x512xf32>
    %c0_21 = arith.constant 0 : index
    %c0_22 = arith.constant 0 : index
    %c0_23 = arith.constant 0 : index
    %49 = vector.load %arg3[%c0_21, %c0_22, %c0_23] : memref<2x128x512xf32, #tpu.memory_space<vmem>>, vector<1x128x512xf32>
    %50 = vector.shape_cast %49 : vector<1x128x512xf32> to vector<128x512xf32>
    %cst_24 = arith.constant dense<0.000000e+00> : vector<8x512xf32>
    %51 = tpu.matmul %42, %50, %cst_24 {dimension_numbers = #tpu.dot_dimension_numbers<[1], [0], [0], [1], [0, 0, 1, 1], [], []>} : vector<8x128xf32>, vector<128x512xf32>, vector<8x512xf32> -> vector<8x512xf32>
    %52 = arith.addf %48, %51 : vector<8x512xf32>
    %53 = vector.extract_strided_slice %52 {offsets = [0, 0], sizes = [8, 128], strides = [1, 1]} : vector<8x512xf32> to vector<8x128xf32>
    %54 = arith.negf %53 : vector<8x128xf32>
    %55 = math.exp %54 : vector<8x128xf32>
    %cst_25 = arith.constant 1.000000e+00 : f32
    %56 = vector.broadcast %cst_25 : f32 to vector<8x128xf32>
    %57 = arith.addf %56, %55 : vector<8x128xf32>
    %58 = arith.divf %56, %57 : vector<8x128xf32>
    %59 = vector.extract_strided_slice %52 {offsets = [0, 128], sizes = [8, 128], strides = [1, 1]} : vector<8x512xf32> to vector<8x128xf32>
    %60 = arith.negf %59 : vector<8x128xf32>
    %61 = math.exp %60 : vector<8x128xf32>
    %cst_26 = arith.constant 1.000000e+00 : f32
    %62 = vector.broadcast %cst_26 : f32 to vector<8x128xf32>
    %63 = arith.addf %62, %61 : vector<8x128xf32>
    %64 = arith.divf %62, %63 : vector<8x128xf32>
    %65 = vector.extract_strided_slice %52 {offsets = [0, 256], sizes = [8, 128], strides = [1, 1]} : vector<8x512xf32> to vector<8x128xf32>
    %66 = math.tanh %65 : vector<8x128xf32>
    %67 = vector.extract_strided_slice %52 {offsets = [0, 384], sizes = [8, 128], strides = [1, 1]} : vector<8x512xf32> to vector<8x128xf32>
    %68 = arith.negf %67 : vector<8x128xf32>
    %69 = math.exp %68 : vector<8x128xf32>
    %cst_27 = arith.constant 1.000000e+00 : f32
    %70 = vector.broadcast %cst_27 : f32 to vector<8x128xf32>
    %71 = arith.addf %70, %69 : vector<8x128xf32>
    %72 = arith.divf %70, %71 : vector<8x128xf32>
    %73 = arith.mulf %64, %40 : vector<8x128xf32>
    %74 = arith.mulf %58, %66 : vector<8x128xf32>
    %75 = arith.addf %73, %74 : vector<8x128xf32>
    %76 = math.tanh %75 : vector<8x128xf32>
    %77 = arith.mulf %72, %76 : vector<8x128xf32>
    %78 = arith.index_cast %46 : i32 to index
    %c0_28 = arith.constant 0 : index
    %79 = vector.load %arg9[%78, %c0_28] : memref<64x128xf32, #tpu.memory_space<vmem>>, vector<8x128xf32>
    tpu.vector_store %arg9[%78, %c0_28], %77 {strides = array<i32>} : memref<64x128xf32, #tpu.memory_space<vmem>>, vector<8x128xf32>,
    %c2_i32 = arith.constant 2 : i32
    %c8_i32_29 = arith.constant 8 : i32
    %80 = arith.muli %c2_i32, %c8_i32_29 : i32
    %81 = tpu.assume_multiple %80, 8 : i32
    %82 = arith.index_cast %81 : i32 to index
    %c0_30 = arith.constant 0 : index
    %83 = vector.load %arg8[%82, %c0_30] : memref<64x512xf32, #tpu.memory_space<vmem>>, vector<8x512xf32>
    %c0_31 = arith.constant 0 : index
    %c0_32 = arith.constant 0 : index
    %c0_33 = arith.constant 0 : index
    %84 = vector.load %arg3[%c0_31, %c0_32, %c0_33] : memref<2x128x512xf32, #tpu.memory_space<vmem>>, vector<1x128x512xf32>
    %85 = vector.shape_cast %84 : vector<1x128x512xf32> to vector<128x512xf32>
    %cst_34 = arith.constant dense<0.000000e+00> : vector<8x512xf32>
    %86 = tpu.matmul %77, %85, %cst_34 {dimension_numbers = #tpu.dot_dimension_numbers<[1], [0], [0], [1], [0, 0, 1, 1], [], []>} : vector<8x128xf32>, vector<128x512xf32>, vector<8x512xf32> -> vector<8x512xf32>
    %87 = arith.addf %83, %86 : vector<8x512xf32>
    %88 = vector.extract_strided_slice %87 {offsets = [0, 0], sizes = [8, 128], strides = [1, 1]} : vector<8x512xf32> to vector<8x128xf32>
    %89 = arith.negf %88 : vector<8x128xf32>
    %90 = math.exp %89 : vector<8x128xf32>
    %cst_35 = arith.constant 1.000000e+00 : f32
    %91 = vector.broadcast %cst_35 : f32 to vector<8x128xf32>
    %92 = arith.addf %91, %90 : vector<8x128xf32>
    %93 = arith.divf %91, %92 : vector<8x128xf32>
    %94 = vector.extract_strided_slice %87 {offsets = [0, 128], sizes = [8, 128], strides = [1, 1]} : vector<8x512xf32> to vector<8x128xf32>
    %95 = arith.negf %94 : vector<8x128xf32>
    %96 = math.exp %95 : vector<8x128xf32>
    %cst_36 = arith.constant 1.000000e+00 : f32
    %97 = vector.broadcast %cst_36 : f32 to vector<8x128xf32>
    %98 = arith.addf %97, %96 : vector<8x128xf32>
    %99 = arith.divf %97, %98 : vector<8x128xf32>
    %100 = vector.extract_strided_slice %87 {offsets = [0, 256], sizes = [8, 128], strides = [1, 1]} : vector<8x512xf32> to vector<8x128xf32>
    %101 = math.tanh %100 : vector<8x128xf32>
    %102 = vector.extract_strided_slice %87 {offsets = [0, 384], sizes = [8, 128], strides = [1, 1]} : vector<8x512xf32> to vector<8x128xf32>
    %103 = arith.negf %102 : vector<8x128xf32>
    %104 = math.exp %103 : vector<8x128xf32>
    %cst_37 = arith.constant 1.000000e+00 : f32
    %105 = vector.broadcast %cst_37 : f32 to vector<8x128xf32>
    %106 = arith.addf %105, %104 : vector<8x128xf32>
    %107 = arith.divf %105, %106 : vector<8x128xf32>
    %108 = arith.mulf %99, %75 : vector<8x128xf32>
    %109 = arith.mulf %93, %101 : vector<8x128xf32>
    %110 = arith.addf %108, %109 : vector<8x128xf32>
    %111 = math.tanh %110 : vector<8x128xf32>
    %112 = arith.mulf %107, %111 : vector<8x128xf32>
    %113 = arith.index_cast %81 : i32 to index
    %c0_38 = arith.constant 0 : index
    %114 = vector.load %arg9[%113, %c0_38] : memref<64x128xf32, #tpu.memory_space<vmem>>, vector<8x128xf32>
    tpu.vector_store %arg9[%113, %c0_38], %112 {strides = array<i32>} : memref<64x128xf32, #tpu.memory_space<vmem>>, vector<8x128xf32>,
    %c3_i32 = arith.constant 3 : i32
    %c8_i32_39 = arith.constant 8 : i32
    %115 = arith.muli %c3_i32, %c8_i32_39 : i32
    %116 = tpu.assume_multiple %115, 8 : i32
    %117 = arith.index_cast %116 : i32 to index
    %c0_40 = arith.constant 0 : index
    %118 = vector.load %arg8[%117, %c0_40] : memref<64x512xf32, #tpu.memory_space<vmem>>, vector<8x512xf32>
    %c0_41 = arith.constant 0 : index
    %c0_42 = arith.constant 0 : index
    %c0_43 = arith.constant 0 : index
    %119 = vector.load %arg3[%c0_41, %c0_42, %c0_43] : memref<2x128x512xf32, #tpu.memory_space<vmem>>, vector<1x128x512xf32>
    %120 = vector.shape_cast %119 : vector<1x128x512xf32> to vector<128x512xf32>
    %cst_44 = arith.constant dense<0.000000e+00> : vector<8x512xf32>
    %121 = tpu.matmul %112, %120, %cst_44 {dimension_numbers = #tpu.dot_dimension_numbers<[1], [0], [0], [1], [0, 0, 1, 1], [], []>} : vector<8x128xf32>, vector<128x512xf32>, vector<8x512xf32> -> vector<8x512xf32>
    %122 = arith.addf %118, %121 : vector<8x512xf32>
    %123 = vector.extract_strided_slice %122 {offsets = [0, 0], sizes = [8, 128], strides = [1, 1]} : vector<8x512xf32> to vector<8x128xf32>
    %124 = arith.negf %123 : vector<8x128xf32>
    %125 = math.exp %124 : vector<8x128xf32>
    %cst_45 = arith.constant 1.000000e+00 : f32
    %126 = vector.broadcast %cst_45 : f32 to vector<8x128xf32>
    %127 = arith.addf %126, %125 : vector<8x128xf32>
    %128 = arith.divf %126, %127 : vector<8x128xf32>
    %129 = vector.extract_strided_slice %122 {offsets = [0, 128], sizes = [8, 128], strides = [1, 1]} : vector<8x512xf32> to vector<8x128xf32>
    %130 = arith.negf %129 : vector<8x128xf32>
    %131 = math.exp %130 : vector<8x128xf32>
    %cst_46 = arith.constant 1.000000e+00 : f32
    %132 = vector.broadcast %cst_46 : f32 to vector<8x128xf32>
    %133 = arith.addf %132, %131 : vector<8x128xf32>
    %134 = arith.divf %132, %133 : vector<8x128xf32>
    %135 = vector.extract_strided_slice %122 {offsets = [0, 256], sizes = [8, 128], strides = [1, 1]} : vector<8x512xf32> to vector<8x128xf32>
    %136 = math.tanh %135 : vector<8x128xf32>
    %137 = vector.extract_strided_slice %122 {offsets = [0, 384], sizes = [8, 128], strides = [1, 1]} : vector<8x512xf32> to vector<8x128xf32>
    %138 = arith.negf %137 : vector<8x128xf32>
    %139 = math.exp %138 : vector<8x128xf32>
    %cst_47 = arith.constant 1.000000e+00 : f32
    %140 = vector.broadcast %cst_47 : f32 to vector<8x128xf32>
    %141 = arith.addf %140, %139 : vector<8x128xf32>
    %142 = arith.divf %140, %141 : vector<8x128xf32>
    %143 = arith.mulf %134, %110 : vector<8x128xf32>
    %144 = arith.mulf %128, %136 : vector<8x128xf32>
    %145 = arith.addf %143, %144 : vector<8x128xf32>
    %146 = math.tanh %145 : vector<8x128xf32>
    %147 = arith.mulf %142, %146 : vector<8x128xf32>
    %148 = arith.index_cast %116 : i32 to index
    %c0_48 = arith.constant 0 : index
    %149 = vector.load %arg9[%148, %c0_48] : memref<64x128xf32, #tpu.memory_space<vmem>>, vector<8x128xf32>
    tpu.vector_store %arg9[%148, %c0_48], %147 {strides = array<i32>} : memref<64x128xf32, #tpu.memory_space<vmem>>, vector<8x128xf32>,
    %c4_i32 = arith.constant 4 : i32
    %c8_i32_49 = arith.constant 8 : i32
    %150 = arith.muli %c4_i32, %c8_i32_49 : i32
    %151 = tpu.assume_multiple %150, 8 : i32
    %152 = arith.index_cast %151 : i32 to index
    %c0_50 = arith.constant 0 : index
    %153 = vector.load %arg8[%152, %c0_50] : memref<64x512xf32, #tpu.memory_space<vmem>>, vector<8x512xf32>
    %c0_51 = arith.constant 0 : index
    %c0_52 = arith.constant 0 : index
    %c0_53 = arith.constant 0 : index
    %154 = vector.load %arg3[%c0_51, %c0_52, %c0_53] : memref<2x128x512xf32, #tpu.memory_space<vmem>>, vector<1x128x512xf32>
    %155 = vector.shape_cast %154 : vector<1x128x512xf32> to vector<128x512xf32>
    %cst_54 = arith.constant dense<0.000000e+00> : vector<8x512xf32>
    %156 = tpu.matmul %147, %155, %cst_54 {dimension_numbers = #tpu.dot_dimension_numbers<[1], [0], [0], [1], [0, 0, 1, 1], [], []>} : vector<8x128xf32>, vector<128x512xf32>, vector<8x512xf32> -> vector<8x512xf32>
    %157 = arith.addf %153, %156 : vector<8x512xf32>
    %158 = vector.extract_strided_slice %157 {offsets = [0, 0], sizes = [8, 128], strides = [1, 1]} : vector<8x512xf32> to vector<8x128xf32>
    %159 = arith.negf %158 : vector<8x128xf32>
    %160 = math.exp %159 : vector<8x128xf32>
    %cst_55 = arith.constant 1.000000e+00 : f32
    %161 = vector.broadcast %cst_55 : f32 to vector<8x128xf32>
    %162 = arith.addf %161, %160 : vector<8x128xf32>
    %163 = arith.divf %161, %162 : vector<8x128xf32>
    %164 = vector.extract_strided_slice %157 {offsets = [0, 128], sizes = [8, 128], strides = [1, 1]} : vector<8x512xf32> to vector<8x128xf32>
    %165 = arith.negf %164 : vector<8x128xf32>
    %166 = math.exp %165 : vector<8x128xf32>
    %cst_56 = arith.constant 1.000000e+00 : f32
    %167 = vector.broadcast %cst_56 : f32 to vector<8x128xf32>
    %168 = arith.addf %167, %166 : vector<8x128xf32>
    %169 = arith.divf %167, %168 : vector<8x128xf32>
    %170 = vector.extract_strided_slice %157 {offsets = [0, 256], sizes = [8, 128], strides = [1, 1]} : vector<8x512xf32> to vector<8x128xf32>
    %171 = math.tanh %170 : vector<8x128xf32>
    %172 = vector.extract_strided_slice %157 {offsets = [0, 384], sizes = [8, 128], strides = [1, 1]} : vector<8x512xf32> to vector<8x128xf32>
    %173 = arith.negf %172 : vector<8x128xf32>
    %174 = math.exp %173 : vector<8x128xf32>
    %cst_57 = arith.constant 1.000000e+00 : f32
    %175 = vector.broadcast %cst_57 : f32 to vector<8x128xf32>
    %176 = arith.addf %175, %174 : vector<8x128xf32>
    %177 = arith.divf %175, %176 : vector<8x128xf32>
    %178 = arith.mulf %169, %145 : vector<8x128xf32>
    %179 = arith.mulf %163, %171 : vector<8x128xf32>
    %180 = arith.addf %178, %179 : vector<8x128xf32>
    %181 = math.tanh %180 : vector<8x128xf32>
    %182 = arith.mulf %177, %181 : vector<8x128xf32>
    %183 = arith.index_cast %151 : i32 to index
    %c0_58 = arith.constant 0 : index
    %184 = vector.load %arg9[%183, %c0_58] : memref<64x128xf32, #tpu.memory_space<vmem>>, vector<8x128xf32>
    tpu.vector_store %arg9[%183, %c0_58], %182 {strides = array<i32>} : memref<64x128xf32, #tpu.memory_space<vmem>>, vector<8x128xf32>,
    %c5_i32 = arith.constant 5 : i32
    %c8_i32_59 = arith.constant 8 : i32
    %185 = arith.muli %c5_i32, %c8_i32_59 : i32
    %186 = tpu.assume_multiple %185, 8 : i32
    %187 = arith.index_cast %186 : i32 to index
    %c0_60 = arith.constant 0 : index
    %188 = vector.load %arg8[%187, %c0_60] : memref<64x512xf32, #tpu.memory_space<vmem>>, vector<8x512xf32>
    %c0_61 = arith.constant 0 : index
    %c0_62 = arith.constant 0 : index
    %c0_63 = arith.constant 0 : index
    %189 = vector.load %arg3[%c0_61, %c0_62, %c0_63] : memref<2x128x512xf32, #tpu.memory_space<vmem>>, vector<1x128x512xf32>
    %190 = vector.shape_cast %189 : vector<1x128x512xf32> to vector<128x512xf32>
    %cst_64 = arith.constant dense<0.000000e+00> : vector<8x512xf32>
    %191 = tpu.matmul %182, %190, %cst_64 {dimension_numbers = #tpu.dot_dimension_numbers<[1], [0], [0], [1], [0, 0, 1, 1], [], []>} : vector<8x128xf32>, vector<128x512xf32>, vector<8x512xf32> -> vector<8x512xf32>
    %192 = arith.addf %188, %191 : vector<8x512xf32>
    %193 = vector.extract_strided_slice %192 {offsets = [0, 0], sizes = [8, 128], strides = [1, 1]} : vector<8x512xf32> to vector<8x128xf32>
    %194 = arith.negf %193 : vector<8x128xf32>
    %195 = math.exp %194 : vector<8x128xf32>
    %cst_65 = arith.constant 1.000000e+00 : f32
    %196 = vector.broadcast %cst_65 : f32 to vector<8x128xf32>
    %197 = arith.addf %196, %195 : vector<8x128xf32>
    %198 = arith.divf %196, %197 : vector<8x128xf32>
    %199 = vector.extract_strided_slice %192 {offsets = [0, 128], sizes = [8, 128], strides = [1, 1]} : vector<8x512xf32> to vector<8x128xf32>
    %200 = arith.negf %199 : vector<8x128xf32>
    %201 = math.exp %200 : vector<8x128xf32>
    %cst_66 = arith.constant 1.000000e+00 : f32
    %202 = vector.broadcast %cst_66 : f32 to vector<8x128xf32>
    %203 = arith.addf %202, %201 : vector<8x128xf32>
    %204 = arith.divf %202, %203 : vector<8x128xf32>
    %205 = vector.extract_strided_slice %192 {offsets = [0, 256], sizes = [8, 128], strides = [1, 1]} : vector<8x512xf32> to vector<8x128xf32>
    %206 = math.tanh %205 : vector<8x128xf32>
    %207 = vector.extract_strided_slice %192 {offsets = [0, 384], sizes = [8, 128], strides = [1, 1]} : vector<8x512xf32> to vector<8x128xf32>
    %208 = arith.negf %207 : vector<8x128xf32>
    %209 = math.exp %208 : vector<8x128xf32>
    %cst_67 = arith.constant 1.000000e+00 : f32
    %210 = vector.broadcast %cst_67 : f32 to vector<8x128xf32>
    %211 = arith.addf %210, %209 : vector<8x128xf32>
    %212 = arith.divf %210, %211 : vector<8x128xf32>
    %213 = arith.mulf %204, %180 : vector<8x128xf32>
    %214 = arith.mulf %198, %206 : vector<8x128xf32>
    %215 = arith.addf %213, %214 : vector<8x128xf32>
    %216 = math.tanh %215 : vector<8x128xf32>
    %217 = arith.mulf %212, %216 : vector<8x128xf32>
    %218 = arith.index_cast %186 : i32 to index
    %c0_68 = arith.constant 0 : index
    %219 = vector.load %arg9[%218, %c0_68] : memref<64x128xf32, #tpu.memory_space<vmem>>, vector<8x128xf32>
    tpu.vector_store %arg9[%218, %c0_68], %217 {strides = array<i32>} : memref<64x128xf32, #tpu.memory_space<vmem>>, vector<8x128xf32>,
    %c6_i32 = arith.constant 6 : i32
    %c8_i32_69 = arith.constant 8 : i32
    %220 = arith.muli %c6_i32, %c8_i32_69 : i32
    %221 = tpu.assume_multiple %220, 8 : i32
    %222 = arith.index_cast %221 : i32 to index
    %c0_70 = arith.constant 0 : index
    %223 = vector.load %arg8[%222, %c0_70] : memref<64x512xf32, #tpu.memory_space<vmem>>, vector<8x512xf32>
    %c0_71 = arith.constant 0 : index
    %c0_72 = arith.constant 0 : index
    %c0_73 = arith.constant 0 : index
    %224 = vector.load %arg3[%c0_71, %c0_72, %c0_73] : memref<2x128x512xf32, #tpu.memory_space<vmem>>, vector<1x128x512xf32>
    %225 = vector.shape_cast %224 : vector<1x128x512xf32> to vector<128x512xf32>
    %cst_74 = arith.constant dense<0.000000e+00> : vector<8x512xf32>
    %226 = tpu.matmul %217, %225, %cst_74 {dimension_numbers = #tpu.dot_dimension_numbers<[1], [0], [0], [1], [0, 0, 1, 1], [], []>} : vector<8x128xf32>, vector<128x512xf32>, vector<8x512xf32> -> vector<8x512xf32>
    %227 = arith.addf %223, %226 : vector<8x512xf32>
    %228 = vector.extract_strided_slice %227 {offsets = [0, 0], sizes = [8, 128], strides = [1, 1]} : vector<8x512xf32> to vector<8x128xf32>
    %229 = arith.negf %228 : vector<8x128xf32>
    %230 = math.exp %229 : vector<8x128xf32>
    %cst_75 = arith.constant 1.000000e+00 : f32
    %231 = vector.broadcast %cst_75 : f32 to vector<8x128xf32>
    %232 = arith.addf %231, %230 : vector<8x128xf32>
    %233 = arith.divf %231, %232 : vector<8x128xf32>
    %234 = vector.extract_strided_slice %227 {offsets = [0, 128], sizes = [8, 128], strides = [1, 1]} : vector<8x512xf32> to vector<8x128xf32>
    %235 = arith.negf %234 : vector<8x128xf32>
    %236 = math.exp %235 : vector<8x128xf32>
    %cst_76 = arith.constant 1.000000e+00 : f32
    %237 = vector.broadcast %cst_76 : f32 to vector<8x128xf32>
    %238 = arith.addf %237, %236 : vector<8x128xf32>
    %239 = arith.divf %237, %238 : vector<8x128xf32>
    %240 = vector.extract_strided_slice %227 {offsets = [0, 256], sizes = [8, 128], strides = [1, 1]} : vector<8x512xf32> to vector<8x128xf32>
    %241 = math.tanh %240 : vector<8x128xf32>
    %242 = vector.extract_strided_slice %227 {offsets = [0, 384], sizes = [8, 128], strides = [1, 1]} : vector<8x512xf32> to vector<8x128xf32>
    %243 = arith.negf %242 : vector<8x128xf32>
    %244 = math.exp %243 : vector<8x128xf32>
    %cst_77 = arith.constant 1.000000e+00 : f32
    %245 = vector.broadcast %cst_77 : f32 to vector<8x128xf32>
    %246 = arith.addf %245, %244 : vector<8x128xf32>
    %247 = arith.divf %245, %246 : vector<8x128xf32>
    %248 = arith.mulf %239, %215 : vector<8x128xf32>
    %249 = arith.mulf %233, %241 : vector<8x128xf32>
    %250 = arith.addf %248, %249 : vector<8x128xf32>
    %251 = math.tanh %250 : vector<8x128xf32>
    %252 = arith.mulf %247, %251 : vector<8x128xf32>
    %253 = arith.index_cast %221 : i32 to index
    %c0_78 = arith.constant 0 : index
    %254 = vector.load %arg9[%253, %c0_78] : memref<64x128xf32, #tpu.memory_space<vmem>>, vector<8x128xf32>
    tpu.vector_store %arg9[%253, %c0_78], %252 {strides = array<i32>} : memref<64x128xf32, #tpu.memory_space<vmem>>, vector<8x128xf32>,
    %c7_i32 = arith.constant 7 : i32
    %c8_i32_79 = arith.constant 8 : i32
    %255 = arith.muli %c7_i32, %c8_i32_79 : i32
    %256 = tpu.assume_multiple %255, 8 : i32
    %257 = arith.index_cast %256 : i32 to index
    %c0_80 = arith.constant 0 : index
    %258 = vector.load %arg8[%257, %c0_80] : memref<64x512xf32, #tpu.memory_space<vmem>>, vector<8x512xf32>
    %c0_81 = arith.constant 0 : index
    %c0_82 = arith.constant 0 : index
    %c0_83 = arith.constant 0 : index
    %259 = vector.load %arg3[%c0_81, %c0_82, %c0_83] : memref<2x128x512xf32, #tpu.memory_space<vmem>>, vector<1x128x512xf32>
    %260 = vector.shape_cast %259 : vector<1x128x512xf32> to vector<128x512xf32>
    %cst_84 = arith.constant dense<0.000000e+00> : vector<8x512xf32>
    %261 = tpu.matmul %252, %260, %cst_84 {dimension_numbers = #tpu.dot_dimension_numbers<[1], [0], [0], [1], [0, 0, 1, 1], [], []>} : vector<8x128xf32>, vector<128x512xf32>, vector<8x512xf32> -> vector<8x512xf32>
    %262 = arith.addf %258, %261 : vector<8x512xf32>
    %263 = vector.extract_strided_slice %262 {offsets = [0, 0], sizes = [8, 128], strides = [1, 1]} : vector<8x512xf32> to vector<8x128xf32>
    %264 = arith.negf %263 : vector<8x128xf32>
    %265 = math.exp %264 : vector<8x128xf32>
    %cst_85 = arith.constant 1.000000e+00 : f32
    %266 = vector.broadcast %cst_85 : f32 to vector<8x128xf32>
    %267 = arith.addf %266, %265 : vector<8x128xf32>
    %268 = arith.divf %266, %267 : vector<8x128xf32>
    %269 = vector.extract_strided_slice %262 {offsets = [0, 128], sizes = [8, 128], strides = [1, 1]} : vector<8x512xf32> to vector<8x128xf32>
    %270 = arith.negf %269 : vector<8x128xf32>
    %271 = math.exp %270 : vector<8x128xf32>
    %cst_86 = arith.constant 1.000000e+00 : f32
    %272 = vector.broadcast %cst_86 : f32 to vector<8x128xf32>
    %273 = arith.addf %272, %271 : vector<8x128xf32>
    %274 = arith.divf %272, %273 : vector<8x128xf32>
    %275 = vector.extract_strided_slice %262 {offsets = [0, 256], sizes = [8, 128], strides = [1, 1]} : vector<8x512xf32> to vector<8x128xf32>
    %276 = math.tanh %275 : vector<8x128xf32>
    %277 = vector.extract_strided_slice %262 {offsets = [0, 384], sizes = [8, 128], strides = [1, 1]} : vector<8x512xf32> to vector<8x128xf32>
    %278 = arith.negf %277 : vector<8x128xf32>
    %279 = math.exp %278 : vector<8x128xf32>
    %cst_87 = arith.constant 1.000000e+00 : f32
    %280 = vector.broadcast %cst_87 : f32 to vector<8x128xf32>
    %281 = arith.addf %280, %279 : vector<8x128xf32>
    %282 = arith.divf %280, %281 : vector<8x128xf32>
    %283 = arith.mulf %274, %250 : vector<8x128xf32>
    %284 = arith.mulf %268, %276 : vector<8x128xf32>
    %285 = arith.addf %283, %284 : vector<8x128xf32>
    %286 = math.tanh %285 : vector<8x128xf32>
    %287 = arith.mulf %282, %286 : vector<8x128xf32>
    %288 = arith.index_cast %256 : i32 to index
    %c0_88 = arith.constant 0 : index
    %289 = vector.load %arg9[%288, %c0_88] : memref<64x128xf32, #tpu.memory_space<vmem>>, vector<8x128xf32>
    tpu.vector_store %arg9[%288, %c0_88], %287 {strides = array<i32>} : memref<64x128xf32, #tpu.memory_space<vmem>>, vector<8x128xf32>,
    %c8_i32_89 = arith.constant 8 : i32
    %c0_90 = arith.constant 0 : index
    %c0_91 = arith.constant 0 : index
    %290 = vector.load %arg9[%c0_90, %c0_91] : memref<64x128xf32, #tpu.memory_space<vmem>>, vector<64x128xf32>
    %c1 = arith.constant 1 : index
    %c0_92 = arith.constant 0 : index
    %c0_93 = arith.constant 0 : index
    %291 = vector.load %arg2[%c1, %c0_92, %c0_93] : memref<2x128x512xf32, #tpu.memory_space<vmem>>, vector<1x128x512xf32>
    %292 = vector.shape_cast %291 : vector<1x128x512xf32> to vector<128x512xf32>
    %cst_94 = arith.constant dense<0.000000e+00> : vector<64x512xf32>
    %293 = tpu.matmul %290, %292, %cst_94 {dimension_numbers = #tpu.dot_dimension_numbers<[1], [0], [0], [1], [0, 0, 1, 1], [], []>} : vector<64x128xf32>, vector<128x512xf32>, vector<64x512xf32> -> vector<64x512xf32>
    %c1_95 = arith.constant 1 : index
    %c0_96 = arith.constant 0 : index
    %c0_97 = arith.constant 0 : index
    %294 = vector.load %arg4[%c1_95, %c0_96, %c0_97] : memref<2x1x512xf32, #tpu.memory_space<vmem>>, vector<1x1x512xf32>
    %295 = vector.shape_cast %294 : vector<1x1x512xf32> to vector<1x512xf32>
    %296 = vector.broadcast %295 : vector<1x512xf32> to vector<64x512xf32>
    %297 = arith.addf %293, %296 : vector<64x512xf32>
    %c0_98 = arith.constant 0 : index
    %c0_99 = arith.constant 0 : index
    %298 = vector.load %arg8[%c0_98, %c0_99] : memref<64x512xf32, #tpu.memory_space<vmem>>, vector<64x512xf32>
    tpu.vector_store %arg8[%c0_98, %c0_99], %297 {strides = array<i32>} : memref<64x512xf32, #tpu.memory_space<vmem>>, vector<64x512xf32>,
    %cst_100 = arith.constant 0.000000e+00 : f32
    %299 = vector.broadcast %cst_100 : f32 to vector<8x128xf32>
    %c0_i32_101 = arith.constant 0 : i32
    %c8_i32_102 = arith.constant 8 : i32
    %300 = arith.muli %c0_i32_101, %c8_i32_102 : i32
    %301 = tpu.assume_multiple %300, 8 : i32
    %302 = arith.index_cast %301 : i32 to index
    %c0_103 = arith.constant 0 : index
    %303 = vector.load %arg8[%302, %c0_103] : memref<64x512xf32, #tpu.memory_space<vmem>>, vector<8x512xf32>
    %c1_104 = arith.constant 1 : index
    %c0_105 = arith.constant 0 : index
    %c0_106 = arith.constant 0 : index
    %304 = vector.load %arg3[%c1_104, %c0_105, %c0_106] : memref<2x128x512xf32, #tpu.memory_space<vmem>>, vector<1x128x512xf32>
    %305 = vector.shape_cast %304 : vector<1x128x512xf32> to vector<128x512xf32>
    %cst_107 = arith.constant dense<0.000000e+00> : vector<8x512xf32>
    %306 = tpu.matmul %299, %305, %cst_107 {dimension_numbers = #tpu.dot_dimension_numbers<[1], [0], [0], [1], [0, 0, 1, 1], [], []>} : vector<8x128xf32>, vector<128x512xf32>, vector<8x512xf32> -> vector<8x512xf32>
    %307 = arith.addf %303, %306 : vector<8x512xf32>
    %308 = vector.extract_strided_slice %307 {offsets = [0, 0], sizes = [8, 128], strides = [1, 1]} : vector<8x512xf32> to vector<8x128xf32>
    %309 = arith.negf %308 : vector<8x128xf32>
    %310 = math.exp %309 : vector<8x128xf32>
    %cst_108 = arith.constant 1.000000e+00 : f32
    %311 = vector.broadcast %cst_108 : f32 to vector<8x128xf32>
    %312 = arith.addf %311, %310 : vector<8x128xf32>
    %313 = arith.divf %311, %312 : vector<8x128xf32>
    %314 = vector.extract_strided_slice %307 {offsets = [0, 128], sizes = [8, 128], strides = [1, 1]} : vector<8x512xf32> to vector<8x128xf32>
    %315 = arith.negf %314 : vector<8x128xf32>
    %316 = math.exp %315 : vector<8x128xf32>
    %cst_109 = arith.constant 1.000000e+00 : f32
    %317 = vector.broadcast %cst_109 : f32 to vector<8x128xf32>
    %318 = arith.addf %317, %316 : vector<8x128xf32>
    %319 = arith.divf %317, %318 : vector<8x128xf32>
    %320 = vector.extract_strided_slice %307 {offsets = [0, 256], sizes = [8, 128], strides = [1, 1]} : vector<8x512xf32> to vector<8x128xf32>
    %321 = math.tanh %320 : vector<8x128xf32>
    %322 = vector.extract_strided_slice %307 {offsets = [0, 384], sizes = [8, 128], strides = [1, 1]} : vector<8x512xf32> to vector<8x128xf32>
    %323 = arith.negf %322 : vector<8x128xf32>
    %324 = math.exp %323 : vector<8x128xf32>
    %cst_110 = arith.constant 1.000000e+00 : f32
    %325 = vector.broadcast %cst_110 : f32 to vector<8x128xf32>
    %326 = arith.addf %325, %324 : vector<8x128xf32>
    %327 = arith.divf %325, %326 : vector<8x128xf32>
    %328 = arith.mulf %319, %299 : vector<8x128xf32>
    %329 = arith.mulf %313, %321 : vector<8x128xf32>
    %330 = arith.addf %328, %329 : vector<8x128xf32>
    %331 = math.tanh %330 : vector<8x128xf32>
    %332 = arith.mulf %327, %331 : vector<8x128xf32>
    %333 = arith.index_cast %301 : i32 to index
    %c0_111 = arith.constant 0 : index
    %334 = vector.load %arg9[%333, %c0_111] : memref<64x128xf32, #tpu.memory_space<vmem>>, vector<8x128xf32>
    tpu.vector_store %arg9[%333, %c0_111], %332 {strides = array<i32>} : memref<64x128xf32, #tpu.memory_space<vmem>>, vector<8x128xf32>,
    %c1_i32_112 = arith.constant 1 : i32
    %c8_i32_113 = arith.constant 8 : i32
    %335 = arith.muli %c1_i32_112, %c8_i32_113 : i32
    %336 = tpu.assume_multiple %335, 8 : i32
    %337 = arith.index_cast %336 : i32 to index
    %c0_114 = arith.constant 0 : index
    %338 = vector.load %arg8[%337, %c0_114] : memref<64x512xf32, #tpu.memory_space<vmem>>, vector<8x512xf32>
    %c1_115 = arith.constant 1 : index
    %c0_116 = arith.constant 0 : index
    %c0_117 = arith.constant 0 : index
    %339 = vector.load %arg3[%c1_115, %c0_116, %c0_117] : memref<2x128x512xf32, #tpu.memory_space<vmem>>, vector<1x128x512xf32>
    %340 = vector.shape_cast %339 : vector<1x128x512xf32> to vector<128x512xf32>
    %cst_118 = arith.constant dense<0.000000e+00> : vector<8x512xf32>
    %341 = tpu.matmul %332, %340, %cst_118 {dimension_numbers = #tpu.dot_dimension_numbers<[1], [0], [0], [1], [0, 0, 1, 1], [], []>} : vector<8x128xf32>, vector<128x512xf32>, vector<8x512xf32> -> vector<8x512xf32>
    %342 = arith.addf %338, %341 : vector<8x512xf32>
    %343 = vector.extract_strided_slice %342 {offsets = [0, 0], sizes = [8, 128], strides = [1, 1]} : vector<8x512xf32> to vector<8x128xf32>
    %344 = arith.negf %343 : vector<8x128xf32>
    %345 = math.exp %344 : vector<8x128xf32>
    %cst_119 = arith.constant 1.000000e+00 : f32
    %346 = vector.broadcast %cst_119 : f32 to vector<8x128xf32>
    %347 = arith.addf %346, %345 : vector<8x128xf32>
    %348 = arith.divf %346, %347 : vector<8x128xf32>
    %349 = vector.extract_strided_slice %342 {offsets = [0, 128], sizes = [8, 128], strides = [1, 1]} : vector<8x512xf32> to vector<8x128xf32>
    %350 = arith.negf %349 : vector<8x128xf32>
    %351 = math.exp %350 : vector<8x128xf32>
    %cst_120 = arith.constant 1.000000e+00 : f32
    %352 = vector.broadcast %cst_120 : f32 to vector<8x128xf32>
    %353 = arith.addf %352, %351 : vector<8x128xf32>
    %354 = arith.divf %352, %353 : vector<8x128xf32>
    %355 = vector.extract_strided_slice %342 {offsets = [0, 256], sizes = [8, 128], strides = [1, 1]} : vector<8x512xf32> to vector<8x128xf32>
    %356 = math.tanh %355 : vector<8x128xf32>
    %357 = vector.extract_strided_slice %342 {offsets = [0, 384], sizes = [8, 128], strides = [1, 1]} : vector<8x512xf32> to vector<8x128xf32>
    %358 = arith.negf %357 : vector<8x128xf32>
    %359 = math.exp %358 : vector<8x128xf32>
    %cst_121 = arith.constant 1.000000e+00 : f32
    %360 = vector.broadcast %cst_121 : f32 to vector<8x128xf32>
    %361 = arith.addf %360, %359 : vector<8x128xf32>
    %362 = arith.divf %360, %361 : vector<8x128xf32>
    %363 = arith.mulf %354, %330 : vector<8x128xf32>
    %364 = arith.mulf %348, %356 : vector<8x128xf32>
    %365 = arith.addf %363, %364 : vector<8x128xf32>
    %366 = math.tanh %365 : vector<8x128xf32>
    %367 = arith.mulf %362, %366 : vector<8x128xf32>
    %368 = arith.index_cast %336 : i32 to index
    %c0_122 = arith.constant 0 : index
    %369 = vector.load %arg9[%368, %c0_122] : memref<64x128xf32, #tpu.memory_space<vmem>>, vector<8x128xf32>
    tpu.vector_store %arg9[%368, %c0_122], %367 {strides = array<i32>} : memref<64x128xf32, #tpu.memory_space<vmem>>, vector<8x128xf32>,
    %c2_i32_123 = arith.constant 2 : i32
    %c8_i32_124 = arith.constant 8 : i32
    %370 = arith.muli %c2_i32_123, %c8_i32_124 : i32
    %371 = tpu.assume_multiple %370, 8 : i32
    %372 = arith.index_cast %371 : i32 to index
    %c0_125 = arith.constant 0 : index
    %373 = vector.load %arg8[%372, %c0_125] : memref<64x512xf32, #tpu.memory_space<vmem>>, vector<8x512xf32>
    %c1_126 = arith.constant 1 : index
    %c0_127 = arith.constant 0 : index
    %c0_128 = arith.constant 0 : index
    %374 = vector.load %arg3[%c1_126, %c0_127, %c0_128] : memref<2x128x512xf32, #tpu.memory_space<vmem>>, vector<1x128x512xf32>
    %375 = vector.shape_cast %374 : vector<1x128x512xf32> to vector<128x512xf32>
    %cst_129 = arith.constant dense<0.000000e+00> : vector<8x512xf32>
    %376 = tpu.matmul %367, %375, %cst_129 {dimension_numbers = #tpu.dot_dimension_numbers<[1], [0], [0], [1], [0, 0, 1, 1], [], []>} : vector<8x128xf32>, vector<128x512xf32>, vector<8x512xf32> -> vector<8x512xf32>
    %377 = arith.addf %373, %376 : vector<8x512xf32>
    %378 = vector.extract_strided_slice %377 {offsets = [0, 0], sizes = [8, 128], strides = [1, 1]} : vector<8x512xf32> to vector<8x128xf32>
    %379 = arith.negf %378 : vector<8x128xf32>
    %380 = math.exp %379 : vector<8x128xf32>
    %cst_130 = arith.constant 1.000000e+00 : f32
    %381 = vector.broadcast %cst_130 : f32 to vector<8x128xf32>
    %382 = arith.addf %381, %380 : vector<8x128xf32>
    %383 = arith.divf %381, %382 : vector<8x128xf32>
    %384 = vector.extract_strided_slice %377 {offsets = [0, 128], sizes = [8, 128], strides = [1, 1]} : vector<8x512xf32> to vector<8x128xf32>
    %385 = arith.negf %384 : vector<8x128xf32>
    %386 = math.exp %385 : vector<8x128xf32>
    %cst_131 = arith.constant 1.000000e+00 : f32
    %387 = vector.broadcast %cst_131 : f32 to vector<8x128xf32>
    %388 = arith.addf %387, %386 : vector<8x128xf32>
    %389 = arith.divf %387, %388 : vector<8x128xf32>
    %390 = vector.extract_strided_slice %377 {offsets = [0, 256], sizes = [8, 128], strides = [1, 1]} : vector<8x512xf32> to vector<8x128xf32>
    %391 = math.tanh %390 : vector<8x128xf32>
    %392 = vector.extract_strided_slice %377 {offsets = [0, 384], sizes = [8, 128], strides = [1, 1]} : vector<8x512xf32> to vector<8x128xf32>
    %393 = arith.negf %392 : vector<8x128xf32>
    %394 = math.exp %393 : vector<8x128xf32>
    %cst_132 = arith.constant 1.000000e+00 : f32
    %395 = vector.broadcast %cst_132 : f32 to vector<8x128xf32>
    %396 = arith.addf %395, %394 : vector<8x128xf32>
    %397 = arith.divf %395, %396 : vector<8x128xf32>
    %398 = arith.mulf %389, %365 : vector<8x128xf32>
    %399 = arith.mulf %383, %391 : vector<8x128xf32>
    %400 = arith.addf %398, %399 : vector<8x128xf32>
    %401 = math.tanh %400 : vector<8x128xf32>
    %402 = arith.mulf %397, %401 : vector<8x128xf32>
    %403 = arith.index_cast %371 : i32 to index
    %c0_133 = arith.constant 0 : index
    %404 = vector.load %arg9[%403, %c0_133] : memref<64x128xf32, #tpu.memory_space<vmem>>, vector<8x128xf32>
    tpu.vector_store %arg9[%403, %c0_133], %402 {strides = array<i32>} : memref<64x128xf32, #tpu.memory_space<vmem>>, vector<8x128xf32>,
    %c3_i32_134 = arith.constant 3 : i32
    %c8_i32_135 = arith.constant 8 : i32
    %405 = arith.muli %c3_i32_134, %c8_i32_135 : i32
    %406 = tpu.assume_multiple %405, 8 : i32
    %407 = arith.index_cast %406 : i32 to index
    %c0_136 = arith.constant 0 : index
    %408 = vector.load %arg8[%407, %c0_136] : memref<64x512xf32, #tpu.memory_space<vmem>>, vector<8x512xf32>
    %c1_137 = arith.constant 1 : index
    %c0_138 = arith.constant 0 : index
    %c0_139 = arith.constant 0 : index
    %409 = vector.load %arg3[%c1_137, %c0_138, %c0_139] : memref<2x128x512xf32, #tpu.memory_space<vmem>>, vector<1x128x512xf32>
    %410 = vector.shape_cast %409 : vector<1x128x512xf32> to vector<128x512xf32>
    %cst_140 = arith.constant dense<0.000000e+00> : vector<8x512xf32>
    %411 = tpu.matmul %402, %410, %cst_140 {dimension_numbers = #tpu.dot_dimension_numbers<[1], [0], [0], [1], [0, 0, 1, 1], [], []>} : vector<8x128xf32>, vector<128x512xf32>, vector<8x512xf32> -> vector<8x512xf32>
    %412 = arith.addf %408, %411 : vector<8x512xf32>
    %413 = vector.extract_strided_slice %412 {offsets = [0, 0], sizes = [8, 128], strides = [1, 1]} : vector<8x512xf32> to vector<8x128xf32>
    %414 = arith.negf %413 : vector<8x128xf32>
    %415 = math.exp %414 : vector<8x128xf32>
    %cst_141 = arith.constant 1.000000e+00 : f32
    %416 = vector.broadcast %cst_141 : f32 to vector<8x128xf32>
    %417 = arith.addf %416, %415 : vector<8x128xf32>
    %418 = arith.divf %416, %417 : vector<8x128xf32>
    %419 = vector.extract_strided_slice %412 {offsets = [0, 128], sizes = [8, 128], strides = [1, 1]} : vector<8x512xf32> to vector<8x128xf32>
    %420 = arith.negf %419 : vector<8x128xf32>
    %421 = math.exp %420 : vector<8x128xf32>
    %cst_142 = arith.constant 1.000000e+00 : f32
    %422 = vector.broadcast %cst_142 : f32 to vector<8x128xf32>
    %423 = arith.addf %422, %421 : vector<8x128xf32>
    %424 = arith.divf %422, %423 : vector<8x128xf32>
    %425 = vector.extract_strided_slice %412 {offsets = [0, 256], sizes = [8, 128], strides = [1, 1]} : vector<8x512xf32> to vector<8x128xf32>
    %426 = math.tanh %425 : vector<8x128xf32>
    %427 = vector.extract_strided_slice %412 {offsets = [0, 384], sizes = [8, 128], strides = [1, 1]} : vector<8x512xf32> to vector<8x128xf32>
    %428 = arith.negf %427 : vector<8x128xf32>
    %429 = math.exp %428 : vector<8x128xf32>
    %cst_143 = arith.constant 1.000000e+00 : f32
    %430 = vector.broadcast %cst_143 : f32 to vector<8x128xf32>
    %431 = arith.addf %430, %429 : vector<8x128xf32>
    %432 = arith.divf %430, %431 : vector<8x128xf32>
    %433 = arith.mulf %424, %400 : vector<8x128xf32>
    %434 = arith.mulf %418, %426 : vector<8x128xf32>
    %435 = arith.addf %433, %434 : vector<8x128xf32>
    %436 = math.tanh %435 : vector<8x128xf32>
    %437 = arith.mulf %432, %436 : vector<8x128xf32>
    %438 = arith.index_cast %406 : i32 to index
    %c0_144 = arith.constant 0 : index
    %439 = vector.load %arg9[%438, %c0_144] : memref<64x128xf32, #tpu.memory_space<vmem>>, vector<8x128xf32>
    tpu.vector_store %arg9[%438, %c0_144], %437 {strides = array<i32>} : memref<64x128xf32, #tpu.memory_space<vmem>>, vector<8x128xf32>,
    %c4_i32_145 = arith.constant 4 : i32
    %c8_i32_146 = arith.constant 8 : i32
    %440 = arith.muli %c4_i32_145, %c8_i32_146 : i32
    %441 = tpu.assume_multiple %440, 8 : i32
    %442 = arith.index_cast %441 : i32 to index
    %c0_147 = arith.constant 0 : index
    %443 = vector.load %arg8[%442, %c0_147] : memref<64x512xf32, #tpu.memory_space<vmem>>, vector<8x512xf32>
    %c1_148 = arith.constant 1 : index
    %c0_149 = arith.constant 0 : index
    %c0_150 = arith.constant 0 : index
    %444 = vector.load %arg3[%c1_148, %c0_149, %c0_150] : memref<2x128x512xf32, #tpu.memory_space<vmem>>, vector<1x128x512xf32>
    %445 = vector.shape_cast %444 : vector<1x128x512xf32> to vector<128x512xf32>
    %cst_151 = arith.constant dense<0.000000e+00> : vector<8x512xf32>
    %446 = tpu.matmul %437, %445, %cst_151 {dimension_numbers = #tpu.dot_dimension_numbers<[1], [0], [0], [1], [0, 0, 1, 1], [], []>} : vector<8x128xf32>, vector<128x512xf32>, vector<8x512xf32> -> vector<8x512xf32>
    %447 = arith.addf %443, %446 : vector<8x512xf32>
    %448 = vector.extract_strided_slice %447 {offsets = [0, 0], sizes = [8, 128], strides = [1, 1]} : vector<8x512xf32> to vector<8x128xf32>
    %449 = arith.negf %448 : vector<8x128xf32>
    %450 = math.exp %449 : vector<8x128xf32>
    %cst_152 = arith.constant 1.000000e+00 : f32
    %451 = vector.broadcast %cst_152 : f32 to vector<8x128xf32>
    %452 = arith.addf %451, %450 : vector<8x128xf32>
    %453 = arith.divf %451, %452 : vector<8x128xf32>
    %454 = vector.extract_strided_slice %447 {offsets = [0, 128], sizes = [8, 128], strides = [1, 1]} : vector<8x512xf32> to vector<8x128xf32>
    %455 = arith.negf %454 : vector<8x128xf32>
    %456 = math.exp %455 : vector<8x128xf32>
    %cst_153 = arith.constant 1.000000e+00 : f32
    %457 = vector.broadcast %cst_153 : f32 to vector<8x128xf32>
    %458 = arith.addf %457, %456 : vector<8x128xf32>
    %459 = arith.divf %457, %458 : vector<8x128xf32>
    %460 = vector.extract_strided_slice %447 {offsets = [0, 256], sizes = [8, 128], strides = [1, 1]} : vector<8x512xf32> to vector<8x128xf32>
    %461 = math.tanh %460 : vector<8x128xf32>
    %462 = vector.extract_strided_slice %447 {offsets = [0, 384], sizes = [8, 128], strides = [1, 1]} : vector<8x512xf32> to vector<8x128xf32>
    %463 = arith.negf %462 : vector<8x128xf32>
    %464 = math.exp %463 : vector<8x128xf32>
    %cst_154 = arith.constant 1.000000e+00 : f32
    %465 = vector.broadcast %cst_154 : f32 to vector<8x128xf32>
    %466 = arith.addf %465, %464 : vector<8x128xf32>
    %467 = arith.divf %465, %466 : vector<8x128xf32>
    %468 = arith.mulf %459, %435 : vector<8x128xf32>
    %469 = arith.mulf %453, %461 : vector<8x128xf32>
    %470 = arith.addf %468, %469 : vector<8x128xf32>
    %471 = math.tanh %470 : vector<8x128xf32>
    %472 = arith.mulf %467, %471 : vector<8x128xf32>
    %473 = arith.index_cast %441 : i32 to index
    %c0_155 = arith.constant 0 : index
    %474 = vector.load %arg9[%473, %c0_155] : memref<64x128xf32, #tpu.memory_space<vmem>>, vector<8x128xf32>
    tpu.vector_store %arg9[%473, %c0_155], %472 {strides = array<i32>} : memref<64x128xf32, #tpu.memory_space<vmem>>, vector<8x128xf32>,
    %c5_i32_156 = arith.constant 5 : i32
    %c8_i32_157 = arith.constant 8 : i32
    %475 = arith.muli %c5_i32_156, %c8_i32_157 : i32
    %476 = tpu.assume_multiple %475, 8 : i32
    %477 = arith.index_cast %476 : i32 to index
    %c0_158 = arith.constant 0 : index
    %478 = vector.load %arg8[%477, %c0_158] : memref<64x512xf32, #tpu.memory_space<vmem>>, vector<8x512xf32>
    %c1_159 = arith.constant 1 : index
    %c0_160 = arith.constant 0 : index
    %c0_161 = arith.constant 0 : index
    %479 = vector.load %arg3[%c1_159, %c0_160, %c0_161] : memref<2x128x512xf32, #tpu.memory_space<vmem>>, vector<1x128x512xf32>
    %480 = vector.shape_cast %479 : vector<1x128x512xf32> to vector<128x512xf32>
    %cst_162 = arith.constant dense<0.000000e+00> : vector<8x512xf32>
    %481 = tpu.matmul %472, %480, %cst_162 {dimension_numbers = #tpu.dot_dimension_numbers<[1], [0], [0], [1], [0, 0, 1, 1], [], []>} : vector<8x128xf32>, vector<128x512xf32>, vector<8x512xf32> -> vector<8x512xf32>
    %482 = arith.addf %478, %481 : vector<8x512xf32>
    %483 = vector.extract_strided_slice %482 {offsets = [0, 0], sizes = [8, 128], strides = [1, 1]} : vector<8x512xf32> to vector<8x128xf32>
    %484 = arith.negf %483 : vector<8x128xf32>
    %485 = math.exp %484 : vector<8x128xf32>
    %cst_163 = arith.constant 1.000000e+00 : f32
    %486 = vector.broadcast %cst_163 : f32 to vector<8x128xf32>
    %487 = arith.addf %486, %485 : vector<8x128xf32>
    %488 = arith.divf %486, %487 : vector<8x128xf32>
    %489 = vector.extract_strided_slice %482 {offsets = [0, 128], sizes = [8, 128], strides = [1, 1]} : vector<8x512xf32> to vector<8x128xf32>
    %490 = arith.negf %489 : vector<8x128xf32>
    %491 = math.exp %490 : vector<8x128xf32>
    %cst_164 = arith.constant 1.000000e+00 : f32
    %492 = vector.broadcast %cst_164 : f32 to vector<8x128xf32>
    %493 = arith.addf %492, %491 : vector<8x128xf32>
    %494 = arith.divf %492, %493 : vector<8x128xf32>
    %495 = vector.extract_strided_slice %482 {offsets = [0, 256], sizes = [8, 128], strides = [1, 1]} : vector<8x512xf32> to vector<8x128xf32>
    %496 = math.tanh %495 : vector<8x128xf32>
    %497 = vector.extract_strided_slice %482 {offsets = [0, 384], sizes = [8, 128], strides = [1, 1]} : vector<8x512xf32> to vector<8x128xf32>
    %498 = arith.negf %497 : vector<8x128xf32>
    %499 = math.exp %498 : vector<8x128xf32>
    %cst_165 = arith.constant 1.000000e+00 : f32
    %500 = vector.broadcast %cst_165 : f32 to vector<8x128xf32>
    %501 = arith.addf %500, %499 : vector<8x128xf32>
    %502 = arith.divf %500, %501 : vector<8x128xf32>
    %503 = arith.mulf %494, %470 : vector<8x128xf32>
    %504 = arith.mulf %488, %496 : vector<8x128xf32>
    %505 = arith.addf %503, %504 : vector<8x128xf32>
    %506 = math.tanh %505 : vector<8x128xf32>
    %507 = arith.mulf %502, %506 : vector<8x128xf32>
    %508 = arith.index_cast %476 : i32 to index
    %c0_166 = arith.constant 0 : index
    %509 = vector.load %arg9[%508, %c0_166] : memref<64x128xf32, #tpu.memory_space<vmem>>, vector<8x128xf32>
    tpu.vector_store %arg9[%508, %c0_166], %507 {strides = array<i32>} : memref<64x128xf32, #tpu.memory_space<vmem>>, vector<8x128xf32>,
    %c6_i32_167 = arith.constant 6 : i32
    %c8_i32_168 = arith.constant 8 : i32
    %510 = arith.muli %c6_i32_167, %c8_i32_168 : i32
    %511 = tpu.assume_multiple %510, 8 : i32
    %512 = arith.index_cast %511 : i32 to index
    %c0_169 = arith.constant 0 : index
    %513 = vector.load %arg8[%512, %c0_169] : memref<64x512xf32, #tpu.memory_space<vmem>>, vector<8x512xf32>
    %c1_170 = arith.constant 1 : index
    %c0_171 = arith.constant 0 : index
    %c0_172 = arith.constant 0 : index
    %514 = vector.load %arg3[%c1_170, %c0_171, %c0_172] : memref<2x128x512xf32, #tpu.memory_space<vmem>>, vector<1x128x512xf32>
    %515 = vector.shape_cast %514 : vector<1x128x512xf32> to vector<128x512xf32>
    %cst_173 = arith.constant dense<0.000000e+00> : vector<8x512xf32>
    %516 = tpu.matmul %507, %515, %cst_173 {dimension_numbers = #tpu.dot_dimension_numbers<[1], [0], [0], [1], [0, 0, 1, 1], [], []>} : vector<8x128xf32>, vector<128x512xf32>, vector<8x512xf32> -> vector<8x512xf32>
    %517 = arith.addf %513, %516 : vector<8x512xf32>
    %518 = vector.extract_strided_slice %517 {offsets = [0, 0], sizes = [8, 128], strides = [1, 1]} : vector<8x512xf32> to vector<8x128xf32>
    %519 = arith.negf %518 : vector<8x128xf32>
    %520 = math.exp %519 : vector<8x128xf32>
    %cst_174 = arith.constant 1.000000e+00 : f32
    %521 = vector.broadcast %cst_174 : f32 to vector<8x128xf32>
    %522 = arith.addf %521, %520 : vector<8x128xf32>
    %523 = arith.divf %521, %522 : vector<8x128xf32>
    %524 = vector.extract_strided_slice %517 {offsets = [0, 128], sizes = [8, 128], strides = [1, 1]} : vector<8x512xf32> to vector<8x128xf32>
    %525 = arith.negf %524 : vector<8x128xf32>
    %526 = math.exp %525 : vector<8x128xf32>
    %cst_175 = arith.constant 1.000000e+00 : f32
    %527 = vector.broadcast %cst_175 : f32 to vector<8x128xf32>
    %528 = arith.addf %527, %526 : vector<8x128xf32>
    %529 = arith.divf %527, %528 : vector<8x128xf32>
    %530 = vector.extract_strided_slice %517 {offsets = [0, 256], sizes = [8, 128], strides = [1, 1]} : vector<8x512xf32> to vector<8x128xf32>
    %531 = math.tanh %530 : vector<8x128xf32>
    %532 = vector.extract_strided_slice %517 {offsets = [0, 384], sizes = [8, 128], strides = [1, 1]} : vector<8x512xf32> to vector<8x128xf32>
    %533 = arith.negf %532 : vector<8x128xf32>
    %534 = math.exp %533 : vector<8x128xf32>
    %cst_176 = arith.constant 1.000000e+00 : f32
    %535 = vector.broadcast %cst_176 : f32 to vector<8x128xf32>
    %536 = arith.addf %535, %534 : vector<8x128xf32>
    %537 = arith.divf %535, %536 : vector<8x128xf32>
    %538 = arith.mulf %529, %505 : vector<8x128xf32>
    %539 = arith.mulf %523, %531 : vector<8x128xf32>
    %540 = arith.addf %538, %539 : vector<8x128xf32>
    %541 = math.tanh %540 : vector<8x128xf32>
    %542 = arith.mulf %537, %541 : vector<8x128xf32>
    %543 = arith.index_cast %511 : i32 to index
    %c0_177 = arith.constant 0 : index
    %544 = vector.load %arg9[%543, %c0_177] : memref<64x128xf32, #tpu.memory_space<vmem>>, vector<8x128xf32>
    tpu.vector_store %arg9[%543, %c0_177], %542 {strides = array<i32>} : memref<64x128xf32, #tpu.memory_space<vmem>>, vector<8x128xf32>,
    %c7_i32_178 = arith.constant 7 : i32
    %c8_i32_179 = arith.constant 8 : i32
    %545 = arith.muli %c7_i32_178, %c8_i32_179 : i32
    %546 = tpu.assume_multiple %545, 8 : i32
    %547 = arith.index_cast %546 : i32 to index
    %c0_180 = arith.constant 0 : index
    %548 = vector.load %arg8[%547, %c0_180] : memref<64x512xf32, #tpu.memory_space<vmem>>, vector<8x512xf32>
    %c1_181 = arith.constant 1 : index
    %c0_182 = arith.constant 0 : index
    %c0_183 = arith.constant 0 : index
    %549 = vector.load %arg3[%c1_181, %c0_182, %c0_183] : memref<2x128x512xf32, #tpu.memory_space<vmem>>, vector<1x128x512xf32>
    %550 = vector.shape_cast %549 : vector<1x128x512xf32> to vector<128x512xf32>
    %cst_184 = arith.constant dense<0.000000e+00> : vector<8x512xf32>
    %551 = tpu.matmul %542, %550, %cst_184 {dimension_numbers = #tpu.dot_dimension_numbers<[1], [0], [0], [1], [0, 0, 1, 1], [], []>} : vector<8x128xf32>, vector<128x512xf32>, vector<8x512xf32> -> vector<8x512xf32>
    %552 = arith.addf %548, %551 : vector<8x512xf32>
    %553 = vector.extract_strided_slice %552 {offsets = [0, 0], sizes = [8, 128], strides = [1, 1]} : vector<8x512xf32> to vector<8x128xf32>
    %554 = arith.negf %553 : vector<8x128xf32>
    %555 = math.exp %554 : vector<8x128xf32>
    %cst_185 = arith.constant 1.000000e+00 : f32
    %556 = vector.broadcast %cst_185 : f32 to vector<8x128xf32>
    %557 = arith.addf %556, %555 : vector<8x128xf32>
    %558 = arith.divf %556, %557 : vector<8x128xf32>
    %559 = vector.extract_strided_slice %552 {offsets = [0, 128], sizes = [8, 128], strides = [1, 1]} : vector<8x512xf32> to vector<8x128xf32>
    %560 = arith.negf %559 : vector<8x128xf32>
    %561 = math.exp %560 : vector<8x128xf32>
    %cst_186 = arith.constant 1.000000e+00 : f32
    %562 = vector.broadcast %cst_186 : f32 to vector<8x128xf32>
    %563 = arith.addf %562, %561 : vector<8x128xf32>
    %564 = arith.divf %562, %563 : vector<8x128xf32>
    %565 = vector.extract_strided_slice %552 {offsets = [0, 256], sizes = [8, 128], strides = [1, 1]} : vector<8x512xf32> to vector<8x128xf32>
    %566 = math.tanh %565 : vector<8x128xf32>
    %567 = vector.extract_strided_slice %552 {offsets = [0, 384], sizes = [8, 128], strides = [1, 1]} : vector<8x512xf32> to vector<8x128xf32>
    %568 = arith.negf %567 : vector<8x128xf32>
    %569 = math.exp %568 : vector<8x128xf32>
    %cst_187 = arith.constant 1.000000e+00 : f32
    %570 = vector.broadcast %cst_187 : f32 to vector<8x128xf32>
    %571 = arith.addf %570, %569 : vector<8x128xf32>
    %572 = arith.divf %570, %571 : vector<8x128xf32>
    %573 = arith.mulf %564, %540 : vector<8x128xf32>
    %574 = arith.mulf %558, %566 : vector<8x128xf32>
    %575 = arith.addf %573, %574 : vector<8x128xf32>
    %576 = math.tanh %575 : vector<8x128xf32>
    %577 = arith.mulf %572, %576 : vector<8x128xf32>
    %578 = arith.index_cast %546 : i32 to index
    %c0_188 = arith.constant 0 : index
    %579 = vector.load %arg9[%578, %c0_188] : memref<64x128xf32, #tpu.memory_space<vmem>>, vector<8x128xf32>
    tpu.vector_store %arg9[%578, %c0_188], %577 {strides = array<i32>} : memref<64x128xf32, #tpu.memory_space<vmem>>, vector<8x128xf32>,
    %c8_i32_189 = arith.constant 8 : i32
    %c0_190 = arith.constant 0 : index
    %c0_191 = arith.constant 0 : index
    %580 = vector.load %arg9[%c0_190, %c0_191] : memref<64x128xf32, #tpu.memory_space<vmem>>, vector<64x128xf32>
    %c0_192 = arith.constant 0 : index
    %c0_193 = arith.constant 0 : index
    %581 = vector.load %arg5[%c0_192, %c0_193] : memref<128x128xf32, #tpu.memory_space<vmem>>, vector<128x128xf32>
    %cst_194 = arith.constant dense<0.000000e+00> : vector<64x128xf32>
    %582 = tpu.matmul %580, %581, %cst_194 {dimension_numbers = #tpu.dot_dimension_numbers<[1], [0], [0], [1], [0, 0, 1, 1], [], []>} : vector<64x128xf32>, vector<128x128xf32>, vector<64x128xf32> -> vector<64x128xf32>
    %c0_195 = arith.constant 0 : index
    %c0_196 = arith.constant 0 : index
    %583 = vector.load %arg6[%c0_195, %c0_196] : memref<1x128xf32, #tpu.memory_space<vmem>>, vector<1x128xf32>
    %584 = vector.broadcast %583 : vector<1x128xf32> to vector<64x128xf32>
    %585 = arith.addf %582, %584 : vector<64x128xf32>
    %c0_197 = arith.constant 0 : index
    %c0_198 = arith.constant 0 : index
    %586 = vector.load %arg7[%c0_197, %c0_198] : memref<64x128xf32, #tpu.memory_space<vmem>>, vector<64x128xf32>
    tpu.vector_store %arg7[%c0_197, %c0_198], %585 {strides = array<i32>} : memref<64x128xf32, #tpu.memory_space<vmem>>, vector<64x128xf32>,
    return
  }
  func.func @transform_0(%arg0: i32) -> (i32, i32) {
    %c0_i32 = arith.constant 0 : i32
    %c0_i32_0 = arith.constant 0 : i32
    %c0_i32_1 = arith.constant 0 : i32
    return %c0_i32, %c0_i32_0 : i32, i32
  }
  func.func @transform_1(%arg0: i32) -> (i32, i32, i32) {
    %c0_i32 = arith.constant 0 : i32
    %c0_i32_0 = arith.constant 0 : i32
    %c0_i32_1 = arith.constant 0 : i32
    %c0_i32_2 = arith.constant 0 : i32
    return %c0_i32, %c0_i32_0, %c0_i32_1 : i32, i32, i32
  }
  func.func @transform_2(%arg0: i32) -> (i32, i32, i32) {
    %c0_i32 = arith.constant 0 : i32
    %c0_i32_0 = arith.constant 0 : i32
    %c0_i32_1 = arith.constant 0 : i32
    %c0_i32_2 = arith.constant 0 : i32
    return %c0_i32, %c0_i32_0, %c0_i32_1 : i32, i32, i32
  }
  func.func @transform_3(%arg0: i32) -> (i32, i32, i32) {
    %c0_i32 = arith.constant 0 : i32
    %c0_i32_0 = arith.constant 0 : i32
    %c0_i32_1 = arith.constant 0 : i32
    %c0_i32_2 = arith.constant 0 : i32
    return %c0_i32, %c0_i32_0, %c0_i32_1 : i32, i32, i32
  }
  func.func @transform_4(%arg0: i32) -> (i32, i32) {
    %c0_i32 = arith.constant 0 : i32
    %c0_i32_0 = arith.constant 0 : i32
    %c0_i32_1 = arith.constant 0 : i32
    return %c0_i32, %c0_i32_0 : i32, i32
  }
  func.func @transform_5(%arg0: i32) -> (i32, i32) {
    %c0_i32 = arith.constant 0 : i32
    %c0_i32_0 = arith.constant 0 : i32
    %c0_i32_1 = arith.constant 0 : i32
    return %c0_i32, %c0_i32_0 : i32, i32
  }
  func.func @transform_6(%arg0: i32) -> (i32, i32) {
    %c0_i32 = arith.constant 0 : i32
    %c0_i32_0 = arith.constant 0 : i32
    %c0_i32_1 = arith.constant 0 : i32
    return %c0_i32, %c0_i32_0 : i32, i32
  }
}

</mosaic_0001>

<bundles_post_ra>
// kernel: tpu_custom_call.1
= control target key start
LH: loop header
LB: loop body
LE: loop exit
PB: predicated region body
PF: predicated region fallthrough
CT: control target
= control target key end

     0   :  { %11 = vsyncpa [#allocation5], 0  ;;  %s7227_s0 = inlined_call_operand.hbm [shape: f32[64,128], index: 0, kind: input, shape index: {}]   ;;  %s7228_s1 = inlined_call_operand.hbm [shape: f32[2,128,512], index: 1, kind: input, shape index: {}]   ;;  %s7229_s2 = inlined_call_operand.hbm [shape: f32[2,128,512], index: 2, kind: input, shape index: {}]   ;;  %s7230_s3 = inlined_call_operand.hbm [shape: f32[2,1,512], index: 3, kind: input, shape index: {}]   ;;  %s7231_s4 = inlined_call_operand.hbm [shape: f32[128,128], index: 4, kind: input, shape index: {}]   ;;  %s7232_s5 = inlined_call_operand.vmem [shape: f32[1,128], index: 5, kind: input, shape index: {}]   ;;  %s7233_s6 = inlined_call_operand.hbm [shape: f32[64,128], index: 6, kind: output, shape index: {}]  }
   0x1   :  { %12 = vsyncpa [#allocation8], 0 }
   0x2   :  { %13 = vsyncpa [#allocation11], 0  ;;  %s32_s23 = sshll.u32 %s7228_s1, 4  ;;  %s33_s23 = int_to_ptr.hbm [resolvable:$true] %s32_s23 }
   0x3   :  { %14 = vsyncpa [#allocation6], 0  ;;  %s4739_s24 = smov [#allocation7]   ;;  %s58_s28 = sshll.u32 %s7230_s3, 4  ;;  %s59_s28 = int_to_ptr.hbm [resolvable:$true] %s58_s28 }
   0x4   :  { %s34_s25 = sshll.u32 %s4739_s24, 4  ;;  %s4740_s29 = smov 512   ;;  %s35_s25 = int_to_ptr.vmem [resolvable:$true] %s34_s25 }
   0x5   :  { %s4741_s30 = smov 32   ;;  %s4742_s7 = smov [#allocation10]  }
   0x6   :  { %40 = dma.hbm_to_vmem [thread:$0]  %s33_s23, 16384, %s35_s25, [#allocation8], %s4740_s29, %s4740_s29, %s4741_s30  }
   0x7   :  { %s60_s8 = sshll.u32 %s4742_s7, 4  ;;  %s4743_s9 = smov 64   ;;  %s61_s8 = int_to_ptr.vmem [resolvable:$true] %s60_s8 }
   0x8   :  { %s4744_s10 = smov 4   ;;  %s19_s12 = sshll.u32 %s7227_s0, 4  ;;  %s20_s12 = int_to_ptr.hbm [resolvable:$true] %s19_s12 }
   0x9   :  { %66 = dma.hbm_to_vmem [thread:$0]  %s59_s28, 128, %s61_s8, [#allocation11], %s4743_s9, %s4743_s9, %s4744_s10  }
   0xa   :  { %s4745_s13 = smov [#allocation4]   ;;  %s45_s16 = sshll.u32 %s7229_s2, 4  ;;  %s46_s16 = int_to_ptr.hbm [resolvable:$true] %s45_s16 }
   0xb   :  { %s21_s14 = sshll.u32 %s4745_s13, 4  ;;  %s4746_s17 = smov 128   ;;  %s22_s14 = int_to_ptr.vmem [resolvable:$true] %s21_s14 }
   0xc   :  { %s4747_s18 = smov 8   ;;  %s4748_s19 = smov [#allocation9]  }
   0xd   :  { %27 = dma.hbm_to_vmem [thread:$0]  %s20_s12, 1024, %s22_s14, [#allocation5], %s4746_s17, %s4746_s17, %s4747_s18  }
   0xe   :  { %s47_s20 = sshll.u32 %s4748_s19, 4  ;;  %s71_s0 = sshll.u32 %s7231_s4, 4  ;;  %s48_s20 = int_to_ptr.vmem [resolvable:$true] %s47_s20  ;;  %s72_s0 = int_to_ptr.hbm [resolvable:$true] %s71_s0 }
   0xf   :  { %53 = dma.hbm_to_vmem [thread:$0]  %s46_s16, 16384, %s48_s20, [#allocation8], %s4740_s29, %s4740_s29, %s4741_s30  }
  0x10   :  { %s4749_s23 = smov [#allocation12]  }
  0x11   :  { %s73_s24 = sshll.u32 %s4749_s23, 4  ;;  %s74_s24 = int_to_ptr.vmem [resolvable:$true] %s73_s24 }
  0x12   :  { %79 = dma.hbm_to_vmem [thread:$0]  %s72_s0, 2048, %s74_s24, [#allocation11], %s4746_s17, %s4746_s17, %s4747_s18  }
  0x13   :  { %4731 = dma.done.wait [#allocation5], 1024  }
  0x14   :  { %4732 = vsyncadd [#allocation5], 4294966272 }
  0x15   :  { %4733 = dma.done.wait [#allocation8], 32768  }
  0x16   :  { %4734 = vsyncadd [#allocation8], 4294934528 }
  0x17   :  { %4735 = dma.done.wait [#allocation11], 2176  }
  0x18   :  { %4736 = vsyncadd [#allocation11], 4294965120  ;;  %v170_v0 = vld [vmem:[#allocation7 + $0x1e0] sm:$0xff]  ;;  %v173_v1 = vld [vmem:[#allocation7 + $0x1f8] sm:$0xff]  ;;  %v7234_v57 = vmov 0.0   ;;  %s4231_s28 = sshll.u32 %s7233_s6, 4  ;;  %s4232_s28 = int_to_ptr.hbm [resolvable:$true] %s4231_s28 }
  0x19   :  { %v166_v2 = vld [vmem:[#allocation7 + $0x1c0] sm:$0xff]  ;;  %184 = vmatpush.msra.mxu1 %v170_v0  ;;  %4301 = vmatpush.msra.mxu2 %v170_v0  ;;  %v169_v3 = vld [vmem:[#allocation7 + $0x1d8] sm:$0xff]  ;;  %v171_v49 = vld [vmem:[#allocation7 + $0x1e8] sm:$0xff] }
  0x1a   :  { %v4808_v4 = vld [vmem:[#allocation9 + $0x1e0] sm:$0xff]  ;;  %307 = vmatpush.msra.mxu3 %v173_v1  ;;  %v165_v7 = vld [vmem:[#allocation7 + $0x1b8] sm:$0xff]  ;;  %v172_v50 = vld [vmem:[#allocation7 + $0x1f0] sm:$0xff] }
  0x1b   :  { %451 = vmatpush.msra.mxu0 %v4808_v4  ;;  %v162_v5 = vld [vmem:[#allocation7 + $0x1a0] sm:$0xff]  ;;  %185 = vmatpush.msra.mxu1 %v166_v2  ;;  %v161_v10 = vld [vmem:[#allocation7 + $0x198] sm:$0xff]  ;;  %v167_v52 = vld [vmem:[#allocation7 + $0x1c8] sm:$0xff] }
  0x1c   :  { %v4811_v6 = vld [vmem:[#allocation9 + $0x1c0] sm:$0xff]  ;;  %4302 = vmatpush.msra.mxu2 %v166_v2  ;;  %308 = vmatpush.msra.mxu3 %v169_v3  ;;  %v157_v13 = vld [vmem:[#allocation7 + $0x178] sm:$0xff]  ;;  %v168_v53 = vld [vmem:[#allocation7 + $0x1d0] sm:$0xff] }
  0x1d   :  { %v4813_v8 = vld [vmem:[#allocation9 + $0x1a0] sm:$0xff]  ;;  %452 = vmatpush.msra.mxu0 %v4811_v6  ;;  %186 = vmatpush.msra.mxu1 %v162_v5  ;;  %v153_v16 = vld [vmem:[#allocation7 + $0x158] sm:$0xff]  ;;  %v163_v54 = vld [vmem:[#allocation7 + $0x1a8] sm:$0xff] }
  0x1e   :  { %v158_v9 = vld [vmem:[#allocation7 + $0x180] sm:$0xff]  ;;  %4303 = vmatpush.msra.mxu2 %v162_v5  ;;  %309 = vmatpush.msra.mxu3 %v165_v7  ;;  %v149_v19 = vld [vmem:[#allocation7 + $0x138] sm:$0xff]  ;;  %v164_v56 = vld [vmem:[#allocation7 + $0x1b0] sm:$0xff] }
  0x1f   :  { %v4816_v11 = vld [vmem:[#allocation9 + $0x180] sm:$0xff]  ;;  %453 = vmatpush.msra.mxu0 %v4813_v8  ;;  %187 = vmatpush.msra.mxu1 %v158_v9  ;;  %v145_v22 = vld [vmem:[#allocation7 + $0x118] sm:$0xff]  ;;  %v159_v58 = vld [vmem:[#allocation7 + $0x188] sm:$0xff] }
  0x20   :  { %v154_v12 = vld [vmem:[#allocation7 + $0x160] sm:$0xff]  ;;  %4304 = vmatpush.msra.mxu2 %v158_v9  ;;  %310 = vmatpush.msra.mxu3 %v161_v10  ;;  %v141_v25 = vld [vmem:[#allocation7 + $0xf8] sm:$0xff]  ;;  %v160_v60 = vld [vmem:[#allocation7 + $0x190] sm:$0xff] }
  0x21   :  { %v4819_v14 = vld [vmem:[#allocation9 + $0x160] sm:$0xff]  ;;  %454 = vmatpush.msra.mxu0 %v4816_v11  ;;  %188 = vmatpush.msra.mxu1 %v154_v12  ;;  %v137_v28 = vld [vmem:[#allocation7 + $0xd8] sm:$0xff]  ;;  %v4868_v61 = vld [vmem:[#allocation4 + $0x8] sm:$0xff] }
  0x22   :  { %v150_v15 = vld [vmem:[#allocation7 + $0x140] sm:$0xff]  ;;  %4305 = vmatpush.msra.mxu2 %v154_v12  ;;  %311 = vmatpush.msra.mxu3 %v157_v13  ;;  %v133_v31 = vld [vmem:[#allocation7 + $0xb8] sm:$0xff]  ;;  %v4871_v62 = vld [vmem:[#allocation4 + $0x28] sm:$0xff] }
  0x23   :  { %v4822_v17 = vld [vmem:[#allocation9 + $0x140] sm:$0xff]  ;;  %455 = vmatpush.msra.mxu0 %v4819_v14  ;;  %189 = vmatpush.msra.mxu1 %v150_v15  ;;  %v129_v34 = vld [vmem:[#allocation7 + $0x98] sm:$0xff]  ;;  %v155_v63 = vld [vmem:[#allocation7 + $0x168] sm:$0xff] }
  0x24   :  { %v146_v18 = vld [vmem:[#allocation7 + $0x120] sm:$0xff]  ;;  %4306 = vmatpush.msra.mxu2 %v150_v15  ;;  %312 = vmatpush.msra.mxu3 %v153_v16  ;;  %v125_v37 = vld [vmem:[#allocation7 + $0x78] sm:$0xff]  ;;  %v156_v0 = vld [vmem:[#allocation7 + $0x170] sm:$0xff] }
  0x25   :  { %v4825_v20 = vld [vmem:[#allocation9 + $0x120] sm:$0xff]  ;;  %456 = vmatpush.msra.mxu0 %v4822_v17  ;;  %190 = vmatpush.msra.mxu1 %v146_v18  ;;  %v121_v40 = vld [vmem:[#allocation7 + $0x58] sm:$0xff]  ;;  %v151_v1 = vld [vmem:[#allocation7 + $0x148] sm:$0xff] }
  0x26   :  { %v142_v21 = vld [vmem:[#allocation7 + $0x100] sm:$0xff]  ;;  %4307 = vmatpush.msra.mxu2 %v146_v18  ;;  %313 = vmatpush.msra.mxu3 %v149_v19  ;;  %v117_v43 = vld [vmem:[#allocation7 + $0x38] sm:$0xff]  ;;  %v152_v3 = vld [vmem:[#allocation7 + $0x150] sm:$0xff] }
  0x27   :  { %v4828_v23 = vld [vmem:[#allocation9 + $0x100] sm:$0xff]  ;;  %457 = vmatpush.msra.mxu0 %v4825_v20  ;;  %191 = vmatpush.msra.mxu1 %v142_v21  ;;  %v113_v46 = vld [vmem:[#allocation7 + $0x18] sm:$0xff]  ;;  %v147_v5 = vld [vmem:[#allocation7 + $0x128] sm:$0xff] }
  0x28   :  { %v138_v24 = vld [vmem:[#allocation7 + $0xe0] sm:$0xff]  ;;  %4308 = vmatpush.msra.mxu2 %v142_v21  ;;  %314 = vmatpush.msra.mxu3 %v145_v22  ;;  %v4862_v55 = vld [vmem:[#allocation9 + $0x1f8] sm:$0xff]  ;;  %v143_v9 = vld [vmem:[#allocation7 + $0x108] sm:$0xff] }
  0x29   :  { %v4831_v26 = vld [vmem:[#allocation9 + $0xe0] sm:$0xff]  ;;  %458 = vmatpush.msra.mxu0 %v4828_v23  ;;  %192 = vmatpush.msra.mxu1 %v138_v24  ;;  %v4866_v59 = vld [vmem:[#allocation9 + $0x1d8] sm:$0xff]  ;;  %v144_v12 = vld [vmem:[#allocation7 + $0x110] sm:$0xff] }
  0x2a   :  { %v134_v27 = vld [vmem:[#allocation7 + $0xc0] sm:$0xff]  ;;  %4309 = vmatpush.msra.mxu2 %v138_v24  ;;  %315 = vmatpush.msra.mxu3 %v141_v25  ;;  %v4876_v2 = vld [vmem:[#allocation9 + $0x1b8] sm:$0xff]  ;;  %v4886_v13 = vld [vmem:[#allocation4 + $0x10] sm:$0xff] }
  0x2b   :  { %v4834_v29 = vld [vmem:[#allocation9 + $0xc0] sm:$0xff]  ;;  %459 = vmatpush.msra.mxu0 %v4831_v26  ;;  %193 = vmatpush.msra.mxu1 %v134_v27  ;;  %v4880_v7 = vld [vmem:[#allocation9 + $0x198] sm:$0xff]  ;;  %v4889_v15 = vld [vmem:[#allocation4 + $0x30] sm:$0xff] }
  0x2c   :  { %v130_v30 = vld [vmem:[#allocation7 + $0xa0] sm:$0xff]  ;;  %4310 = vmatpush.msra.mxu2 %v134_v27  ;;  %316 = vmatpush.msra.mxu3 %v137_v28  ;;  %v4883_v10 = vld [vmem:[#allocation9 + $0x178] sm:$0xff]  ;;  %v139_v16 = vld [vmem:[#allocation7 + $0xe8] sm:$0xff] }
  0x2d   :  { %v4837_v32 = vld [vmem:[#allocation9 + $0xa0] sm:$0xff]  ;;  %460 = vmatpush.msra.mxu0 %v4834_v29  ;;  %194 = vmatpush.msra.mxu1 %v130_v30  ;;  %v140_v18 = vld [vmem:[#allocation7 + $0xf0] sm:$0xff]  ;;  %v4894_v19 = vld [vmem:[#allocation9 + $0x158] sm:$0xff] }
  0x2e   :  { %v126_v33 = vld [vmem:[#allocation7 + $0x80] sm:$0xff]  ;;  %4311 = vmatpush.msra.mxu2 %v130_v30  ;;  %317 = vmatpush.msra.mxu3 %v133_v31  ;;  %v136_v21 = vld [vmem:[#allocation7 + $0xd0] sm:$0xff]  ;;  %v131_v22 = vld [vmem:[#allocation7 + $0xa8] sm:$0xff] }
  0x2f   :  { %v4840_v35 = vld [vmem:[#allocation9 + $0x80] sm:$0xff]  ;;  %461 = vmatpush.msra.mxu0 %v4837_v32  ;;  %195 = vmatpush.msra.mxu1 %v126_v33  ;;  %v4898_v24 = vld [vmem:[#allocation9 + $0x138] sm:$0xff]  ;;  %v127_v25 = vld [vmem:[#allocation7 + $0x88] sm:$0xff] }
  0x30   :  { %v122_v36 = vld [vmem:[#allocation7 + $0x60] sm:$0xff]  ;;  %4312 = vmatpush.msra.mxu2 %v126_v33  ;;  %318 = vmatpush.msra.mxu3 %v129_v34  ;;  %v4901_v27 = vld [vmem:[#allocation9 + $0x118] sm:$0xff]  ;;  %v128_v28 = vld [vmem:[#allocation7 + $0x90] sm:$0xff] }
  0x31   :  { %v4843_v38 = vld [vmem:[#allocation9 + $0x60] sm:$0xff]  ;;  %462 = vmatpush.msra.mxu0 %v4840_v35  ;;  %196 = vmatpush.msra.mxu1 %v122_v36  ;;  %v4904_v30 = vld [vmem:[#allocation4 + $0x18] sm:$0xff]  ;;  %v123_v33 = vld [vmem:[#allocation7 + $0x68] sm:$0xff] }
  0x32   :  { %v118_v39 = vld [vmem:[#allocation7 + $0x40] sm:$0xff]  ;;  %4313 = vmatpush.msra.mxu2 %v122_v36  ;;  %319 = vmatpush.msra.mxu3 %v125_v37  ;;  %v4907_v31 = vld [vmem:[#allocation4 + $0x38] sm:$0xff]  ;;  %v124_v34 = vld [vmem:[#allocation7 + $0x70] sm:$0xff] }
  0x33   :  { %v4846_v41 = vld [vmem:[#allocation9 + $0x40] sm:$0xff]  ;;  %463 = vmatpush.msra.mxu0 %v4843_v38  ;;  %197 = vmatpush.msra.mxu1 %v118_v39  ;;  %v4912_v36 = vld [vmem:[#allocation9 + $0xf8] sm:$0xff]  ;;  %v120_v37 = vld [vmem:[#allocation7 + $0x50] sm:$0xff] }
  0x34   :  { %v114_v42 = vld [vmem:[#allocation7 + $0x20] sm:$0xff]  ;;  %4314 = vmatpush.msra.mxu2 %v118_v39  ;;  %320 = vmatpush.msra.mxu3 %v121_v40  ;;  %v115_v39 = vld [vmem:[#allocation7 + $0x28] sm:$0xff]  ;;  %v4916_v40 = vld [vmem:[#allocation9 + $0xd8] sm:$0xff] }
  0x35   :  { %v4849_v44 = vld [vmem:[#allocation9 + $0x20] sm:$0xff]  ;;  %464 = vmatpush.msra.mxu0 %v4846_v41  ;;  %198 = vmatpush.msra.mxu1 %v114_v42 }
  0x36   :  { %v110_v45 = vld [vmem:[#allocation7] sm:$0xff]  ;;  %4315 = vmatpush.msra.mxu2 %v114_v42  ;;  %321 = vmatpush.msra.mxu3 %v117_v43  ;;  %v111_v42 = vld [vmem:[#allocation7 + $0x8] sm:$0xff]  ;;  %v4919_v43 = vld [vmem:[#allocation9 + $0xb8] sm:$0xff] }
  0x37   :  { %v4852_v47 = vld [vmem:[#allocation4] sm:$0xff]  ;;  %465 = vmatpush.msra.mxu0 %v4849_v44  ;;  %199 = vmatpush.msra.mxu1 %v110_v45 }
  0x38   :  { %v4855_v48 = vld [vmem:[#allocation4 + $0x20] sm:$0xff]  ;;  %4316 = vmatpush.msra.mxu2 %v110_v45  ;;  %322 = vmatpush.msra.mxu3 %v113_v46  ;;  %v112_v45 = vld [vmem:[#allocation7 + $0x10] sm:$0xff]  ;;  %v4923_v46 = vld [vmem:[#allocation9 + $0x1e8] sm:$0xff] }
  0x39   :  { %200 = vmatmul.f32.vlgmr.msra.gmra.mxu1 %v4852_v47  ;;  %v4858_v51 = vld [vmem:[#allocation9] sm:$0xff]  ;;  %212 = vmatmul.f32.vlgmr.msra.gmra.mxu2 %v4855_v48 }
  0x3a   :  { %225 = vmatpush.msrb.mxu1 %v171_v49  ;;  %323 = vmatmul.f32.vlgmr.msra.gmra.mxu3 %v4852_v47  ;;  %v4926_v49 = vld [vmem:[#allocation9 + $0x1f0] sm:$0xff] }
  0x3b   :  { %266 = vmatpush.msrb.mxu2 %v172_v50  ;;  %466 = vmatpush.msra.mxu0 %v4858_v51  ;;  %v4930_v50 = vld [vmem:[#allocation9 + $0x1c8] sm:$0xff] }
  0x3c   :  { %226 = vmatpush.msrb.mxu1 %v167_v52  ;;  %467 = vmatmul.f32.vlgmr.msra.gmra.mxu0 %v7234_v57  ;;  %v4936_v52 = vld [vmem:[#allocation9 + $0x1d0] sm:$0xff] }
  0x3d   :  { %267 = vmatpush.msrb.mxu2 %v168_v53  ;;  %511 = vmatpush.msrb.mxu3 %v4862_v55  ;;  %v4942_v53 = vld [vmem:[#allocation9 + $0x78] sm:$0xff] }
  0x3e   :  { %227 = vmatpush.msrb.mxu1 %v163_v54  ;;  %670 = vmatpush.msrb.mxu0 %v4808_v4  ;;  %v148_v4 = vld [vmem:[#allocation7 + $0x130] sm:$0xff] }
  0x3f   :  { %268 = vmatpush.msrb.mxu2 %v164_v56  ;;  %512 = vmatpush.msrb.mxu3 %v4866_v59  ;;  %v4945_v54 = vld [vmem:[#allocation9 + $0x1b0] sm:$0xff]  ;;  %v4948_v56 = vld [vmem:[#allocation9 + $0x188] sm:$0xff] }
  0x40   :  { %228 = vmatpush.msrb.mxu1 %v159_v58  ;;  %671 = vmatpush.msrb.mxu0 %v4811_v6  ;;  %v135_v6 = vld [vmem:[#allocation7 + $0xc8] sm:$0xff]  ;;  %v4956_v58 = vld [vmem:[#allocation9 + $0x190] sm:$0xff] }
  0x41   :  { %269 = vmatpush.msrb.mxu2 %v160_v60  ;;  %203 = vmatmul.f32.gmra.mxu1 %v4868_v61  ;;  %v4958_v60 = vld [vmem:[#allocation9 + $0x168] sm:$0xff] }
  0x42   :  { %215 = vmatmul.f32.gmra.mxu2 %v4871_v62  ;;  %229 = vmatpush.msrb.mxu1 %v155_v63  ;;  %v4964_v63 = vld [vmem:[#allocation9 + $0x170] sm:$0xff] }
  0x43   :  { %326 = vmatmul.f32.gmra.mxu3 %v4868_v61  ;;  %270 = vmatpush.msrb.mxu2 %v156_v0  ;;  %v4970_v0 = vld [vmem:[#allocation9 + $0x38] sm:$0xff] }
  0x44   :  { %230 = vmatpush.msrb.mxu1 %v151_v1  ;;  %513 = vmatpush.msrb.mxu3 %v4876_v2  ;;  %v4974_v1 = vld [vmem:[#allocation9 + $0x150] sm:$0xff] }
  0x45   :  { %271 = vmatpush.msrb.mxu2 %v152_v3  ;;  %672 = vmatpush.msrb.mxu0 %v4813_v8  ;;  %v132_v8 = vld [vmem:[#allocation7 + $0xb0] sm:$0xff]  ;;  %v4980_v3 = vld [vmem:[#allocation9 + $0x18] sm:$0xff] }
  0x46   :  { %231 = vmatpush.msrb.mxu1 %v147_v5  ;;  %514 = vmatpush.msrb.mxu3 %v4880_v7  ;;  %v4984_v5 = vld [vmem:[#allocation9 + $0x130] sm:$0xff] }
  0x47   :  { %272 = vmatpush.msrb.mxu2 %v148_v4  ;;  %673 = vmatpush.msrb.mxu0 %v4816_v11  ;;  %v119_v11 = vld [vmem:[#allocation7 + $0x48] sm:$0xff] }
  0x48   :  { %232 = vmatpush.msrb.mxu1 %v143_v9  ;;  %515 = vmatpush.msrb.mxu3 %v4883_v10  ;;  %v4986_v4 = vld [vmem:[#allocation9 + $0x108] sm:$0xff] }
  0x49   :  { %273 = vmatpush.msrb.mxu2 %v144_v12  ;;  %206 = vmatmul.f32.gmra.mxu1 %v4886_v13  ;;  %v4994_v9 = vld [vmem:[#allocation9 + $0xe8] sm:$0xff]  ;;  %v4999_v12 = vld [vmem:[#allocation9 + $0xf0] sm:$0xff] }
  0x4a   :  { %218 = vmatmul.f32.gmra.mxu2 %v4889_v15  ;;  %233 = vmatpush.msrb.mxu1 %v139_v16  ;;  %v5008_v16 = vld [vmem:[#allocation9 + $0xd0] sm:$0xff] }
  0x4b   :  { %329 = vmatmul.f32.gmra.mxu3 %v4886_v13  ;;  %274 = vmatpush.msrb.mxu2 %v140_v18  ;;  %v5011_v18 = vld [vmem:[#allocation9 + $0xa8] sm:$0xff] }
  0x4c   :  { %234 = vmatpush.msrb.mxu1 %v135_v6  ;;  %516 = vmatpush.msrb.mxu3 %v4894_v19  ;;  %v5018_v6 = vld [vmem:[#allocation9 + $0x88] sm:$0xff] }
  0x4d   :  { %275 = vmatpush.msrb.mxu2 %v136_v21  ;;  %674 = vmatpush.msrb.mxu0 %v4819_v14  ;;  %v116_v14 = vld [vmem:[#allocation7 + $0x30] sm:$0xff]  ;;  %v5026_v21 = vld [vmem:[#allocation9 + $0x68] sm:$0xff] }
  0x4e   :  { %235 = vmatpush.msrb.mxu1 %v131_v22  ;;  %517 = vmatpush.msrb.mxu3 %v4898_v24  ;;  %v5033_v22 = vld [vmem:[#allocation9 + $0x48] sm:$0xff] }
  0x4f   :  { %276 = vmatpush.msrb.mxu2 %v132_v8  ;;  %675 = vmatpush.msrb.mxu0 %v4822_v17  ;;  %v4932_v17 = vld [vmem:[#allocation9 + $0x98] sm:$0xff]  ;;  %v5040_v8 = vld [vmem:[#allocation9 + $0x50] sm:$0xff] }
  0x50   :  { %236 = vmatpush.msrb.mxu1 %v127_v25  ;;  %518 = vmatpush.msrb.mxu3 %v4901_v27  ;;  %v5047_v25 = vld [vmem:[#allocation9 + $0x30] sm:$0xff] }
  0x51   :  { %277 = vmatpush.msrb.mxu2 %v128_v28  ;;  %209 = vmatmul.f32.gmra.mxu1 %v4904_v30  ;;  %v5051_v28 = vld [vmem:[#allocation9 + $0x8] sm:$0xff] }
  0x52   :  { %221 = vmatmul.f32.gmra.mxu2 %v4907_v31  ;;  %237 = vmatpush.msrb.mxu1 %v123_v33 }
  0x53   :  { %332 = vmatmul.f32.gmra.mxu3 %v4904_v30  ;;  %278 = vmatpush.msrb.mxu2 %v124_v34 }
  0x54   :  { %238 = vmatpush.msrb.mxu1 %v119_v11  ;;  %519 = vmatpush.msrb.mxu3 %v4912_v36 }
  0x55   :  { %279 = vmatpush.msrb.mxu2 %v120_v37  ;;  %676 = vmatpush.msrb.mxu0 %v4825_v20  ;;  %v4939_v20 = vld [vmem:[#allocation9 + $0x1a8] sm:$0xff] }
  0x56   :  { %239 = vmatpush.msrb.mxu1 %v115_v39  ;;  %520 = vmatpush.msrb.mxu3 %v4916_v40 }
  0x57   :  { %280 = vmatpush.msrb.mxu2 %v116_v14  ;;  %677 = vmatpush.msrb.mxu0 %v4828_v23  ;;  %v4967_v23 = vld [vmem:[#allocation9 + $0x148] sm:$0xff] }
  0x58   :  { %240 = vmatpush.msrb.mxu1 %v111_v42  ;;  %521 = vmatpush.msrb.mxu3 %v4919_v43 }
  0x59   :  { %281 = vmatpush.msrb.mxu2 %v112_v45  ;;  %241 = vmatmul.f32.vlgmr.msrb.gmra.mxu1 %v4852_v47 }
  0x5a   :  { %282 = vmatmul.f32.vlgmr.msrb.gmra.mxu2 %v4852_v47  ;;  %471 = vmatpush.msra.mxu1 %v4923_v46  ;;  %v4951_v47 = vld [vmem:[#allocation9 + $0x58] sm:$0xff] }
  0x5b   :  { %335 = vmatmul.f32.gmra.mxu3 %v4855_v48  ;;  %491 = vmatpush.msra.mxu2 %v4926_v49 }
  0x5c   :  { %472 = vmatpush.msra.mxu1 %v4930_v50  ;;  %522 = vmatpush.msrb.mxu3 %v4932_v17 }
  0x5d   :  { %492 = vmatpush.msra.mxu2 %v4936_v52  ;;  %678 = vmatpush.msrb.mxu0 %v4831_v26  ;;  %v4977_v26 = vld [vmem:[#allocation9 + $0x128] sm:$0xff] }
  0x5e   :  { %473 = vmatpush.msra.mxu1 %v4939_v20  ;;  %523 = vmatpush.msrb.mxu3 %v4942_v53 }
  0x5f   :  { %493 = vmatpush.msra.mxu2 %v4945_v54  ;;  %679 = vmatpush.msrb.mxu0 %v4834_v29  ;;  %v5003_v29 = vld [vmem:[#allocation9 + $0xc8] sm:$0xff] }
  0x60   :  { %474 = vmatpush.msra.mxu1 %v4948_v56  ;;  %524 = vmatpush.msrb.mxu3 %v4951_v47 }
  0x61   :  { %244 = vmatmul.f32.gmra.mxu1 %v4868_v61  ;;  %494 = vmatpush.msra.mxu2 %v4956_v58 }
  0x62   :  { %285 = vmatmul.f32.gmra.mxu2 %v4868_v61  ;;  %475 = vmatpush.msra.mxu1 %v4958_v60  ;;  %v4992_v61 = vld [vmem:[#allocation9 + $0x110] sm:$0xff] }
  0x63   :  { %338 = vmatmul.f32.gmra.mxu3 %v4871_v62  ;;  %495 = vmatpush.msra.mxu2 %v4964_v63 }
  0x64   :  { %476 = vmatpush.msra.mxu1 %v4967_v23  ;;  %525 = vmatpush.msrb.mxu3 %v4970_v0 }
  0x65   :  { %496 = vmatpush.msra.mxu2 %v4974_v1  ;;  %680 = vmatpush.msrb.mxu0 %v4837_v32  ;;  %v5015_v32 = vld [vmem:[#allocation9 + $0xb0] sm:$0xff] }
  0x66   :  { %477 = vmatpush.msra.mxu1 %v4977_v26  ;;  %526 = vmatpush.msrb.mxu3 %v4980_v3 }
  0x67   :  { %497 = vmatpush.msra.mxu2 %v4984_v5  ;;  %681 = vmatpush.msrb.mxu0 %v4840_v35  ;;  %v5038_v35 = vld [vmem:[#allocation9 + $0x70] sm:$0xff] }
  0x68   :  { %730 = vmatpush.msra.mxu3 %v4862_v55  ;;  %478 = vmatpush.msra.mxu1 %v4986_v4 }
  0x69   :  { %247 = vmatmul.f32.gmra.mxu1 %v4886_v13  ;;  %498 = vmatpush.msra.mxu2 %v4992_v61 }
  0x6a   :  { %288 = vmatmul.f32.gmra.mxu2 %v4886_v13  ;;  %479 = vmatpush.msra.mxu1 %v4994_v9  ;;  %v5023_v13 = vld [vmem:[#allocation9 + $0x90] sm:$0xff] }
  0x6b   :  { %341 = vmatmul.f32.gmra.mxu3 %v4889_v15  ;;  %499 = vmatpush.msra.mxu2 %v4999_v12 }
  0x6c   :  { %480 = vmatpush.msra.mxu1 %v5003_v29  ;;  %731 = vmatpush.msra.mxu3 %v4866_v59 }
  0x6d   :  { %500 = vmatpush.msra.mxu2 %v5008_v16  ;;  %682 = vmatpush.msrb.mxu0 %v4843_v38  ;;  %v5043_v38 = vld [vmem:[#allocation9 + $0x28] sm:$0xff] }
  0x6e   :  { %481 = vmatpush.msra.mxu1 %v5011_v18  ;;  %732 = vmatpush.msra.mxu3 %v4876_v2 }
  0x6f   :  { %501 = vmatpush.msra.mxu2 %v5015_v32  ;;  %683 = vmatpush.msrb.mxu0 %v4846_v41 }
  0x70   :  { %482 = vmatpush.msra.mxu1 %v5018_v6  ;;  %733 = vmatpush.msra.mxu3 %v4880_v7 }
  0x71   :  { %250 = vmatmul.f32.gmra.mxu1 %v4904_v30  ;;  %502 = vmatpush.msra.mxu2 %v5023_v13 }
  0x72   :  { %291 = vmatmul.f32.gmra.mxu2 %v4904_v30  ;;  %483 = vmatpush.msra.mxu1 %v5026_v21  ;;  %v5055_v30 = vld [vmem:[#allocation9 + $0x10] sm:$0xff] }
  0x73   :  { %344 = vmatmul.f32.gmra.mxu3 %v4907_v31  ;;  %503 = vmatpush.msra.mxu2 %v5038_v35 }
  0x74   :  { %484 = vmatpush.msra.mxu1 %v5033_v22  ;;  %734 = vmatpush.msra.mxu3 %v4883_v10 }
  0x75   :  { %504 = vmatpush.msra.mxu2 %v5040_v8  ;;  %684 = vmatpush.msrb.mxu0 %v4849_v44 }
  0x76   :  { %485 = vmatpush.msra.mxu1 %v5043_v38  ;;  %735 = vmatpush.msra.mxu3 %v4894_v19 }
  0x77   :  { %505 = vmatpush.msra.mxu2 %v5047_v25  ;;  %685 = vmatpush.msrb.mxu0 %v4858_v51 }
  0x78   :  { %486 = vmatpush.msra.mxu1 %v5051_v28  ;;  %736 = vmatpush.msra.mxu3 %v4898_v24 }
  0x79   :  { %253 = vmatmul.f32.gmra.mxu1 %v4855_v48  ;;  %506 = vmatpush.msra.mxu2 %v5055_v30 }
  0x7a   :  { %294 = vmatmul.f32.gmra.mxu2 %v4855_v48  ;;  %690 = vmatpush.msrb.mxu1 %v4923_v46 }
  0x7b   :  { %527 = vmatmul.f32.vlgmr.msrb.gmra.mxu3 %v7234_v57  ;;  %710 = vmatpush.msrb.mxu2 %v4926_v49 }
  0x7c   :  { %691 = vmatpush.msrb.mxu1 %v4930_v50  ;;  %737 = vmatpush.msra.mxu3 %v4901_v27 }
  0x7d   :  { %711 = vmatpush.msrb.mxu2 %v4936_v52 }
  0x7e   :  { %692 = vmatpush.msrb.mxu1 %v4939_v20  ;;  %738 = vmatpush.msra.mxu3 %v4912_v36 }
  0x7f   :  { %712 = vmatpush.msrb.mxu2 %v4945_v54 }
  0x80   :  { %693 = vmatpush.msrb.mxu1 %v4948_v56  ;;  %739 = vmatpush.msra.mxu3 %v4916_v40 }
  0x81   :  { %256 = vmatmul.f32.gmra.mxu1 %v4871_v62  ;;  %713 = vmatpush.msrb.mxu2 %v4956_v58 }
  0x82   :  { %297 = vmatmul.f32.gmra.mxu2 %v4871_v62  ;;  %694 = vmatpush.msrb.mxu1 %v4958_v60 }
  0x83   :  { %714 = vmatpush.msrb.mxu2 %v4964_v63  ;;  %740 = vmatpush.msra.mxu3 %v4919_v43 }
  0x84   :  { %695 = vmatpush.msrb.mxu1 %v4967_v23 }
  0x85   :  { %715 = vmatpush.msrb.mxu2 %v4974_v1  ;;  %741 = vmatpush.msra.mxu3 %v4932_v17 }
  0x86   :  { %696 = vmatpush.msrb.mxu1 %v4977_v26 }
  0x87   :  { %716 = vmatpush.msrb.mxu2 %v4984_v5  ;;  %742 = vmatpush.msra.mxu3 %v4942_v53 }
  0x88   :  { %697 = vmatpush.msrb.mxu1 %v4986_v4 }
  0x89   :  { %259 = vmatmul.f32.gmra.mxu1 %v4889_v15  ;;  %717 = vmatpush.msrb.mxu2 %v4992_v61 }
  0x8a   :  { %300 = vmatmul.f32.gmra.mxu2 %v4889_v15  ;;  %698 = vmatpush.msrb.mxu1 %v4994_v9 }
  0x8b   :  { %718 = vmatpush.msrb.mxu2 %v4999_v12  ;;  %743 = vmatpush.msra.mxu3 %v4951_v47 }
  0x8c   :  { %699 = vmatpush.msrb.mxu1 %v5003_v29 }
  0x8d   :  { %719 = vmatpush.msrb.mxu2 %v5008_v16  ;;  %744 = vmatpush.msra.mxu3 %v4970_v0 }
  0x8e   :  { %700 = vmatpush.msrb.mxu1 %v5011_v18 }
  0x8f   :  { %720 = vmatpush.msrb.mxu2 %v5015_v32  ;;  %745 = vmatpush.msra.mxu3 %v4980_v3 }
  0x90   :  { %701 = vmatpush.msrb.mxu1 %v5018_v6 }
  0x91   :  { %950 = vmatpush.msrb.mxu3 %v4862_v55  ;;  %262 = vmatmul.f32.gmra.mxu1 %v4907_v31 }
  0x92   :  { %721 = vmatpush.msrb.mxu2 %v5023_v13  ;;  %702 = vmatpush.msrb.mxu1 %v5026_v21 }
  0x93   :  { %303 = vmatmul.f32.gmra.mxu2 %v4907_v31  ;;  %951 = vmatpush.msrb.mxu3 %v4866_v59 }
  0x94   :  { %722 = vmatpush.msrb.mxu2 %v5038_v35  ;;  %703 = vmatpush.msrb.mxu1 %v5033_v22 }
  0x95   :  { %952 = vmatpush.msrb.mxu3 %v4876_v2 }
  0x96   :  { %723 = vmatpush.msrb.mxu2 %v5040_v8  ;;  %704 = vmatpush.msrb.mxu1 %v5043_v38 }
  0x97   :  { %953 = vmatpush.msrb.mxu3 %v4880_v7 }
  0x98   :  { %724 = vmatpush.msrb.mxu2 %v5047_v25  ;;  %705 = vmatpush.msrb.mxu1 %v5051_v28 }
  0x99   :  { %487 = vmatmul.f32.vlgmr.msra.gmra.mxu1 %v7234_v57  ;;  %954 = vmatpush.msrb.mxu3 %v4883_v10 }
  0x9a   :  { %725 = vmatpush.msrb.mxu2 %v5055_v30  ;;  %910 = vmatpush.msra.mxu1 %v4923_v46 }
  0x9b   :  { %507 = vmatmul.f32.vlgmr.msra.gmra.mxu2 %v7234_v57  ;;  %955 = vmatpush.msrb.mxu3 %v4894_v19 }
  0x9c   :  { %930 = vmatpush.msra.mxu2 %v4926_v49  ;;  %911 = vmatpush.msra.mxu1 %v4930_v50 }
  0x9d   :  { %956 = vmatpush.msrb.mxu3 %v4898_v24 }
  0x9e   :  { %931 = vmatpush.msra.mxu2 %v4936_v52  ;;  %912 = vmatpush.msra.mxu1 %v4939_v20 }
  0x9f   :  { %957 = vmatpush.msrb.mxu3 %v4901_v27 }
  0xa0   :  { %932 = vmatpush.msra.mxu2 %v4945_v54  ;;  %913 = vmatpush.msra.mxu1 %v4948_v56 }
  0xa1   :  { %958 = vmatpush.msrb.mxu3 %v4912_v36 }
  0xa2   :  { %933 = vmatpush.msra.mxu2 %v4956_v58  ;;  %914 = vmatpush.msra.mxu1 %v4958_v60 }
  0xa3   :  { %959 = vmatpush.msrb.mxu3 %v4916_v40 }
  0xa4   :  { %934 = vmatpush.msra.mxu2 %v4964_v63  ;;  %915 = vmatpush.msra.mxu1 %v4967_v23 }
  0xa5   :  { %960 = vmatpush.msrb.mxu3 %v4919_v43  ;;  %v174_v43 = vld [vmem:[#allocation10] sm:$0xf] }
  0xa6   :  { %935 = vmatpush.msra.mxu2 %v4974_v1  ;;  %916 = vmatpush.msra.mxu1 %v4977_v26  ;;  %v5204_v45 = vperm.slane %v174_v43, 0  ;;  %v5222_v1 = vperm.slane %v174_v43, 1 }
  0xa7   :  { %961 = vmatpush.msrb.mxu3 %v4932_v17 }
  0xa8   :  { %936 = vmatpush.msra.mxu2 %v4984_v5  ;;  %917 = vmatpush.msra.mxu1 %v4986_v4  ;;  %7339 = vst [vmem:[#allocation30_spill] sm:$0xff] %v5204_v45 }
  0xa9   :  { %962 = vmatpush.msrb.mxu3 %v4942_v53  ;;  %7347 = vst [vmem:[#allocation38_spill] sm:$0xff] %v5222_v1 }
  0xaa   :  { %937 = vmatpush.msra.mxu2 %v4992_v61  ;;  %918 = vmatpush.msra.mxu1 %v4994_v9 }
  0xab   :  { %963 = vmatpush.msrb.mxu3 %v4951_v47  ;;  %v5217_v47 = vperm.slane %v174_v43, 3 }
  0xac   :  { %938 = vmatpush.msra.mxu2 %v4999_v12  ;;  %919 = vmatpush.msra.mxu1 %v5003_v29 }
  0xad   :  { %964 = vmatpush.msrb.mxu3 %v4970_v0  ;;  %7345 = vst [vmem:[#allocation36_spill] sm:$0xff] %v5217_v47 }
  0xae   :  { %939 = vmatpush.msra.mxu2 %v5008_v16  ;;  %920 = vmatpush.msra.mxu1 %v5011_v18 }
  0xaf   :  { %965 = vmatpush.msrb.mxu3 %v4980_v3 }
  0xb0   :  { %940 = vmatpush.msra.mxu2 %v5015_v32  ;;  %921 = vmatpush.msra.mxu1 %v5018_v6 }
  0xb2   :  { %941 = vmatpush.msra.mxu2 %v5023_v13  ;;  %922 = vmatpush.msra.mxu1 %v5026_v21  ;;  %v5229_v21 = vperm.slane %v174_v43, 2 }
  0xb4   :  { %942 = vmatpush.msra.mxu2 %v5038_v35  ;;  %923 = vmatpush.msra.mxu1 %v5033_v22  ;;  %7350 = vst [vmem:[#allocation41_spill] sm:$0xff] %v5229_v21 }
  0xb6   :  { %943 = vmatpush.msra.mxu2 %v5040_v8  ;;  %v201_v41 = vpop.f32.mrf.mxu1  ;;  %924 = vmatpush.msra.mxu1 %v5043_v38 }
  0xb7   :  { %v202_v50 = vadd.f32 %v201_v41, %v5204_v45 }
  0xb8   :  { %944 = vmatpush.msra.mxu2 %v5047_v25  ;;  %925 = vmatpush.msra.mxu1 %v5051_v28 }
  0xb9   :  { %v468_v17 = vpop.f32.mrf.mxu0 }
  0xba   :  { %945 = vmatpush.msra.mxu2 %v5055_v30  ;;  %v531_v20 = vadd.f32 %v468_v17, %v202_v50 }
  0xbc   :  { %v5164_v44 = vpop.f32.mrf.mxu2  ;;  %v4253_v54 = vmul.f32 -1.442695, %v531_v20 }
  0xbd   :  { %7327 = vst [vmem:[#allocation18_spill] sm:$0xff] %v5164_v44  ;;  %v324_v48 = vpop.f32.mrf.mxu3 }
  0xbe   :  { %v5166_v51 = vpop.f32.mrf.mxu1  ;;  %4331 = vpow2.f32 %v4253_v54  ;;  %v325_v60 = vadd.f32 %v324_v48, %v5217_v47 }
  0xc4   :  { %v4332_v0 = vpop.eup %4331 }
  0xc5   :  { %v5168_v55 = vpop.f32.mrf.mxu2  ;;  %v538_v5 = vadd.f32 1.0, %v4332_v0 }
  0xc6   :  { %7328 = vst [vmem:[#allocation19_spill] sm:$0xff] %v5168_v55  ;;  %v5170_v59 = vpop.f32.mrf.mxu3  ;;  %v5172_v62 = vpop.f32.mrf.mxu1  ;;  %v5481_v55 = vld [vmem:[#allocation9 + $0x10] sm:$0xff] }
  0xc7   :  { %vm544_vm1 = vweird.f32 %v538_v5  ;;  %v550_v43 = vand.u32 2147483648, %v538_v5 }
  0xcd   :  { %v5174_v2 = vpop.f32.mrf.mxu2 }
  0xce   :  { %7329 = vst [vmem:[#allocation20_spill] sm:$0xff] %v5174_v2  ;;  %v5176_v7 = vpop.f32.mrf.mxu1  ;;  %v5178_v10 = vpop.f32.mrf.mxu3 }
  0xcf   :  { %7330 = vst [vmem:[#allocation21_spill] sm:$0xff] %v5176_v7 }
  0xd5   :  { %v5180_v15 = vpop.f32.mrf.mxu2 }
  0xd6   :  { %7331 = vst [vmem:[#allocation22_spill] sm:$0xff] %v5180_v15  ;;  %v242_v19 = vpop.f32.mrf.mxu1  ;;  %v5182_v24 = vpop.f32.mrf.mxu3 }
  0xd7   :  { %7332 = vst [vmem:[#allocation23_spill] sm:$0xff] %v5182_v24  ;;  %v243_v4 = vadd.f32 %v242_v19, %v5222_v1 }
  0xdd   :  { %v283_v27 = vpop.f32.mrf.mxu2 }
  0xde   :  { %v5184_v31 = vpop.f32.mrf.mxu1  ;;  %v5186_v33 = vpop.f32.mrf.mxu3  ;;  %v284_v38 = vadd.f32 %v283_v27, %v5229_v21 }
  0xdf   :  { %7333 = vst [vmem:[#allocation24_spill] sm:$0xff] %v5186_v33 }
  0xe5   :  { %v5188_v34 = vpop.f32.mrf.mxu2 }
  0xe6   :  { %v5190_v11 = vpop.f32.mrf.mxu1  ;;  %v5192_v36 = vpop.f32.mrf.mxu3 }
  0xe7   :  { %7334 = vst [vmem:[#allocation25_spill] sm:$0xff] %v5192_v36  ;;  %v5473_v36 = vld [vmem:[#allocation9 + $0x30] sm:$0xff] }
  0xed   :  { %v5194_v37 = vpop.f32.mrf.mxu2 }
  0xee   :  { %v5196_v39 = vpop.f32.mrf.mxu1  ;;  %v5202_v42 = vpop.f32.mrf.mxu3 }
  0xef   :  { %7335 = vst [vmem:[#allocation26_spill] sm:$0xff] %v5196_v39 }
  0xf0   :  { %7338 = vst [vmem:[#allocation29_spill] sm:$0xff] %v5202_v42 }
  0xf5   :  { %v5198_v40 = vpop.f32.mrf.mxu2 }
  0xf6   :  { %7336 = vst [vmem:[#allocation27_spill] sm:$0xff] %v5198_v40  ;;  %v5200_v14 = vpop.f32.mrf.mxu1  ;;  %v5211_v52 = vpop.f32.mrf.mxu3 }
  0xf7   :  { %7337 = vst [vmem:[#allocation28_spill] sm:$0xff] %v5200_v14 }
  0xf8   :  { %7342 = vst [vmem:[#allocation33_spill] sm:$0xff] %v5211_v52 }
  0xfd   :  { %v5206_v46 = vpop.f32.mrf.mxu2 }
  0xfe   :  { %7340 = vst [vmem:[#allocation31_spill] sm:$0xff] %v5206_v46  ;;  %v5208_v49 = vpop.f32.mrf.mxu1  ;;  %v528_v58 = vpop.f32.mrf.mxu3  ;;  %v5483_v46 = vld [vmem:[#allocation9 + $0x18] sm:$0xff] }
  0xff   :  { %7341 = vst [vmem:[#allocation32_spill] sm:$0xff] %v5208_v49  ;;  %v534_v63 = vadd.f32 %v528_v58, %v325_v60  ;;  %v548_v58 = vand.u32 2147483647, %v538_v5  ;;  %v5479_v49 = vld [vmem:[#allocation9 + $0x8] sm:$0xff] }
 0x101   :  { %v4255_v3 = vmul.f32 -1.442695, %v534_v63  ;;  %vm549_vm6 = vcmp.eq.f32.partialorder %v548_v58, 8.507059e+37  ;;  %v5265_v58 = vld [vmem:[#allocation9 + $0xe0] sm:$0xff] }
 0x103   :  { %4333 = vpow2.f32 %v4255_v3 }
 0x104   :  { %4335 = vrcp.f32 %v538_v5 }
 0x105   :  { %v5215_v56 = vpop.f32.mrf.mxu2 }
 0x106   :  { %v5213_v53 = vpop.f32.mrf.mxu1  ;;  %7344 = vst [vmem:[#allocation35_spill] sm:$0xff] %v5215_v56  ;;  %v5471_v56 = vld [vmem:[#allocation9 + $0x28] sm:$0xff] }
 0x107   :  { %7343 = vst [vmem:[#allocation34_spill] sm:$0xff] %v5213_v53  ;;  %v5462_v53 = vld [vmem:[#allocation9 + $0x48] sm:$0xff] }
 0x109   :  { %v4334_v16 = vpop.eup %4333 }
 0x10a   :  { %v4336_v18 = vpop.eup %4335  ;;  %v577_v32 = vadd.f32 1.0, %v4334_v16 }
 0x10b   :  { %v540_v13 = vmul.f32 %v4336_v18, %v538_v5  ;;  %vm545_vm0 = vweird.f32 %v4336_v18 }
 0x10c   :  { %vm546_vm3 = vmor %vm544_vm1, %vm545_vm0  ;;  %vm583_vm9 = vweird.f32 %v577_v32 }
 0x10d   :  { %v5224_v26 = vpop.f32.mrf.mxu2  ;;  %v541_v35 = vsub.f32 1.0, %v540_v13 }
 0x10e   :  { %v5220_v23 = vpop.f32.mrf.mxu1  ;;  %7348 = vst [vmem:[#allocation39_spill] sm:$0xff] %v5224_v26  ;;  %v5457_v26 = vld [vmem:[#allocation9 + $0x78] sm:$0xff] }
 0x10f   :  { %7346 = vst [vmem:[#allocation37_spill] sm:$0xff] %v5220_v23  ;;  %v542_v30 = vmul.f32 %v4336_v18, %v541_v35 }
 0x111   :  { %v543_v17 = vadd.f32 %v4336_v18, %v542_v30 }
 0x113   :  { %v547_v27 = vsel %vm546_vm3, %v4336_v18, %v543_v17  ;;  %v587_v18 = vand.u32 2147483647, %v577_v32  ;;  %v5253_v17 = vld [vmem:[#allocation9 + $0x160] sm:$0xff] }
 0x115   :  { %vm588_vm11 = vcmp.eq.f32.partialorder %v587_v18, 8.507059e+37  ;;  %v5289_v18 = vld [vmem:[#allocation9 + $0x20] sm:$0xff] }
 0x116   :  { %v488_v61 = vpop.f32.mrf.mxu1  ;;  %v5227_v29 = vpop.f32.mrf.mxu2 }
 0x117   :  { %v532_v9 = vadd.f32 %v488_v61, %v243_v4  ;;  %7349 = vst [vmem:[#allocation40_spill] sm:$0xff] %v5227_v29  ;;  %v551_v61 = vor.u32 1.1754944e-38, %v550_v43  ;;  %v5259_v43 = vld [vmem:[#allocation9 + $0x120] sm:$0xff] }
 0x119   :  { %v4254_v12 = vmul.f32 -1.442695, %v532_v9  ;;  %v552_v16 = vsel %vm549_vm6, %v551_v61, %v547_v27 }
 0x11b   :  { %4337 = vpow2.f32 %v4254_v12 }
 0x11c   :  { %4339 = vrcp.f32 %v577_v32 }
 0x11e   :  { %v508_v8 = vpop.f32.mrf.mxu2 }
 0x11f   :  { %v533_v25 = vadd.f32 %v508_v8, %v284_v38  ;;  %v589_v38 = vand.u32 2147483648, %v577_v32 }
 0x121   :  { %v4338_v6 = vpop.eup %4337 }
 0x122   :  { %v557_v22 = vadd.f32 1.0, %v4338_v6  ;;  %v4340_v28 = vpop.eup %4339 }
 0x123   :  { %v579_v19 = vmul.f32 %v4340_v28, %v577_v32  ;;  %vm584_vm8 = vweird.f32 %v4340_v28  ;;  %v5244_v32 = vld [vmem:[#allocation9 + $0x1c0] sm:$0xff] }
 0x124   :  { %4341 = vrcp.f32 %v557_v22  ;;  %v569_v20 = vand.u32 2147483648, %v557_v22  ;;  %v567_v60 = vand.u32 2147483647, %v557_v22  ;;  %vm563_vm4 = vweird.f32 %v557_v22  ;;  %vm585_vm10 = vmor %vm583_vm9, %vm584_vm8 }
 0x125   :  { %4343 = vtanh.f32 %v533_v25  ;;  %v580_v63 = vsub.f32 1.0, %v579_v19  ;;  %v590_v25 = vor.u32 1.1754944e-38, %v589_v38  ;;  %v5241_v19 = vld [vmem:[#allocation9 + $0x1e0] sm:$0xff] }
 0x126   :  { %v570_v4 = vor.u32 1.1754944e-38, %v569_v20  ;;  %vm568_vm7 = vcmp.eq.f32.partialorder %v567_v60, 8.507059e+37  ;;  %890 = vmatpush.msra.mxu0 %v5241_v19  ;;  %v5256_v20 = vld [vmem:[#allocation9 + $0x140] sm:$0xff]  ;;  %v205_v60 = vadd.f32 %v5166_v51, %v5204_v45 }
 0x127   :  { %v581_v12 = vmul.f32 %v4340_v28, %v580_v63  ;;  %v246_v63 = vadd.f32 %v5184_v31, %v5222_v1  ;;  %v5278_v51 = vld [vmem:[#allocation9 + $0x80] sm:$0xff]  ;;  %v328_v31 = vadd.f32 %v5170_v59, %v5217_v47 }
 0x128   :  { %891 = vmatpush.msra.mxu0 %v5244_v32 }
 0x129   :  { %v582_v8 = vadd.f32 %v4340_v28, %v581_v12 }
 0x12a   :  { %v4342_v41 = vpop.eup %4341 }
 0x12b   :  { %v559_v48 = vmul.f32 %v4342_v41, %v557_v22  ;;  %vm564_vm2 = vweird.f32 %v4342_v41  ;;  %v4344_v3 = vpop.eup %4343  ;;  %v586_v22 = vsel %vm585_vm10, %v4340_v28, %v582_v8  ;;  %v5247_v28 = vld [vmem:[#allocation9 + $0x1a0] sm:$0xff] }
 0x12c   :  { %vm565_vm5 = vmor %vm563_vm4, %vm564_vm2  ;;  %v594_v35 = vmul.f32 %v4344_v3, %v552_v16  ;;  %892 = vmatpush.msra.mxu0 %v5247_v28  ;;  %v5272_v3 = vld [vmem:[#allocation9 + $0xc0] sm:$0xff] }
 0x12d   :  { %v560_v50 = vsub.f32 1.0, %v559_v48  ;;  %v5286_v8 = vld [vmem:[#allocation9 + $0x40] sm:$0xff] }
 0x12f   :  { %v561_v54 = vmul.f32 %v4342_v41, %v560_v50  ;;  %v5250_v50 = vld [vmem:[#allocation9 + $0x180] sm:$0xff] }
 0x130   :  { %893 = vmatpush.msra.mxu0 %v5250_v50 }
 0x131   :  { %v562_v0 = vadd.f32 %v4342_v41, %v561_v54  ;;  %v5262_v54 = vld [vmem:[#allocation9 + $0x100] sm:$0xff] }
 0x132   :  { %894 = vmatpush.msra.mxu0 %v5253_v17 }
 0x133   :  { %v566_v9 = vsel %vm565_vm5, %v4342_v41, %v562_v0  ;;  %v591_v41 = vsel %vm588_vm11, %v590_v25, %v586_v22  ;;  %v5292_v25 = vld [vmem:[#allocation9] sm:$0xff] }
 0x134   :  { %v571_v6 = vsel %vm568_vm7, %v570_v4, %v566_v9  ;;  %895 = vmatpush.msra.mxu0 %v5256_v20  ;;  %v5275_v9 = vld [vmem:[#allocation9 + $0xa0] sm:$0xff] }
 0x135   :  { %v593_v13 = vmul.f32 0.0, %v571_v6  ;;  %v5283_v6 = vld [vmem:[#allocation9 + $0x60] sm:$0xff] }
 0x136   :  { %896 = vmatpush.msra.mxu0 %v5259_v43 }
 0x137   :  { %v5232_v5 = vadd.f32 %v594_v35, %v593_v13 }
 0x138   :  { %897 = vmatpush.msra.mxu0 %v5262_v54 }
 0x139   :  { %4345 = vtanh.f32 %v5232_v5 }
 0x13a   :  { %898 = vmatpush.msra.mxu0 %v5265_v58 }
 0x13c   :  { %899 = vmatpush.msra.mxu0 %v5272_v3 }
 0x13e   :  { %900 = vmatpush.msra.mxu0 %v5275_v9 }
 0x13f   :  { %v4346_v30 = vpop.eup %4345 }
 0x140   :  { %v5235_v48 = vmul.f32 %v4346_v30, %v591_v41  ;;  %901 = vmatpush.msra.mxu0 %v5278_v51 }
 0x142   :  { %7351 = vst [vmem:[#allocation42_spill] sm:$0xff] %v5235_v48  ;;  %686 = vmatmul.f32.vlgmr.msrb.gmra.mxu0 %v5235_v48  ;;  %706 = vmatmul.f32.vlgmr.msrb.gmra.mxu1 %v5235_v48 }
 0x143   :  { %726 = vmatmul.f32.vlgmr.msrb.gmra.mxu2 %v5235_v48  ;;  %746 = vmatmul.f32.vlgmr.msra.gmra.mxu3 %v5235_v48 }
 0x144   :  { %902 = vmatpush.msra.mxu0 %v5283_v6 }
 0x146   :  { %903 = vmatpush.msra.mxu0 %v5286_v8 }
 0x148   :  { %904 = vmatpush.msra.mxu0 %v5289_v18 }
 0x14a   :  { %905 = vmatpush.msra.mxu0 %v5292_v25 }
 0x14c   :  { %1110 = vmatpush.msrb.mxu0 %v5241_v19 }
 0x14e   :  { %1111 = vmatpush.msrb.mxu0 %v5244_v32 }
 0x150   :  { %1112 = vmatpush.msrb.mxu0 %v5247_v28 }
 0x152   :  { %1113 = vmatpush.msrb.mxu0 %v5250_v50 }
 0x154   :  { %1114 = vmatpush.msrb.mxu0 %v5253_v17 }
 0x156   :  { %1115 = vmatpush.msrb.mxu0 %v5256_v20 }
 0x158   :  { %1116 = vmatpush.msrb.mxu0 %v5259_v43 }
 0x15a   :  { %1117 = vmatpush.msrb.mxu0 %v5262_v54 }
 0x15c   :  { %1118 = vmatpush.msrb.mxu0 %v5265_v58 }
 0x15e   :  { %1119 = vmatpush.msrb.mxu0 %v5272_v3 }
 0x160   :  { %1120 = vmatpush.msrb.mxu0 %v5275_v9 }
 0x162   :  { %1121 = vmatpush.msrb.mxu0 %v5278_v51 }
 0x164   :  { %1122 = vmatpush.msrb.mxu0 %v5283_v6 }
 0x166   :  { %1123 = vmatpush.msrb.mxu0 %v5286_v8 }
 0x168   :  { %1124 = vmatpush.msrb.mxu0 %v5289_v18 }
 0x16a   :  { %1125 = vmatpush.msrb.mxu0 %v5292_v25 }
 0x1bf   :  { %v687_v27 = vpop.f32.mrf.mxu0  ;;  %v707_v0 = vpop.f32.mrf.mxu1 }
 0x1c0   :  { %v750_v4 = vadd.f32 %v687_v27, %v205_v60  ;;  %v751_v61 = vadd.f32 %v707_v0, %v246_v63  ;;  %v287_v27 = vadd.f32 %v5188_v34, %v5229_v21 }
 0x1c2   :  { %v4256_v12 = vmul.f32 -1.442695, %v750_v4  ;;  %v4257_v16 = vmul.f32 -1.442695, %v751_v61 }
 0x1c4   :  { %4347 = vpow2.f32 %v4256_v12 }
 0x1c5   :  { %4349 = vpow2.f32 %v4257_v16 }
 0x1c6   :  { %v747_v13 = vpop.f32.mrf.mxu3  ;;  %v727_v60 = vpop.f32.mrf.mxu2 }
 0x1c7   :  { %v753_v35 = vadd.f32 %v747_v13, %v328_v31  ;;  %v752_v61 = vadd.f32 %v727_v60, %v287_v27 }
 0x1c9   :  { %v4258_v38 = vmul.f32 -1.442695, %v753_v35 }
 0x1ca   :  { %v4348_v22 = vpop.eup %4347 }
 0x1cb   :  { %v4350_v59 = vpop.eup %4349  ;;  %v757_v30 = vadd.f32 1.0, %v4348_v22  ;;  %4351 = vpow2.f32 %v4258_v38 }
 0x1cc   :  { %v776_v41 = vadd.f32 1.0, %v4350_v59 }
 0x1cd   :  { %4353 = vrcp.f32 %v757_v30  ;;  %v769_v38 = vand.u32 2147483648, %v757_v30  ;;  %v767_v59 = vand.u32 2147483647, %v757_v30  ;;  %vm763_vm14 = vweird.f32 %v757_v30 }
 0x1ce   :  { %4355 = vrcp.f32 %v776_v41  ;;  %v788_v34 = vand.u32 2147483648, %v776_v41  ;;  %v786_v60 = vand.u32 2147483647, %v776_v41  ;;  %vm782_vm15 = vweird.f32 %v776_v41 }
 0x1cf   :  { %vm768_vm2 = vcmp.eq.f32.partialorder %v767_v59, 8.507059e+37  ;;  %v5393_v59 = vld [vmem:[#allocation9 + $0x128] sm:$0xff] }
 0x1d0   :  { %vm787_vm3 = vcmp.eq.f32.partialorder %v786_v60, 8.507059e+37  ;;  %7355 = vst [vmem:[#allocation46_spill] sm:$0xff] %v5393_v59  ;;  %v5395_v60 = vld [vmem:[#allocation9 + $0x130] sm:$0xff] }
 0x1d1   :  { %v4352_v63 = vpop.eup %4351 }
 0x1d2   :  { %v796_v0 = vadd.f32 1.0, %v4352_v63 }
 0x1d3   :  { %v4354_v4 = vpop.eup %4353 }
 0x1d4   :  { %v4356_v12 = vpop.eup %4355  ;;  %v759_v16 = vmul.f32 %v4354_v4, %v757_v30  ;;  %4357 = vrcp.f32 %v796_v0  ;;  %vm764_vm12 = vweird.f32 %v4354_v4  ;;  %vm802_vm5 = vweird.f32 %v796_v0 }
 0x1d5   :  { %v778_v31 = vmul.f32 %v4356_v12, %v776_v41  ;;  %4359 = vtanh.f32 %v752_v61  ;;  %vm783_vm13 = vweird.f32 %v4356_v12  ;;  %vm765_vm0 = vmor %vm763_vm14, %vm764_vm12  ;;  %v789_v61 = vor.u32 1.1754944e-38, %v788_v34  ;;  %v5388_v34 = vld [vmem:[#allocation9 + $0x158] sm:$0xff] }
 0x1d6   :  { %v760_v13 = vsub.f32 1.0, %v759_v16  ;;  %v770_v16 = vor.u32 1.1754944e-38, %v769_v38  ;;  %vm784_vm1 = vmor %vm782_vm15, %vm783_vm13  ;;  %7354 = vst [vmem:[#allocation45_spill] sm:$0xff] %v5388_v34 }
 0x1d7   :  { %v779_v35 = vsub.f32 1.0, %v778_v31 }
 0x1d8   :  { %v761_v22 = vmul.f32 %v4354_v4, %v760_v13 }
 0x1d9   :  { %v780_v63 = vmul.f32 %v4356_v12, %v779_v35 }
 0x1da   :  { %v4358_v27 = vpop.eup %4357  ;;  %v762_v57 = vadd.f32 %v4354_v4, %v761_v22 }
 0x1db   :  { %v781_v31 = vadd.f32 %v4356_v12, %v780_v63  ;;  %v798_v29 = vmul.f32 %v4358_v27, %v796_v0  ;;  %v4360_v52 = vpop.eup %4359  ;;  %vm803_vm4 = vweird.f32 %v4358_v27 }
 0x1dc   :  { %v766_v13 = vsel %vm765_vm0, %v4354_v4, %v762_v57  ;;  %v808_v4 = vand.u32 2147483648, %v796_v0  ;;  %vm804_vm6 = vmor %vm802_vm5, %vm803_vm4 }
 0x1dd   :  { %v771_v35 = vsel %vm768_vm2, %v770_v16, %v766_v13  ;;  %v785_v23 = vsel %vm784_vm1, %v4356_v12, %v781_v31  ;;  %v799_v15 = vsub.f32 1.0, %v798_v29  ;;  %v806_v29 = vand.u32 2147483647, %v796_v0  ;;  %v5386_v0 = vld [vmem:[#allocation9 + $0x150] sm:$0xff]  ;;  %v5402_v16 = vld [vmem:[#allocation9 + $0x108] sm:$0xff] }
 0x1de   :  { %v790_v22 = vsel %vm787_vm3, %v789_v61, %v785_v23  ;;  %v813_v30 = vmul.f32 %v4360_v52, %v771_v35  ;;  %7353 = vst [vmem:[#allocation44_spill] sm:$0xff] %v5386_v0  ;;  %v5404_v31 = vld [vmem:[#allocation9 + $0x110] sm:$0xff]  ;;  %v5406_v61 = vld [vmem:[#allocation9 + $0x118] sm:$0xff]  ;;  %v5411_v13 = vld [vmem:[#allocation9 + $0xe8] sm:$0xff] }
 0x1df   :  { %v812_v41 = vmul.f32 %v790_v22, %v5232_v5  ;;  %v800_v38 = vmul.f32 %v4358_v27, %v799_v15  ;;  %v809_v15 = vor.u32 1.1754944e-38, %v808_v4  ;;  %vm807_vm7 = vcmp.eq.f32.partialorder %v806_v29, 8.507059e+37  ;;  %v5413_v35 = vld [vmem:[#allocation9 + $0xf0] sm:$0xff]  ;;  %v5415_v22 = vld [vmem:[#allocation9 + $0xf8] sm:$0xff]  ;;  %v5424_v4 = vld [vmem:[#allocation9 + $0xc8] sm:$0xff] }
 0x1e0   :  { %v5426_v29 = vld [vmem:[#allocation9 + $0xd0] sm:$0xff] }
 0x1e1   :  { %v5308_v63 = vadd.f32 %v813_v30, %v812_v41  ;;  %v801_v57 = vadd.f32 %v4358_v27, %v800_v38  ;;  %v208_v30 = vadd.f32 %v5172_v62, %v5204_v45  ;;  %v249_v41 = vadd.f32 %v5190_v11, %v5222_v1  ;;  %v5433_v62 = vld [vmem:[#allocation9 + $0xa8] sm:$0xff]  ;;  %v5435_v11 = vld [vmem:[#allocation9 + $0xb0] sm:$0xff] }
 0x1e3   :  { %4361 = vtanh.f32 %v5308_v63  ;;  %v805_v52 = vsel %vm804_vm6, %v4358_v27, %v801_v57  ;;  %v5397_v27 = vld [vmem:[#allocation9 + $0x138] sm:$0xff] }
 0x1e4   :  { %v810_v5 = vsel %vm807_vm7, %v809_v15, %v805_v52  ;;  %7356 = vst [vmem:[#allocation47_spill] sm:$0xff] %v5397_v27  ;;  %v5428_v52 = vld [vmem:[#allocation9 + $0xd8] sm:$0xff] }
 0x1e9   :  { %v4362_v23 = vpop.eup %4361 }
 0x1ea   :  { %v5316_v12 = vmul.f32 %v4362_v23, %v810_v5  ;;  %v5437_v5 = vld [vmem:[#allocation9 + $0xb8] sm:$0xff] }
 0x1ec   :  { %7352 = vst [vmem:[#allocation43_spill] sm:$0xff] %v5316_v12  ;;  %906 = vmatmul.f32.vlgmr.msra.gmra.mxu0 %v5316_v12  ;;  %926 = vmatmul.f32.vlgmr.msra.gmra.mxu1 %v5316_v12 }
 0x1ed   :  { %946 = vmatmul.f32.vlgmr.msra.gmra.mxu2 %v5316_v12  ;;  %966 = vmatmul.f32.vlgmr.msrb.gmra.mxu3 %v5316_v12 }
 0x1ee   :  { %1330 = vmatpush.msra.mxu0 %v5241_v19  ;;  %v5339_v19 = vld [vmem:[#allocation9 + $0x1e8] sm:$0xff] }
 0x1ef   :  { %1130 = vmatpush.msrb.mxu1 %v5339_v19 }
 0x1f0   :  { %1331 = vmatpush.msra.mxu0 %v5244_v32  ;;  %v5341_v32 = vld [vmem:[#allocation9 + $0x1f0] sm:$0xff] }
 0x1f1   :  { %1150 = vmatpush.msrb.mxu2 %v5341_v32 }
 0x1f2   :  { %1332 = vmatpush.msra.mxu0 %v5247_v28  ;;  %v5343_v28 = vld [vmem:[#allocation9 + $0x1f8] sm:$0xff] }
 0x1f3   :  { %1170 = vmatpush.msra.mxu3 %v5343_v28 }
 0x1f4   :  { %1333 = vmatpush.msra.mxu0 %v5250_v50  ;;  %v5348_v50 = vld [vmem:[#allocation9 + $0x1c8] sm:$0xff] }
 0x1f5   :  { %1131 = vmatpush.msrb.mxu1 %v5348_v50 }
 0x1f6   :  { %1334 = vmatpush.msra.mxu0 %v5253_v17  ;;  %v5350_v17 = vld [vmem:[#allocation9 + $0x1d0] sm:$0xff] }
 0x1f7   :  { %1151 = vmatpush.msrb.mxu2 %v5350_v17 }
 0x1f8   :  { %1335 = vmatpush.msra.mxu0 %v5256_v20  ;;  %v5352_v20 = vld [vmem:[#allocation9 + $0x1d8] sm:$0xff] }
 0x1f9   :  { %1171 = vmatpush.msra.mxu3 %v5352_v20 }
 0x1fa   :  { %1336 = vmatpush.msra.mxu0 %v5259_v43  ;;  %v5357_v43 = vld [vmem:[#allocation9 + $0x1a8] sm:$0xff] }
 0x1fb   :  { %1132 = vmatpush.msrb.mxu1 %v5357_v43 }
 0x1fc   :  { %1337 = vmatpush.msra.mxu0 %v5262_v54  ;;  %v5359_v54 = vld [vmem:[#allocation9 + $0x1b0] sm:$0xff] }
 0x1fd   :  { %1152 = vmatpush.msrb.mxu2 %v5359_v54 }
 0x1fe   :  { %1338 = vmatpush.msra.mxu0 %v5265_v58  ;;  %v5361_v58 = vld [vmem:[#allocation9 + $0x1b8] sm:$0xff] }
 0x1ff   :  { %1172 = vmatpush.msra.mxu3 %v5361_v58 }
 0x200   :  { %1339 = vmatpush.msra.mxu0 %v5272_v3  ;;  %v5366_v3 = vld [vmem:[#allocation9 + $0x188] sm:$0xff] }
 0x201   :  { %1133 = vmatpush.msrb.mxu1 %v5366_v3 }
 0x202   :  { %1340 = vmatpush.msra.mxu0 %v5275_v9  ;;  %v5368_v9 = vld [vmem:[#allocation9 + $0x190] sm:$0xff] }
 0x203   :  { %1153 = vmatpush.msrb.mxu2 %v5368_v9 }
 0x204   :  { %1341 = vmatpush.msra.mxu0 %v5278_v51  ;;  %v5370_v51 = vld [vmem:[#allocation9 + $0x198] sm:$0xff] }
 0x205   :  { %1173 = vmatpush.msra.mxu3 %v5370_v51 }
 0x206   :  { %1342 = vmatpush.msra.mxu0 %v5283_v6  ;;  %v5375_v6 = vld [vmem:[#allocation9 + $0x168] sm:$0xff] }
 0x207   :  { %1134 = vmatpush.msrb.mxu1 %v5375_v6 }
 0x208   :  { %1343 = vmatpush.msra.mxu0 %v5286_v8  ;;  %v5377_v8 = vld [vmem:[#allocation9 + $0x170] sm:$0xff] }
 0x209   :  { %1154 = vmatpush.msrb.mxu2 %v5377_v8 }
 0x20a   :  { %1344 = vmatpush.msra.mxu0 %v5289_v18  ;;  %v5379_v18 = vld [vmem:[#allocation9 + $0x178] sm:$0xff] }
 0x20b   :  { %1174 = vmatpush.msra.mxu3 %v5379_v18  ;;  %1155 = vmatpush.msrb.mxu2 %v5386_v0 }
 0x20c   :  { %1345 = vmatpush.msra.mxu0 %v5292_v25  ;;  %v5384_v25 = vld [vmem:[#allocation9 + $0x148] sm:$0xff] }
 0x20d   :  { %1135 = vmatpush.msrb.mxu1 %v5384_v25  ;;  %1175 = vmatpush.msra.mxu3 %v5388_v34 }
 0x20e   :  { %1156 = vmatpush.msrb.mxu2 %v5395_v60 }
 0x20f   :  { %1136 = vmatpush.msrb.mxu1 %v5393_v59  ;;  %1176 = vmatpush.msra.mxu3 %v5397_v27 }
 0x210   :  { %1157 = vmatpush.msrb.mxu2 %v5404_v31 }
 0x211   :  { %1137 = vmatpush.msrb.mxu1 %v5402_v16  ;;  %1177 = vmatpush.msra.mxu3 %v5406_v61 }
 0x212   :  { %1158 = vmatpush.msrb.mxu2 %v5413_v35 }
 0x213   :  { %1138 = vmatpush.msrb.mxu1 %v5411_v13  ;;  %1178 = vmatpush.msra.mxu3 %v5415_v22 }
 0x214   :  { %1159 = vmatpush.msrb.mxu2 %v5426_v29 }
 0x215   :  { %1139 = vmatpush.msrb.mxu1 %v5424_v4  ;;  %1179 = vmatpush.msra.mxu3 %v5428_v52 }
 0x216   :  { %1160 = vmatpush.msrb.mxu2 %v5435_v11 }
 0x217   :  { %1140 = vmatpush.msrb.mxu1 %v5433_v62  ;;  %1180 = vmatpush.msra.mxu3 %v5437_v5 }
 0x269   :  { %v907_v38 = vpop.f32.mrf.mxu0  ;;  %v927_v57 = vpop.f32.mrf.mxu1 }
 0x26a   :  { %v970_v15 = vadd.f32 %v907_v38, %v208_v30  ;;  %v971_v23 = vadd.f32 %v927_v57, %v249_v41  ;;  %v5442_v30 = vld [vmem:[#allocation9 + $0x88] sm:$0xff]  ;;  %v5444_v41 = vld [vmem:[#allocation9 + $0x90] sm:$0xff]  ;;  %v5446_v38 = vld [vmem:[#allocation9 + $0x98] sm:$0xff]  ;;  %v331_v57 = vadd.f32 %v5178_v10, %v5217_v47 }
 0x26b   :  { %1141 = vmatpush.msrb.mxu1 %v5442_v30  ;;  %1161 = vmatpush.msrb.mxu2 %v5444_v41  ;;  %v5464_v10 = vld [vmem:[#allocation9 + $0x50] sm:$0xff] }
 0x26c   :  { %v4259_v12 = vmul.f32 -1.442695, %v970_v15  ;;  %v4260_v48 = vmul.f32 -1.442695, %v971_v23  ;;  %1181 = vmatpush.msra.mxu3 %v5446_v38  ;;  %v5453_v15 = vld [vmem:[#allocation9 + $0x68] sm:$0xff]  ;;  %v5455_v23 = vld [vmem:[#allocation9 + $0x70] sm:$0xff] }
 0x26d   :  { %1142 = vmatpush.msrb.mxu1 %v5453_v15  ;;  %1162 = vmatpush.msrb.mxu2 %v5455_v23 }
 0x26e   :  { %4363 = vpow2.f32 %v4259_v12  ;;  %1182 = vmatpush.msra.mxu3 %v5457_v26 }
 0x26f   :  { %4365 = vpow2.f32 %v4260_v48  ;;  %v5466_v48 = vld [vmem:[#allocation9 + $0x58] sm:$0xff]  ;;  %1143 = vmatpush.msrb.mxu1 %v5462_v53  ;;  %1163 = vmatpush.msrb.mxu2 %v5464_v10 }
 0x270   :  { %v967_v42 = vpop.f32.mrf.mxu3  ;;  %1183 = vmatpush.msra.mxu3 %v5466_v48 }
 0x271   :  { %v973_v12 = vadd.f32 %v967_v42, %v331_v57  ;;  %v5475_v42 = vld [vmem:[#allocation9 + $0x38] sm:$0xff]  ;;  %1144 = vmatpush.msrb.mxu1 %v5471_v56  ;;  %1164 = vmatpush.msrb.mxu2 %v5473_v36 }
 0x272   :  { %1184 = vmatpush.msra.mxu3 %v5475_v42 }
 0x273   :  { %v4261_v2 = vmul.f32 -1.442695, %v973_v12  ;;  %1145 = vmatpush.msrb.mxu1 %v5479_v49  ;;  %1165 = vmatpush.msrb.mxu2 %v5481_v55 }
 0x274   :  { %v4364_v57 = vpop.eup %4363  ;;  %1185 = vmatpush.msra.mxu3 %v5483_v46 }
 0x275   :  { %v4366_v12 = vpop.eup %4365  ;;  %v5485_v33 = vadd.f32 1.0, %v4364_v57  ;;  %4367 = vpow2.f32 %v4261_v2  ;;  %1350 = vmatpush.msra.mxu1 %v5339_v19  ;;  %1370 = vmatpush.msra.mxu2 %v5341_v32  ;;  %v947_v2 = vpop.f32.mrf.mxu2 }
 0x276   :  { %v5488_v14 = vadd.f32 1.0, %v4366_v12  ;;  %1390 = vmatpush.msrb.mxu3 %v5343_v28  ;;  %v290_v12 = vadd.f32 %v5194_v37, %v5229_v21 }
 0x277   :  { %4369 = vrcp.f32 %v5485_v33  ;;  %1351 = vmatpush.msra.mxu1 %v5348_v50  ;;  %1371 = vmatpush.msra.mxu2 %v5350_v17  ;;  %v987_v7 = vand.u32 2147483647, %v5485_v33  ;;  %vm983_vm10 = vweird.f32 %v5485_v33 }
 0x278   :  { %4371 = vrcp.f32 %v5488_v14  ;;  %1391 = vmatpush.msrb.mxu3 %v5352_v20  ;;  %v972_v24 = vadd.f32 %v947_v2, %v290_v12  ;;  %v989_v12 = vand.u32 2147483648, %v5485_v33  ;;  %v1008_v21 = vand.u32 2147483648, %v5488_v14 }
 0x279   :  { %1352 = vmatpush.msra.mxu1 %v5357_v43  ;;  %1372 = vmatpush.msra.mxu2 %v5359_v54  ;;  %v1006_v45 = vand.u32 2147483647, %v5488_v14  ;;  %vm1002_vm11 = vweird.f32 %v5488_v14  ;;  %vm988_vm14 = vcmp.eq.f32.partialorder %v987_v7, 8.507059e+37 }
 0x27a   :  { %1392 = vmatpush.msrb.mxu3 %v5361_v58 }
 0x27b   :  { %v4368_v57 = vpop.eup %4367  ;;  %1353 = vmatpush.msra.mxu1 %v5366_v3  ;;  %1373 = vmatpush.msra.mxu2 %v5368_v9  ;;  %vm1007_vm15 = vcmp.eq.f32.partialorder %v1006_v45, 8.507059e+37 }
 0x27c   :  { %v5504_v44 = vadd.f32 1.0, %v4368_v57  ;;  %1393 = vmatpush.msrb.mxu3 %v5370_v51 }
 0x27d   :  { %v4370_v40 = vpop.eup %4369  ;;  %1354 = vmatpush.msra.mxu1 %v5375_v6  ;;  %1374 = vmatpush.msra.mxu2 %v5377_v8 }
 0x27e   :  { %v4372_v47 = vpop.eup %4371  ;;  %v979_v39 = vmul.f32 %v4370_v40, %v5485_v33  ;;  %4373 = vrcp.f32 %v5504_v44  ;;  %1394 = vmatpush.msrb.mxu3 %v5379_v18  ;;  %vm984_vm8 = vweird.f32 %v4370_v40  ;;  %vm1022_vm1 = vweird.f32 %v5504_v44 }
 0x27f   :  { %v998_v37 = vmul.f32 %v4372_v47, %v5488_v14  ;;  %4375 = vtanh.f32 %v972_v24  ;;  %1355 = vmatpush.msra.mxu1 %v5384_v25  ;;  %1375 = vmatpush.msra.mxu2 %v5386_v0  ;;  %vm1003_vm9 = vweird.f32 %v4372_v47  ;;  %vm985_vm12 = vmor %vm983_vm10, %vm984_vm8 }
 0x280   :  { %v980_v57 = vsub.f32 1.0, %v979_v39  ;;  %1395 = vmatpush.msrb.mxu3 %v5388_v34  ;;  %vm1004_vm13 = vmor %vm1002_vm11, %vm1003_vm9  ;;  %v1009_v34 = vor.u32 1.1754944e-38, %v1008_v21  ;;  %v1028_v21 = vand.u32 2147483648, %v5504_v44 }
 0x281   :  { %v999_v2 = vsub.f32 1.0, %v998_v37  ;;  %1356 = vmatpush.msra.mxu1 %v5393_v59  ;;  %1376 = vmatpush.msra.mxu2 %v5395_v60 }
 0x282   :  { %v981_v1 = vmul.f32 %v4370_v40, %v980_v57  ;;  %1396 = vmatpush.msrb.mxu3 %v5397_v27  ;;  %v990_v57 = vor.u32 1.1754944e-38, %v989_v12 }
 0x283   :  { %v1000_v39 = vmul.f32 %v4372_v47, %v999_v2  ;;  %1357 = vmatpush.msra.mxu1 %v5402_v16  ;;  %1377 = vmatpush.msra.mxu2 %v5404_v31 }
 0x284   :  { %v4374_v37 = vpop.eup %4373  ;;  %v982_v24 = vadd.f32 %v4370_v40, %v981_v1  ;;  %1397 = vmatpush.msrb.mxu3 %v5406_v61 }
 0x285   :  { %v1001_v0 = vadd.f32 %v4372_v47, %v1000_v39  ;;  %v1018_v2 = vmul.f32 %v4374_v37, %v5504_v44  ;;  %v4376_v33 = vpop.eup %4375  ;;  %1358 = vmatpush.msra.mxu1 %v5411_v13  ;;  %1378 = vmatpush.msra.mxu2 %v5413_v35  ;;  %vm1023_vm0 = vweird.f32 %v4374_v37 }
 0x286   :  { %v986_v59 = vsel %vm985_vm12, %v4370_v40, %v982_v24  ;;  %1398 = vmatpush.msrb.mxu3 %v5415_v22  ;;  %vm1024_vm2 = vmor %vm1022_vm1, %vm1023_vm0 }
 0x287   :  { %v991_v1 = vsel %vm988_vm14, %v990_v57, %v986_v59  ;;  %v1005_v27 = vsel %vm1004_vm13, %v4372_v47, %v1001_v0  ;;  %v1019_v14 = vsub.f32 1.0, %v1018_v2  ;;  %1359 = vmatpush.msra.mxu1 %v5424_v4  ;;  %1379 = vmatpush.msra.mxu2 %v5426_v29 }
 0x288   :  { %v1010_v12 = vsel %vm1007_vm15, %v1009_v34, %v1005_v27  ;;  %v1033_v39 = vmul.f32 %v4376_v33, %v991_v1  ;;  %1399 = vmatpush.msrb.mxu3 %v5428_v52  ;;  %v1029_v34 = vor.u32 1.1754944e-38, %v1028_v21 }
 0x289   :  { %v1032_v40 = vmul.f32 %v1010_v12, %v5308_v63  ;;  %v1020_v7 = vmul.f32 %v4374_v37, %v1019_v14  ;;  %1360 = vmatpush.msra.mxu1 %v5433_v62  ;;  %1380 = vmatpush.msra.mxu2 %v5435_v11  ;;  %v1026_v63 = vand.u32 2147483647, %v5504_v44 }
 0x28a   :  { %1400 = vmatpush.msrb.mxu3 %v5437_v5 }
 0x28b   :  { %v5540_v47 = vadd.f32 %v1033_v39, %v1032_v40  ;;  %v1021_v45 = vadd.f32 %v4374_v37, %v1020_v7  ;;  %1361 = vmatpush.msra.mxu1 %v5442_v30  ;;  %1381 = vmatpush.msra.mxu2 %v5444_v41  ;;  %vm1027_vm3 = vcmp.eq.f32.partialorder %v1026_v63, 8.507059e+37 }
 0x28c   :  { %1401 = vmatpush.msrb.mxu3 %v5446_v38 }
 0x28d   :  { %4377 = vtanh.f32 %v5540_v47  ;;  %1362 = vmatpush.msra.mxu1 %v5453_v15  ;;  %v1025_v0 = vsel %vm1024_vm2, %v4374_v37, %v1021_v45  ;;  %1382 = vmatpush.msra.mxu2 %v5455_v23 }
 0x28e   :  { %1402 = vmatpush.msrb.mxu3 %v5457_v26  ;;  %v1030_v59 = vsel %vm1027_vm3, %v1029_v34, %v1025_v0 }
 0x28f   :  { %1363 = vmatpush.msra.mxu1 %v5462_v53  ;;  %1383 = vmatpush.msra.mxu2 %v5464_v10 }
 0x290   :  { %1403 = vmatpush.msrb.mxu3 %v5466_v48 }
 0x291   :  { %1364 = vmatpush.msra.mxu1 %v5471_v56  ;;  %1384 = vmatpush.msra.mxu2 %v5473_v36 }
 0x292   :  { %1404 = vmatpush.msrb.mxu3 %v5475_v42 }
 0x293   :  { %v4378_v44 = vpop.eup %4377  ;;  %1365 = vmatpush.msra.mxu1 %v5479_v49  ;;  %1385 = vmatpush.msra.mxu2 %v5481_v55 }
 0x294   :  { %v5559_v27 = vmul.f32 %v4378_v44, %v1030_v59  ;;  %1405 = vmatpush.msrb.mxu3 %v5483_v46 }
 0x296   :  { %1126 = vmatmul.f32.vlgmr.msrb.gmra.mxu0 %v5559_v27  ;;  %1146 = vmatmul.f32.vlgmr.msrb.gmra.mxu1 %v5559_v27 }
 0x297   :  { %1166 = vmatmul.f32.vlgmr.msrb.gmra.mxu2 %v5559_v27  ;;  %1186 = vmatmul.f32.vlgmr.msra.gmra.mxu3 %v5559_v27 }
 0x298   :  { %1570 = vmatpush.msrb.mxu1 %v5339_v19  ;;  %1590 = vmatpush.msrb.mxu2 %v5341_v32  ;;  %v7357_v19 = vld [vmem:[#allocation44_spill] sm:$0xff]  ;;  %v7358_v32 = vld [vmem:[#allocation45_spill] sm:$0xff] }
 0x299   :  { %1610 = vmatpush.msra.mxu3 %v5343_v28  ;;  %v7359_v28 = vld [vmem:[#allocation46_spill] sm:$0xff] }
 0x29a   :  { %1571 = vmatpush.msrb.mxu1 %v5348_v50  ;;  %1591 = vmatpush.msrb.mxu2 %v5350_v17  ;;  %v7360_v50 = vld [vmem:[#allocation47_spill] sm:$0xff]  ;;  %v7361_v17 = vld [vmem:[#allocation30_spill] sm:$0xff] }
 0x29b   :  { %1611 = vmatpush.msra.mxu3 %v5352_v20 }
 0x29c   :  { %1572 = vmatpush.msrb.mxu1 %v5357_v43  ;;  %1592 = vmatpush.msrb.mxu2 %v5359_v54  ;;  %v7364_v43 = vld [vmem:[#allocation26_spill] sm:$0xff] }
 0x29d   :  { %1612 = vmatpush.msra.mxu3 %v5361_v58 }
 0x29e   :  { %1573 = vmatpush.msrb.mxu1 %v5366_v3  ;;  %1593 = vmatpush.msrb.mxu2 %v5368_v9 }
 0x29f   :  { %1613 = vmatpush.msra.mxu3 %v5370_v51 }
 0x2a0   :  { %1574 = vmatpush.msrb.mxu1 %v5375_v6  ;;  %1594 = vmatpush.msrb.mxu2 %v5377_v8  ;;  %v7365_v6 = vld [vmem:[#allocation36_spill] sm:$0xff]  ;;  %v7366_v8 = vld [vmem:[#allocation23_spill] sm:$0xff] }
 0x2a1   :  { %1614 = vmatpush.msra.mxu3 %v5379_v18 }
 0x2a2   :  { %1575 = vmatpush.msrb.mxu1 %v5384_v25  ;;  %1595 = vmatpush.msrb.mxu2 %v7357_v19 }
 0x2a3   :  { %1615 = vmatpush.msra.mxu3 %v7358_v32 }
 0x2a4   :  { %1576 = vmatpush.msrb.mxu1 %v7359_v28  ;;  %1596 = vmatpush.msrb.mxu2 %v5395_v60 }
 0x2a5   :  { %1616 = vmatpush.msra.mxu3 %v7360_v50 }
 0x2a6   :  { %1577 = vmatpush.msrb.mxu1 %v5402_v16  ;;  %1597 = vmatpush.msrb.mxu2 %v5404_v31 }
 0x2a7   :  { %1617 = vmatpush.msra.mxu3 %v5406_v61 }
 0x2a8   :  { %1578 = vmatpush.msrb.mxu1 %v5411_v13  ;;  %1598 = vmatpush.msrb.mxu2 %v5413_v35  ;;  %v7367_v35 = vld [vmem:[#allocation41_spill] sm:$0xff] }
 0x2a9   :  { %1618 = vmatpush.msra.mxu3 %v5415_v22  ;;  %v7368_v22 = vld [vmem:[#allocation27_spill] sm:$0xff] }
 0x2aa   :  { %1579 = vmatpush.msrb.mxu1 %v5424_v4  ;;  %1599 = vmatpush.msrb.mxu2 %v5426_v29  ;;  %v293_v4 = vadd.f32 %v7368_v22, %v7367_v35 }
 0x2ab   :  { %1619 = vmatpush.msra.mxu3 %v5428_v52 }
 0x2ac   :  { %1580 = vmatpush.msrb.mxu1 %v5433_v62  ;;  %1600 = vmatpush.msrb.mxu2 %v5435_v11 }
 0x2ad   :  { %1620 = vmatpush.msra.mxu3 %v5437_v5 }
 0x2ae   :  { %1581 = vmatpush.msrb.mxu1 %v5442_v30  ;;  %1601 = vmatpush.msrb.mxu2 %v5444_v41 }
 0x2af   :  { %1621 = vmatpush.msra.mxu3 %v5446_v38 }
 0x2b0   :  { %1582 = vmatpush.msrb.mxu1 %v5453_v15  ;;  %1602 = vmatpush.msrb.mxu2 %v5455_v23 }
 0x2b1   :  { %1622 = vmatpush.msra.mxu3 %v5457_v26  ;;  %v7362_v26 = vld [vmem:[#allocation21_spill] sm:$0xff] }
 0x2b2   :  { %1583 = vmatpush.msrb.mxu1 %v5462_v53  ;;  %1603 = vmatpush.msrb.mxu2 %v5464_v10  ;;  %v211_v20 = vadd.f32 %v7362_v26, %v7361_v17  ;;  %v7363_v53 = vld [vmem:[#allocation38_spill] sm:$0xff] }
 0x2b3   :  { %1623 = vmatpush.msra.mxu3 %v5466_v48  ;;  %v252_v54 = vadd.f32 %v7364_v43, %v7363_v53 }
 0x2b4   :  { %1584 = vmatpush.msrb.mxu1 %v5471_v56  ;;  %1604 = vmatpush.msrb.mxu2 %v5473_v36 }
 0x2b5   :  { %1624 = vmatpush.msra.mxu3 %v5475_v42 }
 0x2b6   :  { %1585 = vmatpush.msrb.mxu1 %v5479_v49  ;;  %1605 = vmatpush.msrb.mxu2 %v5481_v55  ;;  %v334_v49 = vadd.f32 %v7366_v8, %v7365_v6  ;;  %v5660_v8 = vld [vmem:[#allocation9 + $0xe0] sm:$0xff] }
 0x2b7   :  { %1625 = vmatpush.msra.mxu3 %v5483_v46 }
 0x313   :  { %v1127_v58 = vpop.f32.mrf.mxu0  ;;  %v1147_v3 = vpop.f32.mrf.mxu1 }
 0x314   :  { %v1190_v9 = vadd.f32 %v1127_v58, %v211_v20  ;;  %v1191_v56 = vadd.f32 %v1147_v3, %v252_v54  ;;  %v5639_v54 = vld [vmem:[#allocation9 + $0x1c0] sm:$0xff] }
 0x315   :  { %v5642_v58 = vld [vmem:[#allocation9 + $0x1a0] sm:$0xff] }
 0x316   :  { %v4262_v51 = vmul.f32 -1.442695, %v1190_v9  ;;  %v4263_v36 = vmul.f32 -1.442695, %v1191_v56  ;;  %v5645_v3 = vld [vmem:[#allocation9 + $0x180] sm:$0xff] }
 0x317   :  { %v5648_v9 = vld [vmem:[#allocation9 + $0x160] sm:$0xff] }
 0x318   :  { %4379 = vpow2.f32 %v4262_v51  ;;  %v5651_v56 = vld [vmem:[#allocation9 + $0x140] sm:$0xff] }
 0x319   :  { %4381 = vpow2.f32 %v4263_v36  ;;  %v5654_v51 = vld [vmem:[#allocation9 + $0x120] sm:$0xff] }
 0x31a   :  { %v1187_v55 = vpop.f32.mrf.mxu3  ;;  %v1167_v61 = vpop.f32.mrf.mxu2  ;;  %v5657_v36 = vld [vmem:[#allocation9 + $0x100] sm:$0xff] }
 0x31b   :  { %v1193_v18 = vadd.f32 %v1187_v55, %v334_v49  ;;  %v1192_v62 = vadd.f32 %v1167_v61, %v293_v4  ;;  %v7369_v49 = vld [vmem:[#allocation18_spill] sm:$0xff] }
 0x31c   :  { %v214_v55 = vadd.f32 %v7369_v49, %v7361_v17 }
 0x31d   :  { %v4264_v46 = vmul.f32 -1.442695, %v1193_v18  ;;  %v7370_v18 = vld [vmem:[#allocation28_spill] sm:$0xff] }
 0x31e   :  { %v4380_v25 = vpop.eup %4379 }
 0x31f   :  { %v4382_v60 = vpop.eup %4381  ;;  %v1197_v16 = vadd.f32 1.0, %v4380_v25  ;;  %4383 = vpow2.f32 %v4264_v46  ;;  %v255_v46 = vadd.f32 %v7370_v18, %v7363_v53 }
 0x320   :  { %v1216_v31 = vadd.f32 1.0, %v4382_v60 }
 0x321   :  { %4385 = vrcp.f32 %v1197_v16  ;;  %v1209_v15 = vand.u32 2147483648, %v1197_v16  ;;  %v1207_v48 = vand.u32 2147483647, %v1197_v16  ;;  %vm1203_vm6 = vweird.f32 %v1197_v16 }
 0x322   :  { %4387 = vrcp.f32 %v1216_v31  ;;  %v1228_v23 = vand.u32 2147483648, %v1216_v31  ;;  %v1226_v37 = vand.u32 2147483647, %v1216_v31  ;;  %vm1222_vm7 = vweird.f32 %v1216_v31 }
 0x323   :  { %v1210_v2 = vor.u32 1.1754944e-38, %v1209_v15  ;;  %vm1208_vm10 = vcmp.eq.f32.partialorder %v1207_v48, 8.507059e+37  ;;  %v5684_v15 = vld [vmem:[#allocation9 + $0x20] sm:$0xff] }
 0x324   :  { %v1229_v14 = vor.u32 1.1754944e-38, %v1228_v23  ;;  %vm1227_vm11 = vcmp.eq.f32.partialorder %v1226_v37, 8.507059e+37 }
 0x325   :  { %v4384_v13 = vpop.eup %4383 }
 0x326   :  { %v1236_v29 = vadd.f32 1.0, %v4384_v13  ;;  %v5670_v13 = vld [vmem:[#allocation9 + $0xa0] sm:$0xff] }
 0x327   :  { %v4386_v52 = vpop.eup %4385 }
 0x328   :  { %v4388_v11 = vpop.eup %4387  ;;  %v1199_v5 = vmul.f32 %v4386_v52, %v1197_v16  ;;  %4389 = vrcp.f32 %v1236_v29  ;;  %vm1204_vm4 = vweird.f32 %v4386_v52  ;;  %v1248_v19 = vand.u32 2147483648, %v1236_v29  ;;  %v5667_v16 = vld [vmem:[#allocation9 + $0xc0] sm:$0xff] }
 0x329   :  { %v1218_v30 = vmul.f32 %v4388_v11, %v1216_v31  ;;  %4391 = vtanh.f32 %v1192_v62  ;;  %vm1223_vm5 = vweird.f32 %v4388_v11  ;;  %vm1205_vm8 = vmor %vm1203_vm6, %vm1204_vm4  ;;  %vm1242_vm13 = vweird.f32 %v1236_v29 }
 0x32a   :  { %v1200_v41 = vsub.f32 1.0, %v1199_v5  ;;  %vm1224_vm9 = vmor %vm1222_vm7, %vm1223_vm5  ;;  %v1246_v32 = vand.u32 2147483647, %v1236_v29  ;;  %v1249_v50 = vor.u32 1.1754944e-38, %v1248_v19 }
 0x32b   :  { %v1219_v38 = vsub.f32 1.0, %v1218_v30 }
 0x32c   :  { %v1201_v10 = vmul.f32 %v4386_v52, %v1200_v41  ;;  %vm1247_vm15 = vcmp.eq.f32.partialorder %v1246_v32, 8.507059e+37  ;;  %v5681_v41 = vld [vmem:[#allocation9 + $0x40] sm:$0xff] }
 0x32d   :  { %v1220_v42 = vmul.f32 %v4388_v11, %v1219_v38 }
 0x32e   :  { %v4390_v24 = vpop.eup %4389  ;;  %v1202_v57 = vadd.f32 %v4386_v52, %v1201_v10  ;;  %v5687_v10 = vld [vmem:[#allocation9] sm:$0xff] }
 0x32f   :  { %v1221_v33 = vadd.f32 %v4388_v11, %v1220_v42  ;;  %v1238_v1 = vmul.f32 %v4390_v24, %v1236_v29  ;;  %v4392_v39 = vpop.eup %4391  ;;  %vm1243_vm12 = vweird.f32 %v4390_v24  ;;  %v5673_v29 = vld [vmem:[#allocation9 + $0x80] sm:$0xff] }
 0x330   :  { %v1206_v12 = vsel %vm1205_vm8, %v4386_v52, %v1202_v57  ;;  %vm1244_vm14 = vmor %vm1242_vm13, %vm1243_vm12  ;;  %v7371_v52 = vld [vmem:[#allocation24_spill] sm:$0xff] }
 0x331   :  { %v1211_v40 = vsel %vm1208_vm10, %v1210_v2, %v1206_v12  ;;  %v1225_v7 = vsel %vm1224_vm9, %v4388_v11, %v1221_v33  ;;  %v1239_v45 = vsub.f32 1.0, %v1238_v1  ;;  %v337_v62 = vadd.f32 %v7371_v52, %v7365_v6  ;;  %v5678_v11 = vld [vmem:[#allocation9 + $0x60] sm:$0xff]  ;;  %v7372_v2 = vld [vmem:[#allocation31_spill] sm:$0xff] }
 0x332   :  { %v1230_v21 = vsel %vm1227_vm11, %v1229_v14, %v1225_v7  ;;  %v1253_v63 = vmul.f32 %v4392_v39, %v1211_v40  ;;  %v296_v33 = vadd.f32 %v7372_v2, %v7367_v35  ;;  %v5788_v2 = vld [vmem:[#allocation9 + $0x128] sm:$0xff] }
 0x333   :  { %v1252_v0 = vmul.f32 %v1230_v21, %v5540_v47  ;;  %v1240_v34 = vmul.f32 %v4390_v24, %v1239_v45  ;;  %v5636_v47 = vld [vmem:[#allocation9 + $0x1e0] sm:$0xff] }
 0x334   :  { %1550 = vmatpush.msrb.mxu0 %v5636_v47 }
 0x335   :  { %v5627_v44 = vadd.f32 %v1253_v63, %v1252_v0  ;;  %v1241_v59 = vadd.f32 %v4390_v24, %v1240_v34 }
 0x336   :  { %1551 = vmatpush.msrb.mxu0 %v5639_v54 }
 0x337   :  { %4393 = vtanh.f32 %v5627_v44  ;;  %v1245_v28 = vsel %vm1244_vm14, %v4390_v24, %v1241_v59 }
 0x338   :  { %v1250_v20 = vsel %vm1247_vm15, %v1249_v50, %v1245_v28  ;;  %1552 = vmatpush.msrb.mxu0 %v5642_v58 }
 0x33a   :  { %1553 = vmatpush.msrb.mxu0 %v5645_v3 }
 0x33c   :  { %1554 = vmatpush.msrb.mxu0 %v5648_v9 }
 0x33d   :  { %v4394_v26 = vpop.eup %4393 }
 0x33e   :  { %v5630_v43 = vmul.f32 %v4394_v26, %v1250_v20  ;;  %1555 = vmatpush.msrb.mxu0 %v5651_v56 }
 0x340   :  { %1346 = vmatmul.f32.vlgmr.msra.gmra.mxu0 %v5630_v43  ;;  %1366 = vmatmul.f32.vlgmr.msra.gmra.mxu1 %v5630_v43 }
 0x341   :  { %1386 = vmatmul.f32.vlgmr.msra.gmra.mxu2 %v5630_v43  ;;  %1406 = vmatmul.f32.vlgmr.msrb.gmra.mxu3 %v5630_v43 }
 0x342   :  { %1556 = vmatpush.msrb.mxu0 %v5654_v51 }
 0x344   :  { %1557 = vmatpush.msrb.mxu0 %v5657_v36 }
 0x346   :  { %1558 = vmatpush.msrb.mxu0 %v5660_v8 }
 0x348   :  { %1559 = vmatpush.msrb.mxu0 %v5667_v16 }
 0x34a   :  { %1560 = vmatpush.msrb.mxu0 %v5670_v13 }
 0x34c   :  { %1561 = vmatpush.msrb.mxu0 %v5673_v29 }
 0x34e   :  { %1562 = vmatpush.msrb.mxu0 %v5678_v11 }
 0x350   :  { %1563 = vmatpush.msrb.mxu0 %v5681_v41 }
 0x352   :  { %1564 = vmatpush.msrb.mxu0 %v5684_v15 }
 0x354   :  { %1565 = vmatpush.msrb.mxu0 %v5687_v10 }
 0x356   :  { %1770 = vmatpush.msra.mxu0 %v5636_v47 }
 0x358   :  { %1771 = vmatpush.msra.mxu0 %v5639_v54 }
 0x35a   :  { %1772 = vmatpush.msra.mxu0 %v5642_v58 }
 0x35c   :  { %1773 = vmatpush.msra.mxu0 %v5645_v3 }
 0x35e   :  { %1774 = vmatpush.msra.mxu0 %v5648_v9 }
 0x360   :  { %1775 = vmatpush.msra.mxu0 %v5651_v56 }
 0x362   :  { %1776 = vmatpush.msra.mxu0 %v5654_v51 }
 0x364   :  { %1777 = vmatpush.msra.mxu0 %v5657_v36 }
 0x366   :  { %1778 = vmatpush.msra.mxu0 %v5660_v8 }
 0x368   :  { %1779 = vmatpush.msra.mxu0 %v5667_v16 }
 0x36a   :  { %1780 = vmatpush.msra.mxu0 %v5670_v13 }
 0x36c   :  { %1781 = vmatpush.msra.mxu0 %v5673_v29 }
 0x36e   :  { %1782 = vmatpush.msra.mxu0 %v5678_v11 }
 0x370   :  { %1783 = vmatpush.msra.mxu0 %v5681_v41 }
 0x372   :  { %1784 = vmatpush.msra.mxu0 %v5684_v15 }
 0x374   :  { %1785 = vmatpush.msra.mxu0 %v5687_v10 }
 0x3bd   :  { %v1347_v25 = vpop.f32.mrf.mxu0  ;;  %v1367_v60 = vpop.f32.mrf.mxu1 }
 0x3be   :  { %v1410_v31 = vadd.f32 %v1347_v25, %v214_v55  ;;  %v1411_v61 = vadd.f32 %v1367_v60, %v255_v46 }
 0x3c0   :  { %v4265_v22 = vmul.f32 -1.442695, %v1410_v31  ;;  %v4266_v4 = vmul.f32 -1.442695, %v1411_v61 }
 0x3c2   :  { %4395 = vpow2.f32 %v4265_v22 }
 0x3c3   :  { %4397 = vpow2.f32 %v4266_v4 }
 0x3c4   :  { %v1407_v5 = vpop.f32.mrf.mxu3  ;;  %v1387_v24 = vpop.f32.mrf.mxu2 }
 0x3c5   :  { %v1413_v30 = vadd.f32 %v1407_v5, %v337_v62  ;;  %v1412_v12 = vadd.f32 %v1387_v24, %v296_v33  ;;  %v5781_v24 = vld [vmem:[#allocation9 + $0x150] sm:$0xff] }
 0x3c6   :  { %v5790_v33 = vld [vmem:[#allocation9 + $0x130] sm:$0xff] }
 0x3c7   :  { %v4267_v38 = vmul.f32 -1.442695, %v1413_v30 }
 0x3c8   :  { %v4396_v23 = vpop.eup %4395 }
 0x3c9   :  { %v4398_v48 = vpop.eup %4397  ;;  %v1417_v42 = vadd.f32 1.0, %v4396_v23  ;;  %4399 = vpow2.f32 %v4267_v38 }
 0x3ca   :  { %v1436_v37 = vadd.f32 1.0, %v4398_v48 }
 0x3cb   :  { %4401 = vrcp.f32 %v1417_v42  ;;  %v1429_v63 = vand.u32 2147483648, %v1417_v42  ;;  %v1427_v59 = vand.u32 2147483647, %v1417_v42  ;;  %vm1423_vm2 = vweird.f32 %v1417_v42 }
 0x3cc   :  { %4403 = vrcp.f32 %v1436_v37  ;;  %v1448_v0 = vand.u32 2147483648, %v1436_v37  ;;  %v1446_v32 = vand.u32 2147483647, %v1436_v37  ;;  %vm1442_vm3 = vweird.f32 %v1436_v37 }
 0x3cd   :  { %v1430_v26 = vor.u32 1.1754944e-38, %v1429_v63  ;;  %vm1428_vm6 = vcmp.eq.f32.partialorder %v1427_v59, 8.507059e+37 }
 0x3ce   :  { %v1449_v55 = vor.u32 1.1754944e-38, %v1448_v0  ;;  %vm1447_vm7 = vcmp.eq.f32.partialorder %v1446_v32, 8.507059e+37  ;;  %v7374_v0 = vld [vmem:[#allocation32_spill] sm:$0xff]  ;;  %v5819_v32 = vld [vmem:[#allocation9 + $0xc8] sm:$0xff] }
 0x3cf   :  { %v4400_v57 = vpop.eup %4399 }
 0x3d0   :  { %v1456_v1 = vadd.f32 1.0, %v4400_v57  ;;  %v5783_v57 = vld [vmem:[#allocation9 + $0x158] sm:$0xff] }
 0x3d1   :  { %v4402_v14 = vpop.eup %4401 }
 0x3d2   :  { %v4404_v39 = vpop.eup %4403  ;;  %v1419_v40 = vmul.f32 %v4402_v14, %v1417_v42  ;;  %4405 = vrcp.f32 %v1456_v1  ;;  %vm1424_vm0 = vweird.f32 %v4402_v14  ;;  %v1468_v30 = vand.u32 2147483648, %v1456_v1 }
 0x3d3   :  { %v1438_v7 = vmul.f32 %v4404_v39, %v1436_v37  ;;  %4407 = vtanh.f32 %v1412_v12  ;;  %vm1443_vm1 = vweird.f32 %v4404_v39  ;;  %vm1425_vm4 = vmor %vm1423_vm2, %vm1424_vm0  ;;  %vm1462_vm9 = vweird.f32 %v1456_v1  ;;  %v5799_v12 = vld [vmem:[#allocation9 + $0x110] sm:$0xff] }
 0x3d4   :  { %v1420_v45 = vsub.f32 1.0, %v1419_v40  ;;  %vm1444_vm5 = vmor %vm1442_vm3, %vm1443_vm1  ;;  %v1466_v38 = vand.u32 2147483647, %v1456_v1  ;;  %v1469_v23 = vor.u32 1.1754944e-38, %v1468_v30  ;;  %v5806_v40 = vld [vmem:[#allocation9 + $0xe8] sm:$0xff]  ;;  %v5852_v30 = vld [vmem:[#allocation9 + $0x78] sm:$0xff] }
 0x3d5   :  { %v1439_v21 = vsub.f32 1.0, %v1438_v7  ;;  %v5808_v7 = vld [vmem:[#allocation9 + $0xf0] sm:$0xff] }
 0x3d6   :  { %v1421_v34 = vmul.f32 %v4402_v14, %v1420_v45  ;;  %vm1467_vm11 = vcmp.eq.f32.partialorder %v1466_v38, 8.507059e+37  ;;  %v5810_v45 = vld [vmem:[#allocation9 + $0xf8] sm:$0xff] }
 0x3d7   :  { %v1440_v19 = vmul.f32 %v4404_v39, %v1439_v21  ;;  %v7373_v21 = vld [vmem:[#allocation19_spill] sm:$0xff] }
 0x3d8   :  { %v4406_v28 = vpop.eup %4405  ;;  %v1422_v50 = vadd.f32 %v4402_v14, %v1421_v34  ;;  %v217_v63 = vadd.f32 %v7373_v21, %v7361_v17  ;;  %v258_v34 = vadd.f32 %v7374_v0, %v7363_v53  ;;  %v5868_v0 = vld [vmem:[#allocation9 + $0x30] sm:$0xff] }
 0x3d9   :  { %v1441_v20 = vadd.f32 %v4404_v39, %v1440_v19  ;;  %v1458_v49 = vmul.f32 %v4406_v28, %v1456_v1  ;;  %v4408_v46 = vpop.eup %4407  ;;  %vm1463_vm8 = vweird.f32 %v4406_v28  ;;  %v5792_v1 = vld [vmem:[#allocation9 + $0x138] sm:$0xff] }
 0x3da   :  { %v1426_v18 = vsel %vm1425_vm4, %v4402_v14, %v1422_v50  ;;  %vm1464_vm10 = vmor %vm1462_vm9, %vm1463_vm8  ;;  %v5797_v14 = vld [vmem:[#allocation9 + $0x108] sm:$0xff]  ;;  %v5823_v50 = vld [vmem:[#allocation9 + $0xd8] sm:$0xff] }
 0x3db   :  { %v1431_v25 = vsel %vm1428_vm6, %v1430_v26, %v1426_v18  ;;  %v1445_v60 = vsel %vm1444_vm5, %v4404_v39, %v1441_v20  ;;  %v1459_v31 = vsub.f32 1.0, %v1458_v49  ;;  %v5801_v39 = vld [vmem:[#allocation9 + $0x118] sm:$0xff]  ;;  %v5828_v49 = vld [vmem:[#allocation9 + $0xa8] sm:$0xff] }
 0x3dc   :  { %v1450_v61 = vsel %vm1447_vm7, %v1449_v55, %v1445_v60  ;;  %v1473_v22 = vmul.f32 %v4408_v46, %v1431_v25  ;;  %v5830_v55 = vld [vmem:[#allocation9 + $0xb0] sm:$0xff]  ;;  %v5832_v18 = vld [vmem:[#allocation9 + $0xb8] sm:$0xff]  ;;  %v5837_v60 = vld [vmem:[#allocation9 + $0x88] sm:$0xff] }
 0x3dd   :  { %v1472_v4 = vmul.f32 %v1450_v61, %v5627_v44  ;;  %v1460_v52 = vmul.f32 %v4406_v28, %v1459_v31  ;;  %v5839_v31 = vld [vmem:[#allocation9 + $0x90] sm:$0xff]  ;;  %v5841_v61 = vld [vmem:[#allocation9 + $0x98] sm:$0xff] }
 0x3df   :  { %v5703_v62 = vadd.f32 %v1473_v22, %v1472_v4  ;;  %v1461_v5 = vadd.f32 %v4406_v28, %v1460_v52  ;;  %v7375_v22 = vld [vmem:[#allocation25_spill] sm:$0xff]  ;;  %v5848_v52 = vld [vmem:[#allocation9 + $0x68] sm:$0xff] }
 0x3e0   :  { %v340_v4 = vadd.f32 %v7375_v22, %v7365_v6 }
 0x3e1   :  { %4409 = vtanh.f32 %v5703_v62  ;;  %v1465_v44 = vsel %vm1464_vm10, %v4406_v28, %v1461_v5  ;;  %v5821_v28 = vld [vmem:[#allocation9 + $0xd0] sm:$0xff] }
 0x3e2   :  { %v1470_v42 = vsel %vm1467_vm11, %v1469_v23, %v1465_v44  ;;  %v5850_v5 = vld [vmem:[#allocation9 + $0x70] sm:$0xff]  ;;  %v5857_v23 = vld [vmem:[#allocation9 + $0x48] sm:$0xff] }
 0x3e7   :  { %v4410_v48 = vpop.eup %4409 }
 0x3e8   :  { %v5711_v37 = vmul.f32 %v4410_v48, %v1470_v42  ;;  %v5859_v48 = vld [vmem:[#allocation9 + $0x50] sm:$0xff]  ;;  %v5861_v42 = vld [vmem:[#allocation9 + $0x58] sm:$0xff] }
 0x3ea   :  { %1566 = vmatmul.f32.vlgmr.msrb.gmra.mxu0 %v5711_v37  ;;  %1586 = vmatmul.f32.vlgmr.msrb.gmra.mxu1 %v5711_v37 }
 0x3eb   :  { %1606 = vmatmul.f32.vlgmr.msrb.gmra.mxu2 %v5711_v37  ;;  %1626 = vmatmul.f32.vlgmr.msra.gmra.mxu3 %v5711_v37 }
 0x3ec   :  { %1990 = vmatpush.msrb.mxu0 %v5636_v47  ;;  %v5734_v47 = vld [vmem:[#allocation9 + $0x1e8] sm:$0xff] }
 0x3ed   :  { %1790 = vmatpush.msra.mxu1 %v5734_v47 }
 0x3ee   :  { %1991 = vmatpush.msrb.mxu0 %v5639_v54  ;;  %v5736_v54 = vld [vmem:[#allocation9 + $0x1f0] sm:$0xff] }
 0x3ef   :  { %1810 = vmatpush.msra.mxu2 %v5736_v54 }
 0x3f0   :  { %1992 = vmatpush.msrb.mxu0 %v5642_v58  ;;  %v5738_v58 = vld [vmem:[#allocation9 + $0x1f8] sm:$0xff] }
 0x3f1   :  { %1830 = vmatpush.msrb.mxu3 %v5738_v58 }
 0x3f2   :  { %1993 = vmatpush.msrb.mxu0 %v5645_v3  ;;  %v5743_v3 = vld [vmem:[#allocation9 + $0x1c8] sm:$0xff] }
 0x3f3   :  { %1791 = vmatpush.msra.mxu1 %v5743_v3 }
 0x3f4   :  { %1994 = vmatpush.msrb.mxu0 %v5648_v9  ;;  %v5745_v9 = vld [vmem:[#allocation9 + $0x1d0] sm:$0xff] }
 0x3f5   :  { %1811 = vmatpush.msra.mxu2 %v5745_v9 }
 0x3f6   :  { %1995 = vmatpush.msrb.mxu0 %v5651_v56  ;;  %v5747_v56 = vld [vmem:[#allocation9 + $0x1d8] sm:$0xff] }
 0x3f7   :  { %1831 = vmatpush.msrb.mxu3 %v5747_v56 }
 0x3f8   :  { %1996 = vmatpush.msrb.mxu0 %v5654_v51  ;;  %v5752_v51 = vld [vmem:[#allocation9 + $0x1a8] sm:$0xff] }
 0x3f9   :  { %1792 = vmatpush.msra.mxu1 %v5752_v51 }
 0x3fa   :  { %1997 = vmatpush.msrb.mxu0 %v5657_v36  ;;  %v5754_v36 = vld [vmem:[#allocation9 + $0x1b0] sm:$0xff] }
 0x3fb   :  { %1812 = vmatpush.msra.mxu2 %v5754_v36 }
 0x3fc   :  { %1998 = vmatpush.msrb.mxu0 %v5660_v8  ;;  %v5756_v8 = vld [vmem:[#allocation9 + $0x1b8] sm:$0xff] }
 0x3fd   :  { %1832 = vmatpush.msrb.mxu3 %v5756_v8 }
 0x3fe   :  { %1999 = vmatpush.msrb.mxu0 %v5667_v16  ;;  %v5761_v16 = vld [vmem:[#allocation9 + $0x188] sm:$0xff] }
 0x3ff   :  { %1793 = vmatpush.msra.mxu1 %v5761_v16 }
 0x400   :  { %2000 = vmatpush.msrb.mxu0 %v5670_v13  ;;  %v5763_v13 = vld [vmem:[#allocation9 + $0x190] sm:$0xff] }
 0x401   :  { %1813 = vmatpush.msra.mxu2 %v5763_v13 }
 0x402   :  { %2001 = vmatpush.msrb.mxu0 %v5673_v29  ;;  %v5765_v29 = vld [vmem:[#allocation9 + $0x198] sm:$0xff] }
 0x403   :  { %1833 = vmatpush.msrb.mxu3 %v5765_v29 }
 0x404   :  { %2002 = vmatpush.msrb.mxu0 %v5678_v11  ;;  %v5770_v11 = vld [vmem:[#allocation9 + $0x168] sm:$0xff] }
 0x405   :  { %1794 = vmatpush.msra.mxu1 %v5770_v11 }
 0x406   :  { %2003 = vmatpush.msrb.mxu0 %v5681_v41  ;;  %v5772_v41 = vld [vmem:[#allocation9 + $0x170] sm:$0xff] }
 0x407   :  { %1814 = vmatpush.msra.mxu2 %v5772_v41 }
 0x408   :  { %2004 = vmatpush.msrb.mxu0 %v5684_v15  ;;  %v5774_v15 = vld [vmem:[#allocation9 + $0x178] sm:$0xff] }
 0x409   :  { %1834 = vmatpush.msrb.mxu3 %v5774_v15  ;;  %1815 = vmatpush.msra.mxu2 %v5781_v24 }
 0x40a   :  { %2005 = vmatpush.msrb.mxu0 %v5687_v10  ;;  %v5779_v10 = vld [vmem:[#allocation9 + $0x148] sm:$0xff] }
 0x40b   :  { %1795 = vmatpush.msra.mxu1 %v5779_v10  ;;  %1835 = vmatpush.msrb.mxu3 %v5783_v57 }
 0x40c   :  { %1816 = vmatpush.msra.mxu2 %v5790_v33 }
 0x40d   :  { %1796 = vmatpush.msra.mxu1 %v5788_v2  ;;  %1836 = vmatpush.msrb.mxu3 %v5792_v1 }
 0x40e   :  { %1817 = vmatpush.msra.mxu2 %v5799_v12 }
 0x40f   :  { %1797 = vmatpush.msra.mxu1 %v5797_v14  ;;  %1837 = vmatpush.msrb.mxu3 %v5801_v39 }
 0x410   :  { %1818 = vmatpush.msra.mxu2 %v5808_v7 }
 0x411   :  { %1798 = vmatpush.msra.mxu1 %v5806_v40  ;;  %1838 = vmatpush.msrb.mxu3 %v5810_v45 }
 0x412   :  { %1819 = vmatpush.msra.mxu2 %v5821_v28 }
 0x413   :  { %1799 = vmatpush.msra.mxu1 %v5819_v32  ;;  %1839 = vmatpush.msrb.mxu3 %v5823_v50 }
 0x414   :  { %1820 = vmatpush.msra.mxu2 %v5830_v55 }
 0x415   :  { %1800 = vmatpush.msra.mxu1 %v5828_v49  ;;  %1840 = vmatpush.msrb.mxu3 %v5832_v18 }
 0x416   :  { %1821 = vmatpush.msra.mxu2 %v5839_v31 }
 0x417   :  { %1801 = vmatpush.msra.mxu1 %v5837_v60  ;;  %1841 = vmatpush.msrb.mxu3 %v5841_v61 }
 0x418   :  { %1822 = vmatpush.msra.mxu2 %v5850_v5 }
 0x419   :  { %1802 = vmatpush.msra.mxu1 %v5848_v52  ;;  %1842 = vmatpush.msrb.mxu3 %v5852_v30 }
 0x41a   :  { %1823 = vmatpush.msra.mxu2 %v5859_v48 }
 0x41b   :  { %1803 = vmatpush.msra.mxu1 %v5857_v23  ;;  %1843 = vmatpush.msrb.mxu3 %v5861_v42 }
 0x41c   :  { %1824 = vmatpush.msra.mxu2 %v5868_v0 }
 0x467   :  { %v1567_v59 = vpop.f32.mrf.mxu0  ;;  %v1587_v19 = vpop.f32.mrf.mxu1 }
 0x468   :  { %v1630_v26 = vadd.f32 %v1567_v59, %v217_v63  ;;  %v1631_v20 = vadd.f32 %v1587_v19, %v258_v34  ;;  %v5866_v63 = vld [vmem:[#allocation9 + $0x28] sm:$0xff]  ;;  %v5870_v34 = vld [vmem:[#allocation9 + $0x38] sm:$0xff] }
 0x469   :  { %1804 = vmatpush.msra.mxu1 %v5866_v63  ;;  %v5874_v19 = vld [vmem:[#allocation9 + $0x8] sm:$0xff]  ;;  %1844 = vmatpush.msrb.mxu3 %v5870_v34 }
 0x46a   :  { %v4268_v46 = vmul.f32 -1.442695, %v1630_v26  ;;  %v4269_v25 = vmul.f32 -1.442695, %v1631_v20  ;;  %v5876_v26 = vld [vmem:[#allocation9 + $0x10] sm:$0xff]  ;;  %v5878_v20 = vld [vmem:[#allocation9 + $0x18] sm:$0xff] }
 0x46b   :  { %1805 = vmatpush.msra.mxu1 %v5874_v19  ;;  %1825 = vmatpush.msra.mxu2 %v5876_v26 }
 0x46c   :  { %4411 = vpow2.f32 %v4268_v46  ;;  %1845 = vmatpush.msrb.mxu3 %v5878_v20 }
 0x46d   :  { %4413 = vpow2.f32 %v4269_v25  ;;  %2010 = vmatpush.msrb.mxu1 %v5734_v47  ;;  %2030 = vmatpush.msrb.mxu2 %v5736_v54 }
 0x46e   :  { %v1627_v38 = vpop.f32.mrf.mxu3  ;;  %2050 = vmatpush.msra.mxu3 %v5738_v58 }
 0x46f   :  { %v1633_v44 = vadd.f32 %v1627_v38, %v340_v4  ;;  %2011 = vmatpush.msrb.mxu1 %v5743_v3  ;;  %v1607_v4 = vpop.f32.mrf.mxu2  ;;  %2031 = vmatpush.msrb.mxu2 %v5745_v9 }
 0x470   :  { %2051 = vmatpush.msra.mxu3 %v5747_v56 }
 0x471   :  { %v4270_v21 = vmul.f32 -1.442695, %v1633_v44  ;;  %v7376_v44 = vld [vmem:[#allocation35_spill] sm:$0xff]  ;;  %2012 = vmatpush.msrb.mxu1 %v5752_v51  ;;  %2032 = vmatpush.msrb.mxu2 %v5754_v36 }
 0x472   :  { %v4412_v59 = vpop.eup %4411  ;;  %2052 = vmatpush.msra.mxu3 %v5756_v8 }
 0x473   :  { %v4414_v46 = vpop.eup %4413  ;;  %v5880_v25 = vadd.f32 1.0, %v4412_v59  ;;  %4415 = vpow2.f32 %v4270_v21  ;;  %v299_v21 = vadd.f32 %v7376_v44, %v7367_v35  ;;  %2013 = vmatpush.msrb.mxu1 %v5761_v16  ;;  %2033 = vmatpush.msrb.mxu2 %v5763_v13 }
 0x474   :  { %v5883_v22 = vadd.f32 1.0, %v4414_v46  ;;  %2053 = vmatpush.msra.mxu3 %v5765_v29 }
 0x475   :  { %4417 = vrcp.f32 %v5880_v25  ;;  %v1632_v58 = vadd.f32 %v1607_v4, %v299_v21  ;;  %2014 = vmatpush.msrb.mxu1 %v5770_v11  ;;  %2034 = vmatpush.msrb.mxu2 %v5772_v41  ;;  %v1649_v8 = vand.u32 2147483648, %v5880_v25  ;;  %v1647_v29 = vand.u32 2147483647, %v5880_v25  ;;  %v2194_v21 = vld [vmem:[#allocation7 + $0x370] sm:$0xff] }
 0x476   :  { %4419 = vrcp.f32 %v5883_v22  ;;  %2054 = vmatpush.msra.mxu3 %v5774_v15  ;;  %v1668_v16 = vand.u32 2147483648, %v5883_v22  ;;  %v1666_v41 = vand.u32 2147483647, %v5883_v22  ;;  %vm1643_vm14 = vweird.f32 %v5880_v25 }
 0x477   :  { %2015 = vmatpush.msrb.mxu1 %v5779_v10  ;;  %2035 = vmatpush.msrb.mxu2 %v5781_v24  ;;  %vm1662_vm15 = vweird.f32 %v5883_v22  ;;  %v1650_v10 = vor.u32 1.1754944e-38, %v1649_v8  ;;  %vm1648_vm2 = vcmp.eq.f32.partialorder %v1647_v29, 8.507059e+37  ;;  %v2189_v8 = vld [vmem:[#allocation7 + $0x348] sm:$0xff] }
 0x478   :  { %2055 = vmatpush.msra.mxu3 %v5783_v57  ;;  %v1669_v46 = vor.u32 1.1754944e-38, %v1668_v16  ;;  %vm1667_vm3 = vcmp.eq.f32.partialorder %v1666_v41, 8.507059e+37  ;;  %v2190_v16 = vld [vmem:[#allocation7 + $0x350] sm:$0xff]  ;;  %v2184_v41 = vld [vmem:[#allocation7 + $0x320] sm:$0xff] }
 0x479   :  { %v4416_v38 = vpop.eup %4415  ;;  %2016 = vmatpush.msrb.mxu1 %v5788_v2  ;;  %2036 = vmatpush.msrb.mxu2 %v5790_v33 }
 0x47a   :  { %v5899_v47 = vadd.f32 1.0, %v4416_v38  ;;  %2056 = vmatpush.msra.mxu3 %v5792_v1 }
 0x47b   :  { %v4418_v54 = vpop.eup %4417  ;;  %2017 = vmatpush.msrb.mxu1 %v5797_v14  ;;  %2037 = vmatpush.msrb.mxu2 %v5799_v12 }
 0x47c   :  { %v4420_v3 = vpop.eup %4419  ;;  %v1639_v9 = vmul.f32 %v4418_v54, %v5880_v25  ;;  %4421 = vrcp.f32 %v5899_v47  ;;  %vm1644_vm12 = vweird.f32 %v4418_v54  ;;  %2057 = vmatpush.msra.mxu3 %v5801_v39  ;;  %vm1682_vm5 = vweird.f32 %v5899_v47 }
 0x47d   :  { %v1658_v56 = vmul.f32 %v4420_v3, %v5883_v22  ;;  %4423 = vtanh.f32 %v1632_v58  ;;  %vm1663_vm13 = vweird.f32 %v4420_v3  ;;  %vm1645_vm0 = vmor %vm1643_vm14, %vm1644_vm12  ;;  %2018 = vmatpush.msrb.mxu1 %v5806_v40  ;;  %2038 = vmatpush.msrb.mxu2 %v5808_v7  ;;  %v1686_v40 = vand.u32 2147483647, %v5899_v47  ;;  %v7378_v58 = vld [vmem:[#allocation34_spill] sm:$0xff] }
 0x47e   :  { %v1640_v51 = vsub.f32 1.0, %v1639_v9  ;;  %vm1664_vm1 = vmor %vm1662_vm15, %vm1663_vm13  ;;  %2058 = vmatpush.msra.mxu3 %v5810_v45  ;;  %v2195_v9 = vld [vmem:[#allocation7 + $0x378] sm:$0xff] }
 0x47f   :  { %v1659_v36 = vsub.f32 1.0, %v1658_v56  ;;  %2019 = vmatpush.msrb.mxu1 %v5819_v32  ;;  %2039 = vmatpush.msrb.mxu2 %v5821_v28  ;;  %vm1687_vm7 = vcmp.eq.f32.partialorder %v1686_v40, 8.507059e+37  ;;  %v2172_v40 = vld [vmem:[#allocation7 + $0x2c0] sm:$0xff] }
 0x480   :  { %v1641_v13 = vmul.f32 %v4418_v54, %v1640_v51  ;;  %2059 = vmatpush.msra.mxu3 %v5823_v50 }
 0x481   :  { %v1660_v11 = vmul.f32 %v4420_v3, %v1659_v36  ;;  %2020 = vmatpush.msrb.mxu1 %v5828_v49  ;;  %2040 = vmatpush.msrb.mxu2 %v5830_v55  ;;  %v2208_v49 = vld [vmem:[#allocation7 + $0x3e0] sm:$0xff]  ;;  %v2209_v55 = vld [vmem:[#allocation7 + $0x3e8] sm:$0xff] }
 0x482   :  { %v4422_v15 = vpop.eup %4421  ;;  %v1642_v59 = vadd.f32 %v4418_v54, %v1641_v13  ;;  %2060 = vmatpush.msra.mxu3 %v5832_v18  ;;  %v2210_v18 = vld [vmem:[#allocation7 + $0x3f0] sm:$0xff]  ;;  %v2188_v36 = vld [vmem:[#allocation7 + $0x340] sm:$0xff] }
 0x483   :  { %v1661_v24 = vadd.f32 %v4420_v3, %v1660_v11  ;;  %v1678_v57 = vmul.f32 %v4422_v15, %v5899_v47  ;;  %v4424_v33 = vpop.eup %4423  ;;  %vm1683_vm4 = vweird.f32 %v4422_v15  ;;  %2021 = vmatpush.msrb.mxu1 %v5837_v60  ;;  %2041 = vmatpush.msrb.mxu2 %v5839_v31  ;;  %v2211_v60 = vld [vmem:[#allocation7 + $0x3f8] sm:$0xff]  ;;  %v2204_v31 = vld [vmem:[#allocation7 + $0x3c0] sm:$0xff] }
 0x484   :  { %v1646_v2 = vsel %vm1645_vm0, %v4418_v54, %v1642_v59  ;;  %2061 = vmatpush.msra.mxu3 %v5841_v61  ;;  %vm1684_vm6 = vmor %vm1682_vm5, %vm1683_vm4  ;;  %v2205_v61 = vld [vmem:[#allocation7 + $0x3c8] sm:$0xff]  ;;  %v2191_v11 = vld [vmem:[#allocation7 + $0x358] sm:$0xff] }
 0x485   :  { %v1651_v25 = vsel %vm1648_vm2, %v1650_v10, %v1646_v2  ;;  %v1665_v1 = vsel %vm1664_vm1, %v4420_v3, %v1661_v24  ;;  %v1679_v22 = vsub.f32 1.0, %v1678_v57  ;;  %2022 = vmatpush.msrb.mxu1 %v5848_v52  ;;  %2042 = vmatpush.msrb.mxu2 %v5850_v5  ;;  %v2206_v52 = vld [vmem:[#allocation7 + $0x3d0] sm:$0xff]  ;;  %v2207_v5 = vld [vmem:[#allocation7 + $0x3d8] sm:$0xff]  ;;  %v261_v3 = vadd.f32 %v7378_v58, %v7363_v53  ;;  %v2181_v2 = vld [vmem:[#allocation7 + $0x308] sm:$0xff] }
 0x486   :  { %v1670_v4 = vsel %vm1667_vm3, %v1669_v46, %v1665_v1  ;;  %v1693_v38 = vmul.f32 %v4424_v33, %v1651_v25  ;;  %2062 = vmatpush.msra.mxu3 %v5852_v30  ;;  %v2200_v30 = vld [vmem:[#allocation7 + $0x3a0] sm:$0xff]  ;;  %v2186_v59 = vld [vmem:[#allocation7 + $0x330] sm:$0xff]  ;;  %v2187_v57 = vld [vmem:[#allocation7 + $0x338] sm:$0xff] }
 0x487   :  { %v1692_v14 = vmul.f32 %v1670_v4, %v5703_v62  ;;  %v1680_v44 = vmul.f32 %v4422_v15, %v1679_v22  ;;  %v1688_v62 = vand.u32 2147483648, %v5899_v47  ;;  %2023 = vmatpush.msrb.mxu1 %v5857_v23  ;;  %2043 = vmatpush.msrb.mxu2 %v5859_v48  ;;  %v2201_v23 = vld [vmem:[#allocation7 + $0x3a8] sm:$0xff]  ;;  %v2202_v48 = vld [vmem:[#allocation7 + $0x3b0] sm:$0xff]  ;;  %v7377_v47 = vld [vmem:[#allocation20_spill] sm:$0xff] }
 0x488   :  { %2063 = vmatpush.msra.mxu3 %v5861_v42  ;;  %v2203_v42 = vld [vmem:[#allocation7 + $0x3b8] sm:$0xff]  ;;  %v220_v54 = vadd.f32 %v7377_v47, %v7361_v17  ;;  %v2180_v46 = vld [vmem:[#allocation7 + $0x300] sm:$0xff]  ;;  %v2182_v33 = vld [vmem:[#allocation7 + $0x310] sm:$0xff] }
 0x489   :  { %v5935_v12 = vadd.f32 %v1693_v38, %v1692_v14  ;;  %v1681_v39 = vadd.f32 %v4422_v15, %v1680_v44  ;;  %v1689_v45 = vor.u32 1.1754944e-38, %v1688_v62  ;;  %2024 = vmatpush.msrb.mxu1 %v5866_v63  ;;  %2044 = vmatpush.msrb.mxu2 %v5868_v0  ;;  %v2196_v63 = vld [vmem:[#allocation7 + $0x380] sm:$0xff]  ;;  %v2197_v0 = vld [vmem:[#allocation7 + $0x388] sm:$0xff]  ;;  %v2183_v25 = vld [vmem:[#allocation7 + $0x318] sm:$0xff] }
 0x48a   :  { %2064 = vmatpush.msra.mxu3 %v5870_v34  ;;  %v2198_v34 = vld [vmem:[#allocation7 + $0x390] sm:$0xff]  ;;  %v7379_v1 = vld [vmem:[#allocation29_spill] sm:$0xff]  ;;  %v2177_v38 = vld [vmem:[#allocation7 + $0x2e8] sm:$0xff] }
 0x48b   :  { %4425 = vtanh.f32 %v5935_v12  ;;  %v1685_v7 = vsel %vm1684_vm6, %v4422_v15, %v1681_v39  ;;  %2025 = vmatpush.msrb.mxu1 %v5874_v19  ;;  %2045 = vmatpush.msrb.mxu2 %v5876_v26  ;;  %v2199_v19 = vld [vmem:[#allocation7 + $0x398] sm:$0xff]  ;;  %v2192_v26 = vld [vmem:[#allocation7 + $0x360] sm:$0xff]  ;;  %v2185_v15 = vld [vmem:[#allocation7 + $0x328] sm:$0xff]  ;;  %v343_v22 = vadd.f32 %v7379_v1, %v7365_v6 }
 0x48c   :  { %v1690_v28 = vsel %vm1687_vm7, %v1689_v45, %v1685_v7  ;;  %2065 = vmatpush.msra.mxu3 %v5878_v20  ;;  %v2193_v20 = vld [vmem:[#allocation7 + $0x368] sm:$0xff]  ;;  %v2176_v4 = vld [vmem:[#allocation7 + $0x2e0] sm:$0xff]  ;;  %v2178_v14 = vld [vmem:[#allocation7 + $0x2f0] sm:$0xff] }
 0x48d   :  { %v2179_v39 = vld [vmem:[#allocation7 + $0x2f8] sm:$0xff]  ;;  %v2173_v7 = vld [vmem:[#allocation7 + $0x2c8] sm:$0xff]  ;;  %v2174_v45 = vld [vmem:[#allocation7 + $0x2d0] sm:$0xff] }
 0x48e   :  { %v2159_v47 = vld [vmem:[#allocation7 + $0x258] sm:$0xff] }
 0x491   :  { %v4426_v32 = vpop.eup %4425 }
 0x492   :  { %v5954_v50 = vmul.f32 %v4426_v32, %v1690_v28  ;;  %v2175_v32 = vld [vmem:[#allocation7 + $0x2d8] sm:$0xff] }
 0x494   :  { %1786 = vmatmul.f32.vlgmr.msra.gmra.mxu0 %v5954_v50  ;;  %1806 = vmatmul.f32.vlgmr.msra.gmra.mxu1 %v5954_v50 }
 0x495   :  { %1826 = vmatmul.f32.vlgmr.msra.gmra.mxu2 %v5954_v50  ;;  %1846 = vmatmul.f32.vlgmr.msrb.gmra.mxu3 %v5954_v50 }
 0x496   :  { %2223 = vmatpush.msra.mxu0 %v2208_v49  ;;  %2264 = vmatpush.msra.mxu1 %v2209_v55  ;;  %v2168_v49 = vld [vmem:[#allocation7 + $0x2a0] sm:$0xff]  ;;  %v2169_v55 = vld [vmem:[#allocation7 + $0x2a8] sm:$0xff] }
 0x497   :  { %2305 = vmatpush.msra.mxu2 %v2210_v18  ;;  %2346 = vmatpush.msrb.mxu3 %v2211_v60  ;;  %v2170_v18 = vld [vmem:[#allocation7 + $0x2b0] sm:$0xff] }
 0x498   :  { %2224 = vmatpush.msra.mxu0 %v2204_v31  ;;  %2265 = vmatpush.msra.mxu1 %v2205_v61  ;;  %v2171_v31 = vld [vmem:[#allocation7 + $0x2b8] sm:$0xff]  ;;  %v2164_v61 = vld [vmem:[#allocation7 + $0x280] sm:$0xff] }
 0x499   :  { %2306 = vmatpush.msra.mxu2 %v2206_v52  ;;  %2347 = vmatpush.msrb.mxu3 %v2207_v5  ;;  %v2165_v52 = vld [vmem:[#allocation7 + $0x288] sm:$0xff] }
 0x49a   :  { %2225 = vmatpush.msra.mxu0 %v2200_v30  ;;  %2266 = vmatpush.msra.mxu1 %v2201_v23  ;;  %v2166_v23 = vld [vmem:[#allocation7 + $0x290] sm:$0xff] }
 0x49b   :  { %2307 = vmatpush.msra.mxu2 %v2202_v48  ;;  %2348 = vmatpush.msrb.mxu3 %v2203_v42  ;;  %v2167_v48 = vld [vmem:[#allocation7 + $0x298] sm:$0xff] }
 0x49c   :  { %2226 = vmatpush.msra.mxu0 %v2196_v63  ;;  %2267 = vmatpush.msra.mxu1 %v2197_v0  ;;  %v2160_v63 = vld [vmem:[#allocation7 + $0x260] sm:$0xff]  ;;  %v2161_v0 = vld [vmem:[#allocation7 + $0x268] sm:$0xff] }
 0x49d   :  { %2308 = vmatpush.msra.mxu2 %v2198_v34  ;;  %2349 = vmatpush.msrb.mxu3 %v2199_v19  ;;  %v2162_v34 = vld [vmem:[#allocation7 + $0x270] sm:$0xff]  ;;  %v2163_v19 = vld [vmem:[#allocation7 + $0x278] sm:$0xff] }
 0x49e   :  { %2227 = vmatpush.msra.mxu0 %v2192_v26  ;;  %2268 = vmatpush.msra.mxu1 %v2193_v20  ;;  %v2156_v26 = vld [vmem:[#allocation7 + $0x240] sm:$0xff]  ;;  %v2157_v20 = vld [vmem:[#allocation7 + $0x248] sm:$0xff] }
 0x49f   :  { %2309 = vmatpush.msra.mxu2 %v2194_v21  ;;  %2350 = vmatpush.msrb.mxu3 %v2195_v9  ;;  %v2158_v21 = vld [vmem:[#allocation7 + $0x250] sm:$0xff] }
 0x4a0   :  { %2228 = vmatpush.msra.mxu0 %v2188_v36  ;;  %2269 = vmatpush.msra.mxu1 %v2189_v8  ;;  %v2154_v9 = vld [vmem:[#allocation7 + $0x230] sm:$0xff] }
 0x4a1   :  { %2310 = vmatpush.msra.mxu2 %v2190_v16  ;;  %2351 = vmatpush.msrb.mxu3 %v2191_v11  ;;  %v7380_v36 = vld [vmem:[#allocation39_spill] sm:$0xff]  ;;  %v2148_v16 = vld [vmem:[#allocation7 + $0x200] sm:$0xff] }
 0x4a2   :  { %2229 = vmatpush.msra.mxu0 %v2184_v41  ;;  %2270 = vmatpush.msra.mxu1 %v2185_v15  ;;  %v302_v8 = vadd.f32 %v7380_v36, %v7367_v35  ;;  %v2150_v11 = vld [vmem:[#allocation7 + $0x210] sm:$0xff]  ;;  %v2151_v41 = vld [vmem:[#allocation7 + $0x218] sm:$0xff]  ;;  %v6051_v36 = vld [vmem:[#allocation9 + $0x388] sm:$0xff] }
 0x4a3   :  { %2311 = vmatpush.msra.mxu2 %v2186_v59  ;;  %2352 = vmatpush.msrb.mxu3 %v2187_v57 }
 0x4a4   :  { %2230 = vmatpush.msra.mxu0 %v2180_v46  ;;  %2271 = vmatpush.msra.mxu1 %v2181_v2 }
 0x4a5   :  { %2312 = vmatpush.msra.mxu2 %v2182_v33  ;;  %2353 = vmatpush.msrb.mxu3 %v2183_v25 }
 0x4a6   :  { %2231 = vmatpush.msra.mxu0 %v2176_v4  ;;  %2272 = vmatpush.msra.mxu1 %v2177_v38 }
 0x4a7   :  { %2313 = vmatpush.msra.mxu2 %v2178_v14  ;;  %2354 = vmatpush.msrb.mxu3 %v2179_v39 }
 0x4a8   :  { %2232 = vmatpush.msra.mxu0 %v2172_v40  ;;  %2273 = vmatpush.msra.mxu1 %v2173_v7 }
 0x4a9   :  { %2314 = vmatpush.msra.mxu2 %v2174_v45  ;;  %2355 = vmatpush.msrb.mxu3 %v2175_v32 }
 0x4aa   :  { %2233 = vmatpush.msra.mxu0 %v2168_v49  ;;  %2274 = vmatpush.msra.mxu1 %v2169_v55 }
 0x4ab   :  { %2315 = vmatpush.msra.mxu2 %v2170_v18  ;;  %2356 = vmatpush.msrb.mxu3 %v2171_v31 }
 0x4ac   :  { %2234 = vmatpush.msra.mxu0 %v2164_v61  ;;  %2275 = vmatpush.msra.mxu1 %v2165_v52 }
 0x4ad   :  { %2316 = vmatpush.msra.mxu2 %v2166_v23  ;;  %2357 = vmatpush.msrb.mxu3 %v2167_v48 }
 0x4ae   :  { %2235 = vmatpush.msra.mxu0 %v2160_v63  ;;  %2276 = vmatpush.msra.mxu1 %v2161_v0 }
 0x4af   :  { %2317 = vmatpush.msra.mxu2 %v2162_v34  ;;  %2358 = vmatpush.msrb.mxu3 %v2163_v19  ;;  %v7382_v19 = vld [vmem:[#allocation43_spill] sm:$0xff] }
 0x4b0   :  { %2236 = vmatpush.msra.mxu0 %v2156_v26  ;;  %2277 = vmatpush.msra.mxu1 %v2157_v20  ;;  %v6003_v26 = vld [vmem:[#allocation9 + $0x3e0] sm:$0xff]  ;;  %v6005_v20 = vld [vmem:[#allocation9 + $0x3e8] sm:$0xff] }
 0x4b1   :  { %2318 = vmatpush.msra.mxu2 %v2158_v21  ;;  %2359 = vmatpush.msrb.mxu3 %v2159_v47  ;;  %v6007_v21 = vld [vmem:[#allocation9 + $0x3c0] sm:$0xff]  ;;  %v6011_v47 = vld [vmem:[#allocation9 + $0x3c8] sm:$0xff] }
 0x4b3   :  { %2319 = vmatpush.msra.mxu2 %v2154_v9  ;;  %v6042_v9 = vld [vmem:[#allocation9 + $0x3d0] sm:$0xff] }
 0x4b5   :  { %2320 = vmatpush.msra.mxu2 %v2150_v11  ;;  %v6071_v11 = vld [vmem:[#allocation9 + $0x370] sm:$0xff] }
 0x511   :  { %v1787_v56 = vpop.f32.mrf.mxu0  ;;  %v1807_v51 = vpop.f32.mrf.mxu1 }
 0x512   :  { %v1850_v13 = vadd.f32 %v1787_v56, %v220_v54  ;;  %v1851_v29 = vadd.f32 %v1807_v51, %v261_v3  ;;  %v2152_v54 = vld [vmem:[#allocation7 + $0x220] sm:$0xff]  ;;  %v2153_v3 = vld [vmem:[#allocation7 + $0x228] sm:$0xff]  ;;  %v2155_v56 = vld [vmem:[#allocation7 + $0x238] sm:$0xff] }
 0x513   :  { %2237 = vmatpush.msra.mxu0 %v2152_v54  ;;  %2278 = vmatpush.msra.mxu1 %v2153_v3  ;;  %v6013_v54 = vld [vmem:[#allocation9 + $0x3f8] sm:$0xff]  ;;  %v6018_v3 = vld [vmem:[#allocation9 + $0x3a8] sm:$0xff] }
 0x514   :  { %v4271_v10 = vmul.f32 -1.442695, %v1850_v13  ;;  %v4272_v24 = vmul.f32 -1.442695, %v1851_v29  ;;  %v2149_v13 = vld [vmem:[#allocation7 + $0x208] sm:$0xff]  ;;  %2360 = vmatpush.msrb.mxu3 %v2155_v56  ;;  %v6047_v56 = vld [vmem:[#allocation9 + $0x3b0] sm:$0xff] }
 0x515   :  { %2238 = vmatpush.msra.mxu0 %v2148_v16  ;;  %2279 = vmatpush.msra.mxu1 %v2149_v13  ;;  %v6061_v16 = vld [vmem:[#allocation9 + $0x398] sm:$0xff]  ;;  %v6063_v13 = vld [vmem:[#allocation9 + $0x390] sm:$0xff] }
 0x516   :  { %4427 = vpow2.f32 %v4271_v10  ;;  %2361 = vmatpush.msrb.mxu3 %v2151_v41  ;;  %v7383_v41 = vld [vmem:[#allocation22_spill] sm:$0xff] }
 0x517   :  { %4429 = vpow2.f32 %v4272_v24 }
 0x518   :  { %v1847_v44 = vpop.f32.mrf.mxu3  ;;  %v1827_v58 = vpop.f32.mrf.mxu2 }
 0x519   :  { %v1853_v62 = vadd.f32 %v1847_v44, %v343_v22  ;;  %v1852_v59 = vadd.f32 %v1827_v58, %v302_v8  ;;  %v6016_v58 = vld [vmem:[#allocation9 + $0x3a0] sm:$0xff]  ;;  %v6059_v8 = vld [vmem:[#allocation9 + $0x368] sm:$0xff] }
 0x51b   :  { %v4273_v28 = vmul.f32 -1.442695, %v1853_v62 }
 0x51c   :  { %v4428_v60 = vpop.eup %4427 }
 0x51d   :  { %v4430_v5 = vpop.eup %4429  ;;  %v5971_v30 = vadd.f32 1.0, %v4428_v60  ;;  %4431 = vpow2.f32 %v4273_v28 }
 0x51e   :  { %v5973_v42 = vadd.f32 1.0, %v4430_v5 }
 0x51f   :  { %4433 = vrcp.f32 %v5971_v30  ;;  %v1869_v33 = vand.u32 2147483648, %v5971_v30  ;;  %v1867_v22 = vand.u32 2147483647, %v5971_v30  ;;  %vm1863_vm10 = vweird.f32 %v5971_v30 }
 0x520   :  { %4435 = vrcp.f32 %v5973_v42  ;;  %v1888_v25 = vand.u32 2147483648, %v5973_v42  ;;  %v1886_v38 = vand.u32 2147483647, %v5973_v42  ;;  %vm1882_vm11 = vweird.f32 %v5973_v42 }
 0x521   :  { %v1870_v39 = vor.u32 1.1754944e-38, %v1869_v33  ;;  %vm1868_vm14 = vcmp.eq.f32.partialorder %v1867_v22, 8.507059e+37 }
 0x522   :  { %v1889_v7 = vor.u32 1.1754944e-38, %v1888_v25  ;;  %vm1887_vm15 = vcmp.eq.f32.partialorder %v1886_v38, 8.507059e+37  ;;  %v6087_v25 = vld [vmem:[#allocation9 + $0x350] sm:$0xff] }
 0x523   :  { %v4432_v51 = vpop.eup %4431  ;;  %v6099_v38 = vld [vmem:[#allocation9 + $0x330] sm:$0xff] }
 0x524   :  { %v1896_v29 = vadd.f32 1.0, %v4432_v51  ;;  %v6049_v51 = vld [vmem:[#allocation9 + $0x380] sm:$0xff] }
 0x525   :  { %v4434_v15 = vpop.eup %4433 }
 0x526   :  { %v4436_v10 = vpop.eup %4435  ;;  %v1859_v24 = vmul.f32 %v4434_v15, %v5971_v30  ;;  %4437 = vrcp.f32 %v1896_v29  ;;  %vm1864_vm8 = vweird.f32 %v4434_v15  ;;  %v1908_v30 = vand.u32 2147483648, %v1896_v29 }
 0x527   :  { %v1878_v57 = vmul.f32 %v4436_v10, %v5973_v42  ;;  %4439 = vtanh.f32 %v1852_v59  ;;  %vm1883_vm9 = vweird.f32 %v4436_v10  ;;  %vm1865_vm12 = vmor %vm1863_vm10, %vm1864_vm8  ;;  %vm1902_vm1 = vweird.f32 %v1896_v29  ;;  %v7384_v59 = vld [vmem:[#allocation37_spill] sm:$0xff] }
 0x528   :  { %v1860_v46 = vsub.f32 1.0, %v1859_v24  ;;  %vm1884_vm13 = vmor %vm1882_vm11, %vm1883_vm9  ;;  %v1906_v23 = vand.u32 2147483647, %v1896_v29  ;;  %v1909_v42 = vor.u32 1.1754944e-38, %v1908_v30  ;;  %v6079_v24 = vld [vmem:[#allocation9 + $0x340] sm:$0xff]  ;;  %v6133_v30 = vld [vmem:[#allocation9 + $0x310] sm:$0xff] }
 0x529   :  { %v1879_v2 = vsub.f32 1.0, %v1878_v57  ;;  %v6081_v57 = vld [vmem:[#allocation9 + $0x348] sm:$0xff] }
 0x52a   :  { %v1861_v1 = vmul.f32 %v4434_v15, %v1860_v46  ;;  %vm1907_vm3 = vcmp.eq.f32.partialorder %v1906_v23, 8.507059e+37  ;;  %v6083_v46 = vld [vmem:[#allocation9 + $0x358] sm:$0xff] }
 0x52b   :  { %v1880_v4 = vmul.f32 %v4436_v10, %v1879_v2 }
 0x52c   :  { %v4438_v14 = vpop.eup %4437  ;;  %v1862_v44 = vadd.f32 %v4434_v15, %v1861_v1 }
 0x52d   :  { %v1881_v62 = vadd.f32 %v4436_v10, %v1880_v4  ;;  %v1898_v40 = vmul.f32 %v4438_v14, %v1896_v29  ;;  %v4440_v32 = vpop.eup %4439  ;;  %vm1903_vm0 = vweird.f32 %v4438_v14  ;;  %v6069_v29 = vld [vmem:[#allocation9 + $0x378] sm:$0xff]  ;;  %v6091_v4 = vld [vmem:[#allocation9 + $0x328] sm:$0xff] }
 0x52e   :  { %v1866_v45 = vsel %vm1865_vm12, %v4434_v15, %v1862_v44  ;;  %vm1904_vm2 = vmor %vm1902_vm1, %vm1903_vm0  ;;  %v223_v15 = vadd.f32 %v7383_v41, %v7361_v17  ;;  %v6089_v17 = vld [vmem:[#allocation9 + $0x320] sm:$0xff] }
 0x52f   :  { %v1871_v28 = vsel %vm1868_vm14, %v1870_v39, %v1866_v45  ;;  %v1885_v49 = vsel %vm1884_vm13, %v4436_v10, %v1881_v62  ;;  %v1899_v55 = vsub.f32 1.0, %v1898_v40  ;;  %v264_v10 = vadd.f32 %v7384_v59, %v7363_v53  ;;  %v6094_v53 = vld [vmem:[#allocation9 + $0x338] sm:$0xff]  ;;  %v6101_v39 = vld [vmem:[#allocation9 + $0x300] sm:$0xff]  ;;  %v6103_v62 = vld [vmem:[#allocation9 + $0x308] sm:$0xff] }
 0x530   :  { %v1890_v18 = vsel %vm1887_vm15, %v1889_v7, %v1885_v49  ;;  %v1913_v60 = vmul.f32 %v4440_v32, %v1871_v28  ;;  %v6109_v40 = vld [vmem:[#allocation9 + $0x2e0] sm:$0xff]  ;;  %v6111_v7 = vld [vmem:[#allocation9 + $0x2e8] sm:$0xff]  ;;  %v6113_v45 = vld [vmem:[#allocation9 + $0x318] sm:$0xff] }
 0x531   :  { %v1912_v31 = vmul.f32 %v1890_v18, %v5935_v12  ;;  %v1900_v61 = vmul.f32 %v4438_v14, %v1899_v55  ;;  %v7381_v12 = vld [vmem:[#allocation42_spill] sm:$0xff]  ;;  %v6116_v32 = vld [vmem:[#allocation9 + $0x2c0] sm:$0xff]  ;;  %v6120_v49 = vld [vmem:[#allocation9 + $0x2f8] sm:$0xff] }
 0x532   :  { %v6118_v28 = vld [vmem:[#allocation9 + $0x2c8] sm:$0xff]  ;;  %v7385_v55 = vld [vmem:[#allocation33_spill] sm:$0xff] }
 0x533   :  { %v5988_v52 = vadd.f32 %v1913_v60, %v1912_v31  ;;  %v1901_v5 = vadd.f32 %v4438_v14, %v1900_v61  ;;  %v346_v18 = vadd.f32 %v7385_v55, %v7365_v6  ;;  %v6126_v60 = vld [vmem:[#allocation9 + $0x2d8] sm:$0xff]  ;;  %v6129_v61 = vld [vmem:[#allocation9 + $0x2a0] sm:$0xff] }
 0x534   :  { %v6137_v6 = vld [vmem:[#allocation9 + $0x2b8] sm:$0xff]  ;;  %v6155_v41 = vld [vmem:[#allocation9 + $0x260] sm:$0xff] }
 0x535   :  { %4441 = vtanh.f32 %v5988_v52  ;;  %v1905_v48 = vsel %vm1904_vm2, %v4438_v14, %v1901_v5  ;;  %v6131_v5 = vld [vmem:[#allocation9 + $0x2a8] sm:$0xff]  ;;  %7388 = vst [vmem:[#allocation46_spill] sm:$0xff] %v6155_v41  ;;  %v6183_v55 = vld [vmem:[#allocation9 + $0x220] sm:$0xff] }
 0x536   :  { %v1910_v0 = vsel %vm1907_vm3, %v1909_v42, %v1905_v48  ;;  %v6139_v48 = vld [vmem:[#allocation9 + $0x2f0] sm:$0xff]  ;;  %v6143_v42 = vld [vmem:[#allocation9 + $0x280] sm:$0xff]  ;;  %7394 = vst [vmem:[#allocation36_spill] sm:$0xff] %v6183_v55 }
 0x53b   :  { %v4442_v63 = vpop.eup %4441 }
 0x53c   :  { %v1916_v34 = vmul.f32 %v4442_v63, %v1910_v0  ;;  %v6145_v63 = vld [vmem:[#allocation9 + $0x288] sm:$0xff] }
 0x53d   :  { %7386 = vst [vmem:[#allocation44_spill] sm:$0xff] %v6145_v63 }
 0x53e   :  { %2006 = vmatmul.f32.vlgmr.msrb.gmra.mxu0 %v1916_v34  ;;  %2026 = vmatmul.f32.vlgmr.msrb.gmra.mxu1 %v1916_v34 }
 0x53f   :  { %2046 = vmatmul.f32.vlgmr.msrb.gmra.mxu2 %v1916_v34  ;;  %2066 = vmatmul.f32.vlgmr.msra.gmra.mxu3 %v1916_v34 }
 0x540   :  { %2488 = vmatpush.msrb.mxu0 %v6003_v26  ;;  %2508 = vmatpush.msrb.mxu1 %v6005_v20 }
 0x541   :  { %2548 = vmatpush.msra.mxu3 %v6013_v54 }
 0x542   :  { %2489 = vmatpush.msrb.mxu0 %v6007_v21  ;;  %2509 = vmatpush.msrb.mxu1 %v6011_v47 }
 0x544   :  { %2490 = vmatpush.msrb.mxu0 %v6016_v58  ;;  %2510 = vmatpush.msrb.mxu1 %v6018_v3 }
 0x546   :  { %2239 = vmatmul.f32.vlgmr.msra.gmra.mxu0 %v7381_v12  ;;  %2280 = vmatmul.f32.vlgmr.msra.gmra.mxu1 %v7381_v12 }
 0x547   :  { %2321 = vmatmul.f32.vlgmr.msra.gmra.mxu2 %v7381_v12  ;;  %2362 = vmatmul.f32.vlgmr.msrb.gmra.mxu3 %v7381_v12  ;;  %v6151_v12 = vld [vmem:[#allocation9 + $0x2d0] sm:$0xff] }
 0x548   :  { %2491 = vmatpush.msrb.mxu0 %v6049_v51  ;;  %2511 = vmatpush.msrb.mxu1 %v6051_v36 }
 0x54a   :  { %2512 = vmatpush.msrb.mxu1 %v6059_v8 }
 0x54c   :  { %2513 = vmatpush.msrb.mxu1 %v6081_v57 }
 0x54e   :  { %2242 = vmatmul.f32.gmra.mxu0 %v7382_v19  ;;  %2283 = vmatmul.f32.gmra.mxu1 %v7382_v19 }
 0x54f   :  { %2324 = vmatmul.f32.gmra.mxu2 %v7382_v19  ;;  %2365 = vmatmul.f32.gmra.mxu3 %v7382_v19 }
 0x550   :  { %2514 = vmatpush.msrb.mxu1 %v6091_v4 }
 0x552   :  { %2515 = vmatpush.msrb.mxu1 %v6103_v62 }
 0x554   :  { %2516 = vmatpush.msrb.mxu1 %v6111_v7 }
 0x556   :  { %2245 = vmatmul.f32.gmra.mxu0 %v5559_v27  ;;  %2286 = vmatmul.f32.gmra.mxu1 %v5559_v27 }
 0x557   :  { %2327 = vmatmul.f32.gmra.mxu2 %v5559_v27  ;;  %2368 = vmatmul.f32.gmra.mxu3 %v5559_v27  ;;  %v6020_v27 = vld [vmem:[#allocation9 + $0x3d8] sm:$0xff] }
 0x558   :  { %2549 = vmatpush.msra.mxu3 %v6020_v27  ;;  %2517 = vmatpush.msrb.mxu1 %v6118_v28 }
 0x55a   :  { %2518 = vmatpush.msrb.mxu1 %v6131_v5 }
 0x55c   :  { %2519 = vmatpush.msrb.mxu1 %v6145_v63 }
 0x55e   :  { %2248 = vmatmul.f32.gmra.mxu0 %v5630_v43  ;;  %2289 = vmatmul.f32.gmra.mxu1 %v5630_v43 }
 0x55f   :  { %2330 = vmatmul.f32.gmra.mxu2 %v5630_v43  ;;  %2371 = vmatmul.f32.gmra.mxu3 %v5630_v43  ;;  %v6039_v43 = vld [vmem:[#allocation9 + $0x3f0] sm:$0xff] }
 0x560   :  { %2528 = vmatpush.msrb.mxu2 %v6039_v43 }
 0x562   :  { %2529 = vmatpush.msrb.mxu2 %v6042_v9 }
 0x564   :  { %2530 = vmatpush.msrb.mxu2 %v6047_v56 }
 0x566   :  { %2251 = vmatmul.f32.gmra.mxu0 %v5711_v37  ;;  %2292 = vmatmul.f32.gmra.mxu1 %v5711_v37 }
 0x567   :  { %2333 = vmatmul.f32.gmra.mxu2 %v5711_v37  ;;  %2374 = vmatmul.f32.gmra.mxu3 %v5711_v37  ;;  %v6045_v37 = vld [vmem:[#allocation9 + $0x3b8] sm:$0xff] }
 0x568   :  { %2550 = vmatpush.msra.mxu3 %v6045_v37  ;;  %2531 = vmatpush.msrb.mxu2 %v6063_v13 }
 0x56a   :  { %2551 = vmatpush.msra.mxu3 %v6061_v16  ;;  %2532 = vmatpush.msrb.mxu2 %v6071_v11 }
 0x56c   :  { %2552 = vmatpush.msra.mxu3 %v6069_v29  ;;  %2533 = vmatpush.msrb.mxu2 %v6087_v25 }
 0x56e   :  { %2254 = vmatmul.f32.gmra.mxu0 %v5954_v50  ;;  %2295 = vmatmul.f32.gmra.mxu1 %v5954_v50 }
 0x56f   :  { %2336 = vmatmul.f32.gmra.mxu2 %v5954_v50  ;;  %2377 = vmatmul.f32.gmra.mxu3 %v5954_v50  ;;  %v6054_v50 = vld [vmem:[#allocation9 + $0x360] sm:$0xff] }
 0x570   :  { %2492 = vmatpush.msrb.mxu0 %v6054_v50  ;;  %2553 = vmatpush.msra.mxu3 %v6083_v46 }
 0x571   :  { %2534 = vmatpush.msrb.mxu2 %v6099_v38 }
 0x572   :  { %2493 = vmatpush.msrb.mxu0 %v6079_v24  ;;  %2554 = vmatpush.msra.mxu3 %v6094_v53 }
 0x573   :  { %2535 = vmatpush.msrb.mxu2 %v6133_v30 }
 0x574   :  { %2494 = vmatpush.msrb.mxu0 %v6089_v17  ;;  %2555 = vmatpush.msra.mxu3 %v6113_v45 }
 0x575   :  { %2536 = vmatpush.msrb.mxu2 %v6139_v48 }
 0x576   :  { %2257 = vmatmul.f32.gmra.mxu0 %v1916_v34  ;;  %2298 = vmatmul.f32.gmra.mxu1 %v1916_v34 }
 0x577   :  { %2339 = vmatmul.f32.gmra.mxu2 %v1916_v34  ;;  %2380 = vmatmul.f32.gmra.mxu3 %v1916_v34  ;;  %v6149_v34 = vld [vmem:[#allocation9 + $0x298] sm:$0xff] }
 0x578   :  { %2495 = vmatpush.msrb.mxu0 %v6101_v39  ;;  %2556 = vmatpush.msra.mxu3 %v6120_v49  ;;  %7387 = vst [vmem:[#allocation45_spill] sm:$0xff] %v6149_v34 }
 0x579   :  { %2537 = vmatpush.msrb.mxu2 %v6151_v12 }
 0x57a   :  { %2496 = vmatpush.msrb.mxu0 %v6109_v40  ;;  %2557 = vmatpush.msra.mxu3 %v6126_v60 }
 0x57c   :  { %2497 = vmatpush.msrb.mxu0 %v6116_v32  ;;  %2558 = vmatpush.msra.mxu3 %v6137_v6 }
 0x57e   :  { %2498 = vmatpush.msrb.mxu0 %v6129_v61  ;;  %2559 = vmatpush.msra.mxu3 %v6149_v34  ;;  %v6207_v34 = vld [vmem:[#allocation9 + $0x218] sm:$0xff] }
 0x57f   :  { %7401 = vst [vmem:[#allocation24_spill] sm:$0xff] %v6207_v34 }
 0x580   :  { %2499 = vmatpush.msrb.mxu0 %v6143_v42 }
 0x582   :  { %2500 = vmatpush.msrb.mxu0 %v6155_v41 }
 0x5bb   :  { %v2007_v2 = vpop.f32.mrf.mxu0  ;;  %v2027_v33 = vpop.f32.mrf.mxu1 }
 0x5bc   :  { %v2070_v1 = vadd.f32 %v2007_v2, %v223_v15  ;;  %v2071_v22 = vadd.f32 %v2027_v33, %v264_v10  ;;  %v6157_v15 = vld [vmem:[#allocation9 + $0x268] sm:$0xff]  ;;  %v6163_v2 = vld [vmem:[#allocation9 + $0x2b0] sm:$0xff]  ;;  %v6165_v33 = vld [vmem:[#allocation9 + $0x278] sm:$0xff] }
 0x5bd   :  { %7389 = vst [vmem:[#allocation47_spill] sm:$0xff] %v6157_v15  ;;  %2520 = vmatpush.msrb.mxu1 %v6157_v15  ;;  %2538 = vmatpush.msrb.mxu2 %v6163_v2  ;;  %v7399_v15 = vld [vmem:[#allocation40_spill] sm:$0xff] }
 0x5be   :  { %v4274_v14 = vmul.f32 -1.442695, %v2070_v1  ;;  %v4275_v44 = vmul.f32 -1.442695, %v2071_v22  ;;  %7390 = vst [vmem:[#allocation30_spill] sm:$0xff] %v6165_v33  ;;  %v6171_v22 = vld [vmem:[#allocation9 + $0x240] sm:$0xff]  ;;  %2560 = vmatpush.msra.mxu3 %v6165_v33  ;;  %v305_v41 = vadd.f32 %v7399_v15, %v7367_v35 }
 0x5bf   :  { %7391 = vst [vmem:[#allocation21_spill] sm:$0xff] %v6171_v22  ;;  %2501 = vmatpush.msrb.mxu0 %v6171_v22  ;;  %v6205_v22 = vld [vmem:[#allocation9 + $0x238] sm:$0xff]  ;;  %v6215_v35 = vld [vmem:[#allocation9 + $0x230] sm:$0xff] }
 0x5c0   :  { %4443 = vpow2.f32 %v4274_v14  ;;  %v6173_v14 = vld [vmem:[#allocation9 + $0x248] sm:$0xff]  ;;  %7400 = vst [vmem:[#allocation28_spill] sm:$0xff] %v6205_v22 }
 0x5c1   :  { %4445 = vpow2.f32 %v4275_v44  ;;  %7392 = vst [vmem:[#allocation38_spill] sm:$0xff] %v6173_v14  ;;  %v6178_v44 = vld [vmem:[#allocation9 + $0x290] sm:$0xff]  ;;  %2521 = vmatpush.msrb.mxu1 %v6173_v14  ;;  %2502 = vmatpush.msrb.mxu0 %v6183_v55 }
 0x5c2   :  { %v2067_v31 = vpop.f32.mrf.mxu3  ;;  %7393 = vst [vmem:[#allocation26_spill] sm:$0xff] %v6178_v44  ;;  %2539 = vmatpush.msrb.mxu2 %v6178_v44  ;;  %v6203_v14 = vld [vmem:[#allocation9 + $0x250] sm:$0xff] }
 0x5c3   :  { %v2073_v23 = vadd.f32 %v2067_v31, %v346_v18  ;;  %v6185_v18 = vld [vmem:[#allocation9 + $0x228] sm:$0xff]  ;;  %v6187_v31 = vld [vmem:[#allocation9 + $0x258] sm:$0xff] }
 0x5c4   :  { %7395 = vst [vmem:[#allocation23_spill] sm:$0xff] %v6185_v18  ;;  %2561 = vmatpush.msra.mxu3 %v6187_v31  ;;  %2522 = vmatpush.msrb.mxu1 %v6185_v18 }
 0x5c5   :  { %v4276_v0 = vmul.f32 -1.442695, %v2073_v23  ;;  %7396 = vst [vmem:[#allocation41_spill] sm:$0xff] %v6187_v31  ;;  %v6191_v23 = vld [vmem:[#allocation9 + $0x270] sm:$0xff] }
 0x5c6   :  { %v4444_v19 = vpop.eup %4443  ;;  %2540 = vmatpush.msrb.mxu2 %v6191_v23  ;;  %2562 = vmatpush.msra.mxu3 %v6205_v22  ;;  %v6222_v22 = vld [vmem:[#allocation9 + $0x210] sm:$0xff] }
 0x5c7   :  { %v4446_v59 = vpop.eup %4445  ;;  %v6159_v10 = vadd.f32 1.0, %v4444_v19  ;;  %4447 = vpow2.f32 %v4276_v0  ;;  %v2047_v0 = vpop.f32.mrf.mxu2  ;;  %v6195_v19 = vld [vmem:[#allocation9 + $0x200] sm:$0xff] }
 0x5c8   :  { %v6167_v1 = vadd.f32 1.0, %v4446_v59  ;;  %7397 = vst [vmem:[#allocation27_spill] sm:$0xff] %v6195_v19  ;;  %v6197_v59 = vld [vmem:[#allocation9 + $0x208] sm:$0xff]  ;;  %v2072_v63 = vadd.f32 %v2047_v0, %v305_v41  ;;  %2503 = vmatpush.msrb.mxu0 %v6195_v19  ;;  %2541 = vmatpush.msrb.mxu2 %v6203_v14 }
 0x5c9   :  { %4449 = vrcp.f32 %v6159_v10  ;;  %7398 = vst [vmem:[#allocation18_spill] sm:$0xff] %v6197_v59  ;;  %2523 = vmatpush.msrb.mxu1 %v6197_v59  ;;  %2563 = vmatpush.msra.mxu3 %v6207_v34  ;;  %v2089_v59 = vand.u32 2147483648, %v6159_v10  ;;  %vm2083_vm6 = vweird.f32 %v6159_v10 }
 0x5ca   :  { %4451 = vrcp.f32 %v6167_v1  ;;  %2704 = vmatpush.msra.mxu0 %v6003_v26  ;;  %2542 = vmatpush.msrb.mxu2 %v6215_v35  ;;  %v2108_v34 = vand.u32 2147483648, %v6167_v1  ;;  %v2087_v26 = vand.u32 2147483647, %v6159_v10  ;;  %vm2102_vm7 = vweird.f32 %v6167_v1 }
 0x5cb   :  { %2724 = vmatpush.msra.mxu1 %v6005_v20  ;;  %2764 = vmatpush.msrb.mxu3 %v6013_v54  ;;  %v2106_v54 = vand.u32 2147483647, %v6167_v1 }
 0x5cc   :  { %2705 = vmatpush.msra.mxu0 %v6007_v21  ;;  %2543 = vmatpush.msrb.mxu2 %v6222_v22  ;;  %vm2088_vm10 = vcmp.eq.f32.partialorder %v2087_v26, 8.507059e+37 }
 0x5cd   :  { %v4448_v33 = vpop.eup %4447  ;;  %2725 = vmatpush.msra.mxu1 %v6011_v47  ;;  %2765 = vmatpush.msrb.mxu3 %v6020_v27  ;;  %v2090_v27 = vor.u32 1.1754944e-38, %v2089_v59  ;;  %vm2107_vm11 = vcmp.eq.f32.partialorder %v2106_v54, 8.507059e+37 }
 0x5ce   :  { %v6209_v44 = vadd.f32 1.0, %v4448_v33  ;;  %2744 = vmatpush.msra.mxu2 %v6039_v43  ;;  %2706 = vmatpush.msra.mxu0 %v6016_v58  ;;  %v2109_v58 = vor.u32 1.1754944e-38, %v2108_v34 }
 0x5cf   :  { %v4450_v31 = vpop.eup %4449  ;;  %2726 = vmatpush.msra.mxu1 %v6018_v3  ;;  %2766 = vmatpush.msrb.mxu3 %v6045_v37 }
 0x5d0   :  { %v4452_v15 = vpop.eup %4451  ;;  %v2079_v18 = vmul.f32 %v4450_v31, %v6159_v10  ;;  %4453 = vrcp.f32 %v6209_v44  ;;  %vm2084_vm4 = vweird.f32 %v4450_v31  ;;  %2745 = vmatpush.msra.mxu2 %v6042_v9  ;;  %2707 = vmatpush.msra.mxu0 %v6049_v51  ;;  %vm2122_vm13 = vweird.f32 %v6209_v44 }
 0x5d1   :  { %v2098_v33 = vmul.f32 %v4452_v15, %v6167_v1  ;;  %4455 = vtanh.f32 %v2072_v63  ;;  %vm2103_vm5 = vweird.f32 %v4452_v15  ;;  %vm2085_vm8 = vmor %vm2083_vm6, %vm2084_vm4  ;;  %2727 = vmatpush.msra.mxu1 %v6051_v36  ;;  %2767 = vmatpush.msrb.mxu3 %v6061_v16  ;;  %v2126_v26 = vand.u32 2147483647, %v6209_v44 }
 0x5d2   :  { %v2080_v41 = vsub.f32 1.0, %v2079_v18  ;;  %vm2104_vm9 = vmor %vm2102_vm7, %vm2103_vm5  ;;  %2746 = vmatpush.msra.mxu2 %v6047_v56  ;;  %2708 = vmatpush.msra.mxu0 %v6054_v50 }
 0x5d3   :  { %v2099_v0 = vsub.f32 1.0, %v2098_v33  ;;  %2728 = vmatpush.msra.mxu1 %v6059_v8  ;;  %2768 = vmatpush.msrb.mxu3 %v6069_v29  ;;  %vm2127_vm15 = vcmp.eq.f32.partialorder %v2126_v26, 8.507059e+37 }
 0x5d4   :  { %v2081_v19 = vmul.f32 %v4450_v31, %v2080_v41  ;;  %2747 = vmatpush.msra.mxu2 %v6063_v13  ;;  %2709 = vmatpush.msra.mxu0 %v6079_v24 }
 0x5d5   :  { %v2100_v20 = vmul.f32 %v4452_v15, %v2099_v0  ;;  %2729 = vmatpush.msra.mxu1 %v6081_v57  ;;  %2769 = vmatpush.msrb.mxu3 %v6083_v46 }
 0x5d6   :  { %v6238_v21 = vpop.eup %4453  ;;  %v2082_v47 = vadd.f32 %v4450_v31, %v2081_v19  ;;  %2748 = vmatpush.msra.mxu2 %v6071_v11  ;;  %2710 = vmatpush.msra.mxu0 %v6089_v17 }
 0x5d7   :  { %v2101_v63 = vadd.f32 %v4452_v15, %v2100_v20  ;;  %v2118_v18 = vmul.f32 %v6238_v21, %v6209_v44  ;;  %v4456_v3 = vpop.eup %4455  ;;  %vm2123_vm12 = vweird.f32 %v6238_v21  ;;  %2730 = vmatpush.msra.mxu1 %v6091_v4  ;;  %2770 = vmatpush.msrb.mxu3 %v6094_v53 }
 0x5d8   :  { %v2086_v10 = vsel %vm2085_vm8, %v4450_v31, %v2082_v47  ;;  %2749 = vmatpush.msra.mxu2 %v6087_v25  ;;  %2711 = vmatpush.msra.mxu0 %v6101_v39  ;;  %vm2124_vm14 = vmor %vm2122_vm13, %vm2123_vm12 }
 0x5d9   :  { %v2091_v1 = vsel %vm2088_vm10, %v2090_v27, %v2086_v10  ;;  %v2105_v19 = vsel %vm2104_vm9, %v4452_v15, %v2101_v63  ;;  %v2119_v59 = vsub.f32 1.0, %v2118_v18  ;;  %2731 = vmatpush.msra.mxu1 %v6103_v62  ;;  %2771 = vmatpush.msrb.mxu3 %v6113_v45  ;;  %v7402_v27 = vld [vmem:[#allocation44_spill] sm:$0xff]  ;;  %v7403_v63 = vld [vmem:[#allocation45_spill] sm:$0xff]  ;;  %v7404_v18 = vld [vmem:[#allocation26_spill] sm:$0xff] }
 0x5da   :  { %v2110_v33 = vsel %vm2107_vm11, %v2109_v58, %v2105_v19  ;;  %v2133_v41 = vmul.f32 %v4456_v3, %v2091_v1  ;;  %2750 = vmatpush.msra.mxu2 %v6099_v38  ;;  %2712 = vmatpush.msra.mxu0 %v6109_v40  ;;  %v7405_v58 = vld [vmem:[#allocation46_spill] sm:$0xff]  ;;  %v7406_v10 = vld [vmem:[#allocation47_spill] sm:$0xff]  ;;  %v7408_v1 = vld [vmem:[#allocation21_spill] sm:$0xff] }
 0x5db   :  { %v2132_v34 = vmul.f32 %v2110_v33, %v5988_v52  ;;  %v2120_v31 = vmul.f32 %v6238_v21, %v2119_v59  ;;  %v2128_v52 = vand.u32 2147483648, %v6209_v44  ;;  %2732 = vmatpush.msra.mxu1 %v6111_v7  ;;  %2772 = vmatpush.msrb.mxu3 %v6120_v49  ;;  %v7407_v3 = vld [vmem:[#allocation30_spill] sm:$0xff]  ;;  %v7410_v59 = vld [vmem:[#allocation41_spill] sm:$0xff]  ;;  %v7411_v33 = vmov 0.0  }
 0x5dc   :  { %2751 = vmatpush.msra.mxu2 %v6133_v30  ;;  %2713 = vmatpush.msra.mxu0 %v6116_v32  ;;  %v7409_v19 = vld [vmem:[#allocation38_spill] sm:$0xff] }
 0x5dd   :  { %v2134_v15 = vadd.f32 %v2133_v41, %v2132_v34  ;;  %v2121_v0 = vadd.f32 %v6238_v21, %v2120_v31  ;;  %v2129_v54 = vor.u32 1.1754944e-38, %v2128_v52  ;;  %2733 = vmatpush.msra.mxu1 %v6118_v28  ;;  %2773 = vmatpush.msrb.mxu3 %v6126_v60  ;;  %v7412_v41 = vld [vmem:[#allocation23_spill] sm:$0xff]  ;;  %v7413_v34 = vld [vmem:[#allocation28_spill] sm:$0xff] }
 0x5de   :  { %2752 = vmatpush.msra.mxu2 %v6139_v48  ;;  %2714 = vmatpush.msra.mxu0 %v6129_v61  ;;  %v7414_v31 = vld [vmem:[#allocation27_spill] sm:$0xff] }
 0x5df   :  { %4457 = vtanh.f32 %v2134_v15  ;;  %v2125_v20 = vsel %vm2124_vm14, %v6238_v21, %v2121_v0  ;;  %2734 = vmatpush.msra.mxu1 %v6131_v5  ;;  %2774 = vmatpush.msrb.mxu3 %v6137_v6  ;;  %v7415_v15 = vld [vmem:[#allocation18_spill] sm:$0xff]  ;;  %v7416_v0 = vld [vmem:[#allocation24_spill] sm:$0xff] }
 0x5e0   :  { %v2130_v47 = vsel %vm2127_vm15, %v2129_v54, %v2125_v20  ;;  %2753 = vmatpush.msra.mxu2 %v6151_v12  ;;  %2715 = vmatpush.msra.mxu0 %v6143_v42 }
 0x5e1   :  { %2735 = vmatpush.msra.mxu1 %v7402_v27  ;;  %2775 = vmatpush.msrb.mxu3 %v7403_v63 }
 0x5e2   :  { %2754 = vmatpush.msra.mxu2 %v6163_v2  ;;  %2716 = vmatpush.msra.mxu0 %v7405_v58 }
 0x5e3   :  { %2736 = vmatpush.msra.mxu1 %v7406_v10  ;;  %2776 = vmatpush.msrb.mxu3 %v7407_v3 }
 0x5e4   :  { %2755 = vmatpush.msra.mxu2 %v7404_v18  ;;  %2717 = vmatpush.msra.mxu0 %v7408_v1 }
 0x5e5   :  { %v4458_v44 = vpop.eup %4457  ;;  %2737 = vmatpush.msra.mxu1 %v7409_v19  ;;  %2777 = vmatpush.msrb.mxu3 %v7410_v59 }
 0x5e6   :  { %v2136_v21 = vmul.f32 %v4458_v44, %v2130_v47  ;;  %2756 = vmatpush.msra.mxu2 %v6191_v23  ;;  %2718 = vmatpush.msra.mxu0 %v6183_v55 }
 0x5e7   :  { %2738 = vmatpush.msra.mxu1 %v7412_v41  ;;  %2778 = vmatpush.msrb.mxu3 %v7413_v34 }
 0x5e8   :  { %2260 = vmatmul.f32.gmra.mxu0 %v2136_v21  ;;  %2301 = vmatmul.f32.gmra.mxu1 %v2136_v21 }
 0x5e9   :  { %2342 = vmatmul.f32.gmra.mxu2 %v2136_v21  ;;  %2383 = vmatmul.f32.gmra.mxu3 %v2136_v21 }
 0x5ea   :  { %2757 = vmatpush.msra.mxu2 %v6203_v14  ;;  %2719 = vmatpush.msra.mxu0 %v7414_v31 }
 0x5eb   :  { %2739 = vmatpush.msra.mxu1 %v7415_v15  ;;  %2779 = vmatpush.msrb.mxu3 %v7416_v0 }
 0x5ec   :  { %2758 = vmatpush.msra.mxu2 %v6215_v35 }
 0x5ee   :  { %2759 = vmatpush.msra.mxu2 %v6222_v22 }
 0x5f0   :  { %2504 = vmatmul.f32.vlgmr.msrb.gmra.mxu0 %v7411_v33  ;;  %2524 = vmatmul.f32.vlgmr.msrb.gmra.mxu1 %v7411_v33 }
 0x5f1   :  { %2544 = vmatmul.f32.vlgmr.msrb.gmra.mxu2 %v7411_v33  ;;  %2564 = vmatmul.f32.vlgmr.msra.gmra.mxu3 %v7411_v33 }
 0x5f2   :  { %2960 = vmatpush.msrb.mxu2 %v6039_v43  ;;  %v2240_v43 = vpop.f32.mrf.mxu0 }
 0x5f4   :  { %2961 = vmatpush.msrb.mxu2 %v6042_v9  ;;  %v2281_v9 = vpop.f32.mrf.mxu1 }
 0x5f6   :  { %2962 = vmatpush.msrb.mxu2 %v6047_v56  ;;  %v2363_v56 = vpop.f32.mrf.mxu3 }
 0x5f8   :  { %2963 = vmatpush.msrb.mxu2 %v6063_v13 }
 0x5fa   :  { %2964 = vmatpush.msrb.mxu2 %v6071_v11  ;;  %v6330_v13 = vpop.f32.mrf.mxu0 }
 0x5fc   :  { %2965 = vmatpush.msrb.mxu2 %v6087_v25  ;;  %v6332_v11 = vpop.f32.mrf.mxu1  ;;  %v2322_v25 = vpop.f32.mrf.mxu2 }
 0x5fe   :  { %2966 = vmatpush.msrb.mxu2 %v6099_v38  ;;  %v6334_v38 = vpop.f32.mrf.mxu3 }
 0x600   :  { %2967 = vmatpush.msrb.mxu2 %v6133_v30 }
 0x602   :  { %2968 = vmatpush.msrb.mxu2 %v6139_v48  ;;  %v6336_v30 = vpop.f32.mrf.mxu0 }
 0x603   :  { %7417 = vst [vmem:[#allocation31_spill] sm:$0xff] %v6336_v30 }
 0x604   :  { %2969 = vmatpush.msrb.mxu2 %v6151_v12  ;;  %v6338_v48 = vpop.f32.mrf.mxu1  ;;  %v6340_v12 = vpop.f32.mrf.mxu2 }
 0x605   :  { %7418 = vst [vmem:[#allocation19_spill] sm:$0xff] %v6338_v48 }
 0x606   :  { %2970 = vmatpush.msrb.mxu2 %v6163_v2  ;;  %7419 = vst [vmem:[#allocation32_spill] sm:$0xff] %v6340_v12  ;;  %v6342_v2 = vpop.f32.mrf.mxu3 }
 0x607   :  { %7420 = vst [vmem:[#allocation25_spill] sm:$0xff] %v6342_v2 }
 0x608   :  { %2971 = vmatpush.msrb.mxu2 %v7404_v18 }
 0x60a   :  { %2972 = vmatpush.msrb.mxu2 %v6191_v23 }
 0x60c   :  { %2973 = vmatpush.msrb.mxu2 %v6203_v14  ;;  %v6344_v14 = vpop.f32.mrf.mxu0  ;;  %v6348_v23 = vpop.f32.mrf.mxu2 }
 0x60d   :  { %7421 = vst [vmem:[#allocation35_spill] sm:$0xff] %v6344_v14 }
 0x60e   :  { %2974 = vmatpush.msrb.mxu2 %v6215_v35  ;;  %7423 = vst [vmem:[#allocation34_spill] sm:$0xff] %v6348_v23  ;;  %v6350_v35 = vpop.f32.mrf.mxu3 }
 0x60f   :  { %7424 = vst [vmem:[#allocation29_spill] sm:$0xff] %v6350_v35 }
 0x610   :  { %2975 = vmatpush.msrb.mxu2 %v6222_v22  ;;  %v6346_v22 = vpop.f32.mrf.mxu1 }
 0x611   :  { %7422 = vst [vmem:[#allocation20_spill] sm:$0xff] %v6346_v22 }
 0x614   :  { %v6352_v52 = vpop.f32.mrf.mxu0  ;;  %v6356_v20 = vpop.f32.mrf.mxu2 }
 0x615   :  { %7425 = vst [vmem:[#allocation39_spill] sm:$0xff] %v6352_v52 }
 0x616   :  { %7427 = vst [vmem:[#allocation43_spill] sm:$0xff] %v6356_v20  ;;  %v6358_v54 = vpop.f32.mrf.mxu3 }
 0x617   :  { %7428 = vst [vmem:[#allocation22_spill] sm:$0xff] %v6358_v54 }
 0x618   :  { %v6354_v26 = vpop.f32.mrf.mxu1 }
 0x619   :  { %7426 = vst [vmem:[#allocation42_spill] sm:$0xff] %v6354_v26  ;;  %v2213_v26 = vld [vmem:[#allocation10 + $0x4] sm:$0xf] }
 0x61a   :  { %v6390_v2 = vperm.slane %v2213_v26, 3 }
 0x61c   :  { %v6360_v44 = vpop.f32.mrf.mxu0  ;;  %v6364_v21 = vpop.f32.mrf.mxu2  ;;  %7443 = vst [vmem:[#allocation52_spill] sm:$0xff] %v6390_v2  ;;  %v2364_v48 = vadd.f32 %v2363_v56, %v6390_v2 }
 0x61d   :  { %7429 = vst [vmem:[#allocation37_spill] sm:$0xff] %v6360_v44  ;;  %v6380_v44 = vperm.slane %v2213_v26, 0 }
 0x61e   :  { %7431 = vst [vmem:[#allocation40_spill] sm:$0xff] %v6364_v21  ;;  %v6366_v18 = vpop.f32.mrf.mxu3 }
 0x61f   :  { %7432 = vst [vmem:[#allocation44_spill] sm:$0xff] %v6366_v18  ;;  %v2241_v21 = vadd.f32 %v2240_v43, %v6380_v44 }
 0x620   :  { %v6362_v47 = vpop.f32.mrf.mxu1  ;;  %7439 = vst [vmem:[#allocation48_spill] sm:$0xff] %v6380_v44 }
 0x621   :  { %7430 = vst [vmem:[#allocation33_spill] sm:$0xff] %v6362_v47  ;;  %v6382_v47 = vperm.slane %v2213_v26, 1 }
 0x623   :  { %7440 = vst [vmem:[#allocation49_spill] sm:$0xff] %v6382_v47  ;;  %v2282_v18 = vadd.f32 %v2281_v9, %v6382_v47 }
 0x624   :  { %v6368_v33 = vpop.f32.mrf.mxu0  ;;  %v6372_v35 = vpop.f32.mrf.mxu2 }
 0x625   :  { %7433 = vst [vmem:[#allocation45_spill] sm:$0xff] %v6368_v33 }
 0x626   :  { %7435 = vst [vmem:[#allocation46_spill] sm:$0xff] %v6372_v35  ;;  %v6374_v52 = vpop.f32.mrf.mxu3 }
 0x627   :  { %7436 = vst [vmem:[#allocation47_spill] sm:$0xff] %v6374_v52 }
 0x628   :  { %v6370_v22 = vpop.f32.mrf.mxu1 }
 0x629   :  { %7434 = vst [vmem:[#allocation26_spill] sm:$0xff] %v6370_v22 }
 0x62c   :  { %v6386_v33 = vpop.f32.mrf.mxu2 }
 0x62d   :  { %7441 = vst [vmem:[#allocation50_spill] sm:$0xff] %v6386_v33 }
 0x665   :  { %v6376_v20 = vpop.f32.mrf.mxu0  ;;  %v6378_v54 = vpop.f32.mrf.mxu1 }
 0x666   :  { %7437 = vst [vmem:[#allocation30_spill] sm:$0xff] %v6376_v20 }
 0x667   :  { %7438 = vst [vmem:[#allocation21_spill] sm:$0xff] %v6378_v54 }
 0x66c   :  { %v6388_v22 = vpop.f32.mrf.mxu3  ;;  %v6393_v30 = vpop.f32.mrf.mxu2 }
 0x66d   :  { %7442 = vst [vmem:[#allocation51_spill] sm:$0xff] %v6388_v22  ;;  %v2505_v35 = vpop.f32.mrf.mxu0  ;;  %v2525_v14 = vpop.f32.mrf.mxu1 }
 0x66e   :  { %v2568_v52 = vadd.f32 %v2505_v35, %v2241_v21  ;;  %v2569_v23 = vadd.f32 %v2525_v14, %v2282_v18  ;;  %7444 = vst [vmem:[#allocation53_spill] sm:$0xff] %v6393_v30  ;;  %v6395_v35 = vperm.slane %v2213_v26, 2 }
 0x670   :  { %v4277_v20 = vmul.f32 -1.442695, %v2568_v52  ;;  %v4278_v54 = vmul.f32 -1.442695, %v2569_v23  ;;  %7445 = vst [vmem:[#allocation54_spill] sm:$0xff] %v6395_v35  ;;  %v2323_v52 = vadd.f32 %v2322_v25, %v6395_v35 }
 0x672   :  { %4459 = vpow2.f32 %v4277_v20 }
 0x673   :  { %4461 = vpow2.f32 %v4278_v54 }
 0x674   :  { %v2565_v43 = vpop.f32.mrf.mxu3  ;;  %v2545_v14 = vpop.f32.mrf.mxu2 }
 0x675   :  { %v2571_v9 = vadd.f32 %v2565_v43, %v2364_v48  ;;  %v2570_v54 = vadd.f32 %v2545_v14, %v2323_v52 }
 0x677   :  { %v4279_v12 = vmul.f32 -1.442695, %v2571_v9 }
 0x678   :  { %v4460_v33 = vpop.eup %4459 }
 0x679   :  { %v4462_v0 = vpop.eup %4461  ;;  %v2575_v22 = vadd.f32 1.0, %v4460_v33  ;;  %4463 = vpow2.f32 %v4279_v12 }
 0x67a   :  { %v2594_v15 = vadd.f32 1.0, %v4462_v0 }
 0x67b   :  { %4465 = vrcp.f32 %v2575_v22  ;;  %v2587_v33 = vand.u32 2147483648, %v2575_v22  ;;  %v2585_v26 = vand.u32 2147483647, %v2575_v22  ;;  %vm2581_vm2 = vweird.f32 %v2575_v22 }
 0x67c   :  { %4467 = vrcp.f32 %v2594_v15  ;;  %v2606_v0 = vand.u32 2147483648, %v2594_v15  ;;  %v2604_v31 = vand.u32 2147483647, %v2594_v15  ;;  %vm2600_vm3 = vweird.f32 %v2594_v15 }
 0x67d   :  { %v2588_v14 = vor.u32 1.1754944e-38, %v2587_v33  ;;  %vm2586_vm5 = vcmp.eq.f32.partialorder %v2585_v26, 8.507059e+37  ;;  %v6427_v26 = vld [vmem:[#allocation9 + $0x3a8] sm:$0xff] }
 0x67e   :  { %v2607_v35 = vor.u32 1.1754944e-38, %v2606_v0  ;;  %vm2605_vm7 = vcmp.eq.f32.partialorder %v2604_v31, 8.507059e+37 }
 0x67f   :  { %v4464_v23 = vpop.eup %4463 }
 0x680   :  { %v2614_v56 = vadd.f32 1.0, %v4464_v23 }
 0x681   :  { %v4466_v20 = vpop.eup %4465 }
 0x682   :  { %v4468_v21 = vpop.eup %4467  ;;  %v2577_v18 = vmul.f32 %v4466_v20, %v2575_v22  ;;  %4469 = vrcp.f32 %v2614_v56  ;;  %vm2582_vm0 = vweird.f32 %v4466_v20  ;;  %vm2620_vm9 = vweird.f32 %v2614_v56 }
 0x683   :  { %v2596_v48 = vmul.f32 %v4468_v21, %v2594_v15  ;;  %4471 = vtanh.f32 %v2570_v54  ;;  %vm2601_vm1 = vweird.f32 %v4468_v21  ;;  %vm2583_vm4 = vmor %vm2581_vm2, %vm2582_vm0  ;;  %v2624_v22 = vand.u32 2147483647, %v2614_v56 }
 0x684   :  { %v2578_v43 = vsub.f32 1.0, %v2577_v18  ;;  %vm2602_vm6 = vmor %vm2600_vm3, %vm2601_vm1 }
 0x685   :  { %v2597_v9 = vsub.f32 1.0, %v2596_v48  ;;  %vm2625_vm11 = vcmp.eq.f32.partialorder %v2624_v22, 8.507059e+37 }
 0x686   :  { %v2579_v12 = vmul.f32 %v4466_v20, %v2578_v43 }
 0x687   :  { %v2598_v30 = vmul.f32 %v4468_v21, %v2597_v9 }
 0x688   :  { %v4470_v34 = vpop.eup %4469  ;;  %v2580_v25 = vadd.f32 %v4466_v20, %v2579_v12 }
 0x689   :  { %v2599_v23 = vadd.f32 %v4468_v21, %v2598_v30  ;;  %v2616_v52 = vmul.f32 %v4470_v34, %v2614_v56  ;;  %v4472_v54 = vpop.eup %4471  ;;  %vm2621_vm8 = vweird.f32 %v4470_v34  ;;  %v2626_v30 = vand.u32 2147483648, %v2614_v56  ;;  %v6425_v56 = vld [vmem:[#allocation9 + $0x3a0] sm:$0xff] }
 0x68a   :  { %v2584_v18 = vsel %vm2583_vm4, %v4466_v20, %v2580_v25  ;;  %vm2622_vm10 = vmor %vm2620_vm9, %vm2621_vm8 }
 0x68b   :  { %v2589_v48 = vsel %vm2586_vm5, %v2588_v14, %v2584_v18  ;;  %v2603_v43 = vsel %vm2602_vm6, %v4468_v21, %v2599_v23  ;;  %v2617_v41 = vsub.f32 1.0, %v2616_v52  ;;  %v2627_v33 = vor.u32 1.1754944e-38, %v2626_v30 }
 0x68c   :  { %v2608_v9 = vsel %vm2605_vm7, %v2607_v35, %v2603_v43  ;;  %v2631_v55 = vmul.f32 %v4472_v54, %v2589_v48  ;;  %v6420_v35 = vld [vmem:[#allocation9 + $0x3d8] sm:$0xff] }
 0x68d   :  { %v2630_v59 = vmul.f32 0.0, %v2608_v9  ;;  %v2618_v19 = vmul.f32 %v4470_v34, %v2617_v41  ;;  %v6416_v41 = vld [vmem:[#allocation9 + $0x3c0] sm:$0xff] }
 0x68f   :  { %v6398_v12 = vadd.f32 %v2631_v55, %v2630_v59  ;;  %v2619_v15 = vadd.f32 %v4470_v34, %v2618_v19  ;;  %v6407_v55 = vld [vmem:[#allocation9 + $0x3e0] sm:$0xff]  ;;  %v6409_v19 = vld [vmem:[#allocation9 + $0x3e8] sm:$0xff]  ;;  %v6411_v59 = vld [vmem:[#allocation9 + $0x3f8] sm:$0xff] }
 0x690   :  { %2920 = vmatpush.msrb.mxu0 %v6407_v55  ;;  %2940 = vmatpush.msrb.mxu1 %v6409_v19 }
 0x691   :  { %4473 = vtanh.f32 %v6398_v12  ;;  %v2623_v20 = vsel %vm2622_vm10, %v4470_v34, %v2619_v15  ;;  %2980 = vmatpush.msra.mxu3 %v6411_v59  ;;  %v6418_v34 = vld [vmem:[#allocation9 + $0x3c8] sm:$0xff] }
 0x692   :  { %v2628_v31 = vsel %vm2625_vm11, %v2627_v33, %v2623_v20  ;;  %2921 = vmatpush.msrb.mxu0 %v6416_v41  ;;  %2941 = vmatpush.msrb.mxu1 %v6418_v34 }
 0x693   :  { %2981 = vmatpush.msra.mxu3 %v6420_v35 }
 0x694   :  { %2922 = vmatpush.msrb.mxu0 %v6425_v56  ;;  %2942 = vmatpush.msrb.mxu1 %v6427_v26 }
 0x695   :  { %2982 = vmatpush.msra.mxu3 %v6045_v37  ;;  %v2244_v37 = vadd.f32 %v6330_v13, %v6380_v44 }
 0x696   :  { %2923 = vmatpush.msrb.mxu0 %v6049_v51  ;;  %2943 = vmatpush.msrb.mxu1 %v6051_v36  ;;  %v2285_v51 = vadd.f32 %v6332_v11, %v6382_v47 }
 0x697   :  { %v4474_v21 = vpop.eup %4473  ;;  %2983 = vmatpush.msra.mxu3 %v6061_v16 }
 0x698   :  { %v6401_v0 = vmul.f32 %v4474_v21, %v2628_v31  ;;  %2924 = vmatpush.msrb.mxu0 %v6054_v50  ;;  %2944 = vmatpush.msrb.mxu1 %v6059_v8 }
 0x699   :  { %2984 = vmatpush.msra.mxu3 %v6069_v29 }
 0x69a   :  { %7446 = vst [vmem:[#allocation55_spill] sm:$0xff] %v6401_v0  ;;  %2720 = vmatmul.f32.vlgmr.msra.gmra.mxu0 %v6401_v0  ;;  %2740 = vmatmul.f32.vlgmr.msra.gmra.mxu1 %v6401_v0 }
 0x69b   :  { %2760 = vmatmul.f32.vlgmr.msra.gmra.mxu2 %v6401_v0  ;;  %2780 = vmatmul.f32.vlgmr.msrb.gmra.mxu3 %v6401_v0  ;;  %v6637_v0 = vld [vmem:[#allocation9 + $0x250] sm:$0xff] }
 0x69c   :  { %2925 = vmatpush.msrb.mxu0 %v6079_v24  ;;  %2945 = vmatpush.msrb.mxu1 %v6081_v57  ;;  %v2367_v57 = vadd.f32 %v6334_v38, %v6390_v2 }
 0x69d   :  { %2985 = vmatpush.msra.mxu3 %v6083_v46 }
 0x69e   :  { %2926 = vmatpush.msrb.mxu0 %v6089_v17  ;;  %2946 = vmatpush.msrb.mxu1 %v6091_v4  ;;  %v7447_v4 = vld [vmem:[#allocation38_spill] sm:$0xff] }
 0x69f   :  { %2986 = vmatpush.msra.mxu3 %v6094_v53 }
 0x6a0   :  { %2927 = vmatpush.msrb.mxu0 %v6101_v39  ;;  %2947 = vmatpush.msrb.mxu1 %v6103_v62  ;;  %v7448_v39 = vld [vmem:[#allocation41_spill] sm:$0xff] }
 0x6a1   :  { %2987 = vmatpush.msra.mxu3 %v6113_v45 }
 0x6a2   :  { %2928 = vmatpush.msrb.mxu0 %v6109_v40  ;;  %2948 = vmatpush.msrb.mxu1 %v6111_v7  ;;  %v7449_v40 = vld [vmem:[#allocation36_spill] sm:$0xff]  ;;  %v7450_v7 = vld [vmem:[#allocation23_spill] sm:$0xff] }
 0x6a3   :  { %2988 = vmatpush.msra.mxu3 %v6120_v49 }
 0x6a4   :  { %2929 = vmatpush.msrb.mxu0 %v6116_v32  ;;  %2949 = vmatpush.msrb.mxu1 %v6118_v28  ;;  %v7451_v28 = vld [vmem:[#allocation28_spill] sm:$0xff] }
 0x6a5   :  { %2989 = vmatpush.msra.mxu3 %v6126_v60  ;;  %v7452_v60 = vld [vmem:[#allocation27_spill] sm:$0xff] }
 0x6a6   :  { %2930 = vmatpush.msrb.mxu0 %v6129_v61  ;;  %2950 = vmatpush.msrb.mxu1 %v6131_v5  ;;  %v7453_v61 = vld [vmem:[#allocation18_spill] sm:$0xff]  ;;  %v7454_v5 = vld [vmem:[#allocation24_spill] sm:$0xff] }
 0x6a7   :  { %2990 = vmatpush.msra.mxu3 %v6137_v6 }
 0x6a8   :  { %2931 = vmatpush.msrb.mxu0 %v6143_v42  ;;  %2951 = vmatpush.msrb.mxu1 %v7402_v27  ;;  %v7455_v27 = vld [vmem:[#allocation54_spill] sm:$0xff] }
 0x6a9   :  { %2991 = vmatpush.msra.mxu3 %v7403_v63  ;;  %v7456_v63 = vld [vmem:[#allocation32_spill] sm:$0xff] }
 0x6aa   :  { %2932 = vmatpush.msrb.mxu0 %v7405_v58  ;;  %2952 = vmatpush.msrb.mxu1 %v7406_v10  ;;  %v2326_v58 = vadd.f32 %v7456_v63, %v7455_v27  ;;  %v6529_v63 = vld [vmem:[#allocation9 + $0x378] sm:$0xff] }
 0x6ab   :  { %2992 = vmatpush.msra.mxu3 %v7407_v3  ;;  %7458 = vst [vmem:[#allocation41_spill] sm:$0xff] %v6529_v63 }
 0x6ac   :  { %2933 = vmatpush.msrb.mxu0 %v7408_v1  ;;  %2953 = vmatpush.msrb.mxu1 %v7447_v4 }
 0x6ad   :  { %2993 = vmatpush.msra.mxu3 %v7448_v39 }
 0x6ae   :  { %2934 = vmatpush.msrb.mxu0 %v7449_v40  ;;  %2954 = vmatpush.msrb.mxu1 %v7450_v7  ;;  %v6500_v7 = vld [vmem:[#allocation9 + $0x3d0] sm:$0xff] }
 0x6af   :  { %2994 = vmatpush.msra.mxu3 %v7451_v28  ;;  %v6509_v28 = vld [vmem:[#allocation9 + $0x380] sm:$0xff] }
 0x6b0   :  { %2935 = vmatpush.msrb.mxu0 %v7452_v60  ;;  %2955 = vmatpush.msrb.mxu1 %v7453_v61  ;;  %v6513_v60 = vld [vmem:[#allocation9 + $0x390] sm:$0xff]  ;;  %v6517_v61 = vld [vmem:[#allocation9 + $0x398] sm:$0xff] }
 0x6b1   :  { %2995 = vmatpush.msra.mxu3 %v7454_v5  ;;  %v6521_v5 = vld [vmem:[#allocation9 + $0x360] sm:$0xff] }
 0x6b2   :  { %3136 = vmatpush.msra.mxu0 %v6407_v55  ;;  %3156 = vmatpush.msra.mxu1 %v6409_v19 }
 0x6b3   :  { %3196 = vmatpush.msrb.mxu3 %v6411_v59 }
 0x6b4   :  { %3137 = vmatpush.msra.mxu0 %v6416_v41  ;;  %3157 = vmatpush.msra.mxu1 %v6418_v34 }
 0x6b5   :  { %3197 = vmatpush.msrb.mxu3 %v6420_v35 }
 0x6b6   :  { %3138 = vmatpush.msra.mxu0 %v6425_v56  ;;  %3158 = vmatpush.msra.mxu1 %v6427_v26 }
 0x6b8   :  { %3139 = vmatpush.msra.mxu0 %v6509_v28 }
 0x6ba   :  { %3140 = vmatpush.msra.mxu0 %v6521_v5 }
 0x717   :  { %v2721_v36 = vpop.f32.mrf.mxu0  ;;  %v2741_v50 = vpop.f32.mrf.mxu1 }
 0x718   :  { %v2784_v8 = vadd.f32 %v2721_v36, %v2244_v37  ;;  %v2785_v16 = vadd.f32 %v2741_v50, %v2285_v51 }
 0x71a   :  { %v4280_v29 = vmul.f32 -1.442695, %v2784_v8  ;;  %v4281_v24 = vmul.f32 -1.442695, %v2785_v16 }
 0x71c   :  { %4475 = vpow2.f32 %v4280_v29 }
 0x71d   :  { %4477 = vpow2.f32 %v4281_v24 }
 0x71e   :  { %v2781_v46 = vpop.f32.mrf.mxu3  ;;  %v2761_v6 = vpop.f32.mrf.mxu2 }
 0x71f   :  { %v2787_v17 = vadd.f32 %v2781_v46, %v2367_v57  ;;  %v2786_v1 = vadd.f32 %v2761_v6, %v2326_v58  ;;  %v6523_v6 = vld [vmem:[#allocation9 + $0x368] sm:$0xff]  ;;  %v6533_v58 = vld [vmem:[#allocation9 + $0x340] sm:$0xff] }
 0x720   :  { %3141 = vmatpush.msra.mxu0 %v6533_v58 }
 0x721   :  { %v4282_v53 = vmul.f32 -1.442695, %v2787_v17 }
 0x722   :  { %v4476_v62 = vpop.eup %4475 }
 0x723   :  { %v4478_v45 = vpop.eup %4477  ;;  %v2791_v32 = vadd.f32 1.0, %v4476_v62  ;;  %4479 = vpow2.f32 %v4282_v53 }
 0x724   :  { %v2810_v49 = vadd.f32 1.0, %v4478_v45  ;;  %v6503_v45 = vld [vmem:[#allocation9 + $0x3b0] sm:$0xff] }
 0x725   :  { %4481 = vrcp.f32 %v2791_v32  ;;  %v2803_v23 = vand.u32 2147483648, %v2791_v32  ;;  %v2801_v54 = vand.u32 2147483647, %v2791_v32  ;;  %vm2797_vm14 = vweird.f32 %v2791_v32 }
 0x726   :  { %4483 = vrcp.f32 %v2810_v49  ;;  %v2822_v52 = vand.u32 2147483648, %v2810_v49  ;;  %v2820_v43 = vand.u32 2147483647, %v2810_v49  ;;  %vm2816_vm15 = vweird.f32 %v2810_v49 }
 0x727   :  { %v2804_v30 = vor.u32 1.1754944e-38, %v2803_v23  ;;  %vm2802_vm2 = vcmp.eq.f32.partialorder %v2801_v54, 8.507059e+37  ;;  %v6559_v23 = vld [vmem:[#allocation9 + $0x308] sm:$0xff]  ;;  %v6569_v54 = vld [vmem:[#allocation9 + $0x2e0] sm:$0xff] }
 0x728   :  { %v2823_v33 = vor.u32 1.1754944e-38, %v2822_v52  ;;  %vm2821_vm3 = vcmp.eq.f32.partialorder %v2820_v43, 8.507059e+37  ;;  %v6561_v52 = vld [vmem:[#allocation9 + $0x310] sm:$0xff] }
 0x729   :  { %v4480_v42 = vpop.eup %4479  ;;  %v6573_v43 = vld [vmem:[#allocation9 + $0x2f0] sm:$0xff] }
 0x72a   :  { %v2830_v10 = vadd.f32 1.0, %v4480_v42  ;;  %v6525_v42 = vld [vmem:[#allocation9 + $0x370] sm:$0xff] }
 0x72b   :  { %v4482_v3 = vpop.eup %4481 }
 0x72c   :  { %v4484_v13 = vpop.eup %4483  ;;  %v2793_v11 = vmul.f32 %v4482_v3, %v2791_v32  ;;  %4485 = vrcp.f32 %v2830_v10  ;;  %vm2798_vm12 = vweird.f32 %v4482_v3  ;;  %v2842_v46 = vand.u32 2147483648, %v2830_v10  ;;  %v6505_v32 = vld [vmem:[#allocation9 + $0x3b8] sm:$0xff] }
 0x72d   :  { %v2812_v38 = vmul.f32 %v4484_v13, %v2810_v49  ;;  %4487 = vtanh.f32 %v2786_v1  ;;  %vm2817_vm13 = vweird.f32 %v4484_v13  ;;  %vm2799_vm0 = vmor %vm2797_vm14, %vm2798_vm12  ;;  %vm2836_vm5 = vweird.f32 %v2830_v10  ;;  %3198 = vmatpush.msrb.mxu3 %v6505_v32  ;;  %v6511_v49 = vld [vmem:[#allocation9 + $0x388] sm:$0xff]  ;;  %v6541_v1 = vld [vmem:[#allocation9 + $0x358] sm:$0xff] }
 0x72e   :  { %v2794_v25 = vsub.f32 1.0, %v2793_v11  ;;  %vm2818_vm1 = vmor %vm2816_vm15, %vm2817_vm13  ;;  %v2840_v17 = vand.u32 2147483647, %v2830_v10  ;;  %v2843_v53 = vor.u32 1.1754944e-38, %v2842_v46  ;;  %3159 = vmatpush.msra.mxu1 %v6511_v49  ;;  %v6547_v11 = vld [vmem:[#allocation9 + $0x328] sm:$0xff] }
 0x72f   :  { %v2813_v14 = vsub.f32 1.0, %v2812_v38  ;;  %3199 = vmatpush.msrb.mxu3 %v6517_v61  ;;  %7461 = vst [vmem:[#allocation28_spill] sm:$0xff] %v6547_v11  ;;  %v6549_v38 = vld [vmem:[#allocation9 + $0x330] sm:$0xff] }
 0x730   :  { %v2795_v18 = vmul.f32 %v4482_v3, %v2794_v25  ;;  %vm2841_vm7 = vcmp.eq.f32.partialorder %v2840_v17, 8.507059e+37  ;;  %3160 = vmatpush.msra.mxu1 %v6523_v6  ;;  %v6553_v25 = vld [vmem:[#allocation9 + $0x338] sm:$0xff] }
 0x731   :  { %v2814_v48 = vmul.f32 %v4484_v13, %v2813_v14  ;;  %3200 = vmatpush.msrb.mxu3 %v6529_v63  ;;  %7462 = vst [vmem:[#allocation27_spill] sm:$0xff] %v6553_v25  ;;  %v6557_v14 = vld [vmem:[#allocation9 + $0x300] sm:$0xff] }
 0x732   :  { %v4486_v9 = vpop.eup %4485  ;;  %v2796_v15 = vadd.f32 %v4482_v3, %v2795_v18  ;;  %v6565_v18 = vld [vmem:[#allocation9 + $0x318] sm:$0xff] }
 0x733   :  { %v2815_v22 = vadd.f32 %v4484_v13, %v2814_v48  ;;  %v2832_v20 = vmul.f32 %v4486_v9, %v2830_v10  ;;  %v4488_v31 = vpop.eup %4487  ;;  %vm2837_vm4 = vweird.f32 %v4486_v9  ;;  %v6535_v10 = vld [vmem:[#allocation9 + $0x348] sm:$0xff]  ;;  %3201 = vmatpush.msrb.mxu3 %v6541_v1 }
 0x734   :  { %v2800_v21 = vsel %vm2799_vm0, %v4482_v3, %v2796_v15  ;;  %vm2838_vm6 = vmor %vm2836_vm5, %vm2837_vm4  ;;  %7459 = vst [vmem:[#allocation36_spill] sm:$0xff] %v6535_v10  ;;  %v6537_v3 = vld [vmem:[#allocation9 + $0x350] sm:$0xff]  ;;  %3161 = vmatpush.msra.mxu1 %v6535_v10  ;;  %v6571_v48 = vld [vmem:[#allocation9 + $0x2e8] sm:$0xff] }
 0x735   :  { %v2805_v37 = vsel %vm2802_vm2, %v2804_v30, %v2800_v21  ;;  %v2819_v51 = vsel %vm2818_vm1, %v4484_v13, %v2815_v22  ;;  %v2833_v36 = vsub.f32 1.0, %v2832_v20  ;;  %v6545_v13 = vld [vmem:[#allocation9 + $0x320] sm:$0xff]  ;;  %3202 = vmatpush.msrb.mxu3 %v6553_v25  ;;  %v7464_v30 = vld [vmem:[#allocation19_spill] sm:$0xff]  ;;  %v6581_v20 = vld [vmem:[#allocation9 + $0x2f8] sm:$0xff] }
 0x736   :  { %v2824_v50 = vsel %vm2821_vm3, %v2823_v33, %v2819_v51  ;;  %v2847_v8 = vmul.f32 %v4488_v31, %v2805_v37  ;;  %7460 = vst [vmem:[#allocation23_spill] sm:$0xff] %v6545_v13  ;;  %3142 = vmatpush.msra.mxu0 %v6545_v13  ;;  %3162 = vmatpush.msra.mxu1 %v6547_v11  ;;  %v6585_v31 = vld [vmem:[#allocation9 + $0x2c0] sm:$0xff]  ;;  %v6587_v37 = vld [vmem:[#allocation9 + $0x2c8] sm:$0xff]  ;;  %v6589_v51 = vld [vmem:[#allocation9 + $0x2d0] sm:$0xff] }
 0x737   :  { %v2846_v16 = vmul.f32 %v2824_v50, %v6398_v12  ;;  %v2834_v29 = vmul.f32 %v4486_v9, %v2833_v36  ;;  %v6497_v12 = vld [vmem:[#allocation9 + $0x3f0] sm:$0xff]  ;;  %3203 = vmatpush.msrb.mxu3 %v6565_v18  ;;  %v2288_v22 = vadd.f32 %v7464_v30, %v6382_v47  ;;  %v6621_v30 = vld [vmem:[#allocation9 + $0x268] sm:$0xff] }
 0x738   :  { %3176 = vmatpush.msra.mxu2 %v6497_v12  ;;  %3143 = vmatpush.msra.mxu0 %v6557_v14  ;;  %7467 = vst [vmem:[#allocation32_spill] sm:$0xff] %v6621_v30  ;;  %v6645_v47 = vld [vmem:[#allocation9 + $0x228] sm:$0xff] }
 0x739   :  { %v6488_v24 = vadd.f32 %v2847_v8, %v2846_v16  ;;  %v2835_v57 = vadd.f32 %v4486_v9, %v2834_v29  ;;  %3163 = vmatpush.msra.mxu1 %v6559_v23  ;;  %3204 = vmatpush.msrb.mxu3 %v6581_v20  ;;  %v6593_v8 = vld [vmem:[#allocation9 + $0x2d8] sm:$0xff]  ;;  %v6597_v16 = vld [vmem:[#allocation9 + $0x2a0] sm:$0xff]  ;;  %v6599_v29 = vld [vmem:[#allocation9 + $0x2a8] sm:$0xff] }
 0x73a   :  { %3177 = vmatpush.msra.mxu2 %v6500_v7  ;;  %3144 = vmatpush.msra.mxu0 %v6569_v54 }
 0x73b   :  { %4489 = vtanh.f32 %v6488_v24  ;;  %v2839_v4 = vsel %vm2838_vm6, %v4486_v9, %v2835_v57  ;;  %v7463_v9 = vld [vmem:[#allocation31_spill] sm:$0xff]  ;;  %3164 = vmatpush.msra.mxu1 %v6571_v48  ;;  %3205 = vmatpush.msrb.mxu3 %v6593_v8 }
 0x73c   :  { %v2844_v62 = vsel %vm2841_vm7, %v2843_v53, %v2839_v4  ;;  %3178 = vmatpush.msra.mxu2 %v6503_v45  ;;  %v2247_v15 = vadd.f32 %v7463_v9, %v6380_v44  ;;  %3145 = vmatpush.msra.mxu0 %v6585_v31  ;;  %v6601_v57 = vld [vmem:[#allocation9 + $0x2b0] sm:$0xff]  ;;  %v6605_v4 = vld [vmem:[#allocation9 + $0x2b8] sm:$0xff]  ;;  %v6609_v53 = vld [vmem:[#allocation9 + $0x280] sm:$0xff] }
 0x73d   :  { %3165 = vmatpush.msra.mxu1 %v6587_v37  ;;  %3206 = vmatpush.msrb.mxu3 %v6605_v4  ;;  %v6617_v9 = vld [vmem:[#allocation9 + $0x298] sm:$0xff]  ;;  %v6649_v44 = vld [vmem:[#allocation9 + $0x230] sm:$0xff] }
 0x73e   :  { %3179 = vmatpush.msra.mxu2 %v6513_v60  ;;  %3146 = vmatpush.msra.mxu0 %v6597_v16  ;;  %7465 = vst [vmem:[#allocation18_spill] sm:$0xff] %v6617_v9 }
 0x73f   :  { %3166 = vmatpush.msra.mxu1 %v6599_v29  ;;  %3207 = vmatpush.msrb.mxu3 %v6617_v9 }
 0x740   :  { %3180 = vmatpush.msra.mxu2 %v6525_v42  ;;  %3147 = vmatpush.msra.mxu0 %v6609_v53 }
 0x741   :  { %v4490_v39 = vpop.eup %4489 }
 0x742   :  { %v6491_v40 = vmul.f32 %v4490_v39, %v2844_v62  ;;  %3181 = vmatpush.msra.mxu2 %v6537_v3  ;;  %v6611_v39 = vld [vmem:[#allocation9 + $0x288] sm:$0xff]  ;;  %v6613_v62 = vld [vmem:[#allocation9 + $0x290] sm:$0xff] }
 0x743   :  { %3167 = vmatpush.msra.mxu1 %v6611_v39 }
 0x744   :  { %7457 = vst [vmem:[#allocation38_spill] sm:$0xff] %v6491_v40  ;;  %2936 = vmatmul.f32.vlgmr.msrb.gmra.mxu0 %v6491_v40  ;;  %2956 = vmatmul.f32.vlgmr.msrb.gmra.mxu1 %v6491_v40 }
 0x745   :  { %2976 = vmatmul.f32.vlgmr.msrb.gmra.mxu2 %v6491_v40  ;;  %2996 = vmatmul.f32.vlgmr.msra.gmra.mxu3 %v6491_v40  ;;  %v6635_v40 = vld [vmem:[#allocation9 + $0x248] sm:$0xff] }
 0x746   :  { %3182 = vmatpush.msra.mxu2 %v6549_v38  ;;  %3168 = vmatpush.msra.mxu1 %v6621_v30  ;;  %7472 = vst [vmem:[#allocation56_spill] sm:$0xff] %v6635_v40  ;;  %v6651_v30 = vld [vmem:[#allocation9 + $0x238] sm:$0xff] }
 0x748   :  { %3183 = vmatpush.msra.mxu2 %v6561_v52  ;;  %3169 = vmatpush.msra.mxu1 %v6635_v40  ;;  %v6663_v40 = vld [vmem:[#allocation9 + $0x218] sm:$0xff] }
 0x74a   :  { %3184 = vmatpush.msra.mxu2 %v6573_v43  ;;  %3170 = vmatpush.msra.mxu1 %v6645_v47 }
 0x74c   :  { %3185 = vmatpush.msra.mxu2 %v6589_v51 }
 0x74e   :  { %3186 = vmatpush.msra.mxu2 %v6601_v57 }
 0x750   :  { %3187 = vmatpush.msra.mxu2 %v6613_v62 }
 0x7c1   :  { %v2937_v33 = vpop.f32.mrf.mxu0  ;;  %v2957_v21 = vpop.f32.mrf.mxu1 }
 0x7c2   :  { %v3000_v36 = vadd.f32 %v2937_v33, %v2247_v15  ;;  %v3001_v50 = vadd.f32 %v2957_v21, %v2288_v22  ;;  %v6619_v15 = vld [vmem:[#allocation9 + $0x260] sm:$0xff]  ;;  %v6627_v21 = vld [vmem:[#allocation9 + $0x270] sm:$0xff] }
 0x7c3   :  { %7466 = vst [vmem:[#allocation24_spill] sm:$0xff] %v6619_v15  ;;  %v7468_v22 = vld [vmem:[#allocation25_spill] sm:$0xff]  ;;  %3148 = vmatpush.msra.mxu0 %v6619_v15  ;;  %3188 = vmatpush.msra.mxu2 %v6627_v21 }
 0x7c4   :  { %v4283_v46 = vmul.f32 -1.442695, %v3000_v36  ;;  %v4284_v17 = vmul.f32 -1.442695, %v3001_v50  ;;  %v2370_v33 = vadd.f32 %v7468_v22, %v6390_v2  ;;  %7469 = vst [vmem:[#allocation31_spill] sm:$0xff] %v6627_v21  ;;  %v6629_v36 = vld [vmem:[#allocation9 + $0x278] sm:$0xff] }
 0x7c5   :  { %7470 = vst [vmem:[#allocation19_spill] sm:$0xff] %v6629_v36  ;;  %v6631_v50 = vld [vmem:[#allocation9 + $0x240] sm:$0xff]  ;;  %3208 = vmatpush.msrb.mxu3 %v6629_v36  ;;  %3189 = vmatpush.msra.mxu2 %v6637_v0 }
 0x7c6   :  { %4491 = vpow2.f32 %v4283_v46  ;;  %7471 = vst [vmem:[#allocation25_spill] sm:$0xff] %v6631_v50  ;;  %v6643_v2 = vld [vmem:[#allocation9 + $0x220] sm:$0xff]  ;;  %3149 = vmatpush.msra.mxu0 %v6631_v50  ;;  %v6661_v50 = vld [vmem:[#allocation9 + $0x210] sm:$0xff] }
 0x7c7   :  { %4493 = vpow2.f32 %v4284_v17  ;;  %v6639_v17 = vld [vmem:[#allocation9 + $0x258] sm:$0xff]  ;;  %7473 = vst [vmem:[#allocation57_spill] sm:$0xff] %v6661_v50  ;;  %3190 = vmatpush.msra.mxu2 %v6649_v44 }
 0x7c8   :  { %v2997_v46 = vpop.f32.mrf.mxu3  ;;  %3209 = vmatpush.msrb.mxu3 %v6639_v17  ;;  %3150 = vmatpush.msra.mxu0 %v6643_v2 }
 0x7c9   :  { %v3003_v22 = vadd.f32 %v2997_v46, %v2370_v33  ;;  %v6655_v33 = vld [vmem:[#allocation9 + $0x200] sm:$0xff]  ;;  %v6657_v46 = vld [vmem:[#allocation9 + $0x208] sm:$0xff]  ;;  %3191 = vmatpush.msra.mxu2 %v6661_v50 }
 0x7ca   :  { %3210 = vmatpush.msrb.mxu3 %v6651_v30  ;;  %3151 = vmatpush.msra.mxu0 %v6655_v33 }
 0x7cb   :  { %v4285_v15 = vmul.f32 -1.442695, %v3003_v22  ;;  %3171 = vmatpush.msra.mxu1 %v6657_v46  ;;  %3392 = vmatpush.msrb.mxu2 %v6497_v12 }
 0x7cc   :  { %v4492_v36 = vpop.eup %4491  ;;  %3211 = vmatpush.msrb.mxu3 %v6663_v40  ;;  %3352 = vmatpush.msrb.mxu0 %v6407_v55 }
 0x7cd   :  { %v4494_v21 = vpop.eup %4493  ;;  %v6665_v9 = vadd.f32 1.0, %v4492_v36  ;;  %4495 = vpow2.f32 %v4285_v15  ;;  %3372 = vmatpush.msrb.mxu1 %v6409_v19  ;;  %v2977_v15 = vpop.f32.mrf.mxu2  ;;  %v7474_v36 = vld [vmem:[#allocation34_spill] sm:$0xff]  ;;  %3393 = vmatpush.msrb.mxu2 %v6500_v7 }
 0x7ce   :  { %v6669_v22 = vadd.f32 1.0, %v4494_v21  ;;  %3412 = vmatpush.msra.mxu3 %v6411_v59  ;;  %3353 = vmatpush.msrb.mxu0 %v6416_v41  ;;  %v2329_v50 = vadd.f32 %v7474_v36, %v7455_v27 }
 0x7cf   :  { %4497 = vrcp.f32 %v6665_v9  ;;  %3373 = vmatpush.msrb.mxu1 %v6418_v34  ;;  %3394 = vmatpush.msrb.mxu2 %v6503_v45  ;;  %v3017_v36 = vand.u32 2147483647, %v6665_v9  ;;  %vm3013_vm10 = vweird.f32 %v6665_v9 }
 0x7d0   :  { %4499 = vrcp.f32 %v6669_v22  ;;  %3413 = vmatpush.msra.mxu3 %v6420_v35  ;;  %3354 = vmatpush.msrb.mxu0 %v6425_v56  ;;  %v3002_v59 = vadd.f32 %v2977_v15, %v2329_v50  ;;  %v3019_v50 = vand.u32 2147483648, %v6665_v9  ;;  %v3038_v15 = vand.u32 2147483648, %v6669_v22 }
 0x7d1   :  { %3374 = vmatpush.msrb.mxu1 %v6427_v26  ;;  %3395 = vmatpush.msrb.mxu2 %v6513_v60  ;;  %vm3032_vm11 = vweird.f32 %v6669_v22  ;;  %vm3018_vm14 = vcmp.eq.f32.partialorder %v3017_v36, 8.507059e+37  ;;  %v7477_v36 = vld [vmem:[#allocation32_spill] sm:$0xff] }
 0x7d2   :  { %3414 = vmatpush.msra.mxu3 %v6505_v32  ;;  %3355 = vmatpush.msrb.mxu0 %v6509_v28 }
 0x7d3   :  { %v4496_v21 = vpop.eup %4495  ;;  %3375 = vmatpush.msrb.mxu1 %v6511_v49  ;;  %3396 = vmatpush.msrb.mxu2 %v6525_v42 }
 0x7d4   :  { %v6687_v55 = vadd.f32 1.0, %v4496_v21  ;;  %3415 = vmatpush.msra.mxu3 %v6517_v61  ;;  %3356 = vmatpush.msrb.mxu0 %v6521_v5 }
 0x7d5   :  { %v4498_v19 = vpop.eup %4497  ;;  %3376 = vmatpush.msrb.mxu1 %v6523_v6  ;;  %3397 = vmatpush.msrb.mxu2 %v6537_v3 }
 0x7d6   :  { %v4500_v41 = vpop.eup %4499  ;;  %v3009_v34 = vmul.f32 %v4498_v19, %v6665_v9  ;;  %4501 = vrcp.f32 %v6687_v55  ;;  %3416 = vmatpush.msra.mxu3 %v6529_v63  ;;  %vm3014_vm8 = vweird.f32 %v4498_v19  ;;  %3357 = vmatpush.msrb.mxu0 %v6533_v58  ;;  %v3039_v9 = vor.u32 1.1754944e-38, %v3038_v15  ;;  %v7476_v15 = vld [vmem:[#allocation24_spill] sm:$0xff] }
 0x7d7   :  { %v3028_v35 = vmul.f32 %v4500_v41, %v6669_v22  ;;  %4503 = vtanh.f32 %v3002_v59  ;;  %3377 = vmatpush.msrb.mxu1 %v6535_v10  ;;  %vm3033_vm9 = vweird.f32 %v4500_v41  ;;  %vm3015_vm12 = vmor %vm3013_vm10, %vm3014_vm8  ;;  %3398 = vmatpush.msrb.mxu2 %v6549_v38  ;;  %vm3052_vm1 = vweird.f32 %v6687_v55 }
 0x7d8   :  { %v3010_v56 = vsub.f32 1.0, %v3009_v34  ;;  %3417 = vmatpush.msra.mxu3 %v6541_v1  ;;  %3358 = vmatpush.msrb.mxu0 %v6545_v13  ;;  %vm3034_vm13 = vmor %vm3032_vm11, %vm3033_vm9 }
 0x7d9   :  { %v3029_v26 = vsub.f32 1.0, %v3028_v35  ;;  %v3036_v35 = vand.u32 2147483647, %v6669_v22  ;;  %3378 = vmatpush.msrb.mxu1 %v6547_v11  ;;  %3399 = vmatpush.msrb.mxu2 %v6561_v52 }
 0x7da   :  { %v3011_v21 = vmul.f32 %v4498_v19, %v3010_v56  ;;  %v3020_v56 = vor.u32 1.1754944e-38, %v3019_v50  ;;  %3418 = vmatpush.msra.mxu3 %v6553_v25  ;;  %3359 = vmatpush.msrb.mxu0 %v6557_v14 }
 0x7db   :  { %v3030_v34 = vmul.f32 %v4500_v41, %v3029_v26  ;;  %3379 = vmatpush.msrb.mxu1 %v6559_v23  ;;  %vm3037_vm15 = vcmp.eq.f32.partialorder %v3036_v35, 8.507059e+37  ;;  %3400 = vmatpush.msrb.mxu2 %v6573_v43 }
 0x7dc   :  { %v6712_v59 = vpop.eup %4501  ;;  %v3012_v63 = vadd.f32 %v4498_v19, %v3011_v21  ;;  %3419 = vmatpush.msra.mxu3 %v6565_v18  ;;  %3360 = vmatpush.msrb.mxu0 %v6569_v54 }
 0x7dd   :  { %v3031_v26 = vadd.f32 %v4500_v41, %v3030_v34  ;;  %v3048_v10 = vmul.f32 %v6712_v59, %v6687_v55  ;;  %v4504_v22 = vpop.eup %4503  ;;  %3380 = vmatpush.msrb.mxu1 %v6571_v48  ;;  %3401 = vmatpush.msrb.mxu2 %v6589_v51  ;;  %vm3053_vm0 = vweird.f32 %v6712_v59 }
 0x7de   :  { %v3016_v21 = vsel %vm3015_vm12, %v4498_v19, %v3012_v63  ;;  %3420 = vmatpush.msra.mxu3 %v6581_v20  ;;  %3361 = vmatpush.msrb.mxu0 %v6585_v31  ;;  %vm3054_vm2 = vmor %vm3052_vm1, %vm3053_vm0 }
 0x7df   :  { %v3021_v11 = vsel %vm3018_vm14, %v3020_v56, %v3016_v21  ;;  %v3035_v50 = vsel %vm3034_vm13, %v4500_v41, %v3031_v26  ;;  %v3049_v34 = vsub.f32 1.0, %v3048_v10  ;;  %3381 = vmatpush.msrb.mxu1 %v6587_v37  ;;  %3402 = vmatpush.msrb.mxu2 %v6601_v57  ;;  %v7478_v56 = vld [vmem:[#allocation31_spill] sm:$0xff] }
 0x7e0   :  { %v3040_v13 = vsel %vm3037_vm15, %v3039_v9, %v3035_v50  ;;  %v3063_v25 = vmul.f32 %v4504_v22, %v3021_v11  ;;  %3421 = vmatpush.msra.mxu3 %v6593_v8  ;;  %3362 = vmatpush.msrb.mxu0 %v6597_v16  ;;  %v3056_v11 = vand.u32 2147483647, %v6687_v55  ;;  %v7479_v26 = vld [vmem:[#allocation19_spill] sm:$0xff]  ;;  %v7481_v9 = vld [vmem:[#allocation56_spill] sm:$0xff]  ;;  %v7483_v50 = vld [vmem:[#allocation57_spill] sm:$0xff] }
 0x7e1   :  { %v3062_v63 = vmul.f32 %v3040_v13, %v6488_v24  ;;  %v3050_v19 = vmul.f32 %v6712_v59, %v3049_v34  ;;  %3382 = vmatpush.msrb.mxu1 %v6599_v29  ;;  %v3058_v13 = vand.u32 2147483648, %v6687_v55  ;;  %3403 = vmatpush.msrb.mxu2 %v6613_v62  ;;  %v7480_v55 = vld [vmem:[#allocation25_spill] sm:$0xff]  ;;  %v7488_v34 = vld [vmem:[#allocation52_spill] sm:$0xff] }
 0x7e2   :  { %3422 = vmatpush.msra.mxu3 %v6605_v4  ;;  %3363 = vmatpush.msrb.mxu0 %v6609_v53  ;;  %vm3057_vm3 = vcmp.eq.f32.partialorder %v3056_v11, 8.507059e+37 }
 0x7e3   :  { %v6736_v10 = vadd.f32 %v3063_v25, %v3062_v63  ;;  %v3051_v24 = vadd.f32 %v6712_v59, %v3050_v19  ;;  %3383 = vmatpush.msrb.mxu1 %v6611_v39  ;;  %v7475_v25 = vld [vmem:[#allocation18_spill] sm:$0xff]  ;;  %v3059_v35 = vor.u32 1.1754944e-38, %v3058_v13  ;;  %3404 = vmatpush.msrb.mxu2 %v7478_v56  ;;  %v7489_v63 = vld [vmem:[#allocation29_spill] sm:$0xff] }
 0x7e4   :  { %3423 = vmatpush.msra.mxu3 %v7475_v25  ;;  %3364 = vmatpush.msrb.mxu0 %v7476_v15 }
 0x7e5   :  { %4505 = vtanh.f32 %v6736_v10  ;;  %v3055_v41 = vsel %vm3054_vm2, %v6712_v59, %v3051_v24  ;;  %3384 = vmatpush.msrb.mxu1 %v7477_v36  ;;  %3405 = vmatpush.msrb.mxu2 %v6637_v0 }
 0x7e6   :  { %3424 = vmatpush.msra.mxu3 %v7479_v26  ;;  %3365 = vmatpush.msrb.mxu0 %v7480_v55  ;;  %v3060_v22 = vsel %vm3057_vm3, %v3059_v35, %v3055_v41 }
 0x7e7   :  { %3385 = vmatpush.msrb.mxu1 %v7481_v9  ;;  %3406 = vmatpush.msrb.mxu2 %v6649_v44 }
 0x7e8   :  { %3425 = vmatpush.msra.mxu3 %v6639_v17  ;;  %3366 = vmatpush.msrb.mxu0 %v6643_v2 }
 0x7e9   :  { %3386 = vmatpush.msrb.mxu1 %v6645_v47  ;;  %3407 = vmatpush.msrb.mxu2 %v7483_v50 }
 0x7ea   :  { %3426 = vmatpush.msra.mxu3 %v6651_v30  ;;  %3367 = vmatpush.msrb.mxu0 %v6655_v33 }
 0x7eb   :  { %v4506_v21 = vpop.eup %4505  ;;  %3387 = vmatpush.msrb.mxu1 %v6657_v46 }
 0x7ec   :  { %v6763_v59 = vmul.f32 %v4506_v21, %v3060_v22  ;;  %3427 = vmatpush.msra.mxu3 %v6663_v40  ;;  %v7490_v22 = vld [vmem:[#allocation43_spill] sm:$0xff] }
 0x7ee   :  { %7482 = vst [vmem:[#allocation34_spill] sm:$0xff] %v6763_v59  ;;  %3152 = vmatmul.f32.vlgmr.msra.gmra.mxu0 %v6763_v59  ;;  %3172 = vmatmul.f32.vlgmr.msra.gmra.mxu1 %v6763_v59 }
 0x7ef   :  { %3192 = vmatmul.f32.vlgmr.msra.gmra.mxu2 %v6763_v59  ;;  %3212 = vmatmul.f32.vlgmr.msrb.gmra.mxu3 %v6763_v59 }
 0x7f0   :  { %3608 = vmatpush.msra.mxu2 %v6497_v12  ;;  %v7484_v12 = vld [vmem:[#allocation48_spill] sm:$0xff] }
 0x7f2   :  { %3609 = vmatpush.msra.mxu2 %v6500_v7  ;;  %v7485_v7 = vld [vmem:[#allocation35_spill] sm:$0xff] }
 0x7f4   :  { %3610 = vmatpush.msra.mxu2 %v6503_v45  ;;  %v2250_v45 = vadd.f32 %v7485_v7, %v7484_v12 }
 0x7f6   :  { %3611 = vmatpush.msra.mxu2 %v6513_v60  ;;  %v7486_v60 = vld [vmem:[#allocation49_spill] sm:$0xff] }
 0x7f8   :  { %3612 = vmatpush.msra.mxu2 %v6525_v42  ;;  %v7487_v42 = vld [vmem:[#allocation20_spill] sm:$0xff] }
 0x7fa   :  { %3613 = vmatpush.msra.mxu2 %v6537_v3  ;;  %v2291_v3 = vadd.f32 %v7487_v42, %v7486_v60 }
 0x7fc   :  { %3614 = vmatpush.msra.mxu2 %v6549_v38 }
 0x7fe   :  { %3615 = vmatpush.msra.mxu2 %v6561_v52 }
 0x800   :  { %3616 = vmatpush.msra.mxu2 %v6573_v43 }
 0x802   :  { %3617 = vmatpush.msra.mxu2 %v6589_v51 }
 0x804   :  { %3618 = vmatpush.msra.mxu2 %v6601_v57 }
 0x806   :  { %3619 = vmatpush.msra.mxu2 %v6613_v62 }
 0x808   :  { %3620 = vmatpush.msra.mxu2 %v7478_v56 }
 0x80a   :  { %3621 = vmatpush.msra.mxu2 %v6637_v0  ;;  %v2373_v0 = vadd.f32 %v7489_v63, %v7488_v34 }
 0x80c   :  { %3622 = vmatpush.msra.mxu2 %v6649_v44 }
 0x80e   :  { %3623 = vmatpush.msra.mxu2 %v7483_v50  ;;  %v2332_v50 = vadd.f32 %v7490_v22, %v7455_v27 }
 0x86b   :  { %v3153_v38 = vpop.f32.mrf.mxu0  ;;  %v3173_v52 = vpop.f32.mrf.mxu1 }
 0x86c   :  { %v3216_v43 = vadd.f32 %v3153_v38, %v2250_v45  ;;  %v3217_v51 = vadd.f32 %v3173_v52, %v2291_v3 }
 0x86e   :  { %v4286_v57 = vmul.f32 -1.442695, %v3216_v43  ;;  %v4287_v62 = vmul.f32 -1.442695, %v3217_v51 }
 0x870   :  { %4507 = vpow2.f32 %v4286_v57 }
 0x871   :  { %4509 = vpow2.f32 %v4287_v62 }
 0x872   :  { %v3213_v44 = vpop.f32.mrf.mxu3  ;;  %v3193_v56 = vpop.f32.mrf.mxu2 }
 0x873   :  { %v3219_v19 = vadd.f32 %v3213_v44, %v2373_v0  ;;  %v3218_v42 = vadd.f32 %v3193_v56, %v2332_v50 }
 0x875   :  { %v4288_v24 = vmul.f32 -1.442695, %v3219_v19 }
 0x876   :  { %v4508_v13 = vpop.eup %4507 }
 0x877   :  { %v4510_v11 = vpop.eup %4509  ;;  %v3223_v41 = vadd.f32 1.0, %v4508_v13  ;;  %4511 = vpow2.f32 %v4288_v24 }
 0x878   :  { %v3242_v35 = vadd.f32 1.0, %v4510_v11 }
 0x879   :  { %4513 = vrcp.f32 %v3223_v41  ;;  %v3235_v57 = vand.u32 2147483648, %v3223_v41  ;;  %v3233_v0 = vand.u32 2147483647, %v3223_v41  ;;  %vm3229_vm6 = vweird.f32 %v3223_v41 }
 0x87a   :  { %4515 = vrcp.f32 %v3242_v35  ;;  %v3254_v62 = vand.u32 2147483648, %v3242_v35  ;;  %v3252_v19 = vand.u32 2147483647, %v3242_v35  ;;  %vm3248_vm7 = vweird.f32 %v3242_v35 }
 0x87b   :  { %v3236_v11 = vor.u32 1.1754944e-38, %v3235_v57  ;;  %vm3234_vm10 = vcmp.eq.f32.partialorder %v3233_v0, 8.507059e+37 }
 0x87c   :  { %v3255_v22 = vor.u32 1.1754944e-38, %v3254_v62  ;;  %vm3253_vm11 = vcmp.eq.f32.partialorder %v3252_v19, 8.507059e+37 }
 0x87d   :  { %v4512_v21 = vpop.eup %4511 }
 0x87e   :  { %v3262_v7 = vadd.f32 1.0, %v4512_v21 }
 0x87f   :  { %v4514_v45 = vpop.eup %4513 }
 0x880   :  { %v4516_v3 = vpop.eup %4515  ;;  %v3225_v38 = vmul.f32 %v4514_v45, %v3223_v41  ;;  %4517 = vrcp.f32 %v3262_v7  ;;  %vm3230_vm4 = vweird.f32 %v4514_v45  ;;  %v3274_v57 = vand.u32 2147483648, %v3262_v7 }
 0x881   :  { %v3244_v52 = vmul.f32 %v4516_v3, %v3242_v35  ;;  %4519 = vtanh.f32 %v3218_v42  ;;  %vm3249_vm5 = vweird.f32 %v4516_v3  ;;  %vm3231_vm8 = vmor %vm3229_vm6, %vm3230_vm4  ;;  %vm3268_vm13 = vweird.f32 %v3262_v7 }
 0x882   :  { %v3226_v43 = vsub.f32 1.0, %v3225_v38  ;;  %vm3250_vm9 = vmor %vm3248_vm7, %vm3249_vm5  ;;  %v3275_v0 = vor.u32 1.1754944e-38, %v3274_v57 }
 0x883   :  { %v3245_v51 = vsub.f32 1.0, %v3244_v52 }
 0x884   :  { %v3227_v63 = vmul.f32 %v4514_v45, %v3226_v43 }
 0x885   :  { %v3246_v44 = vmul.f32 %v4516_v3, %v3245_v51 }
 0x886   :  { %v4518_v24 = vpop.eup %4517  ;;  %v3228_v13 = vadd.f32 %v4514_v45, %v3227_v63 }
 0x887   :  { %v3247_v56 = vadd.f32 %v4516_v3, %v3246_v44  ;;  %v3264_v21 = vmul.f32 %v4518_v24, %v3262_v7  ;;  %v4520_v42 = vpop.eup %4519  ;;  %vm3269_vm12 = vweird.f32 %v4518_v24 }
 0x888   :  { %v3232_v50 = vsel %vm3231_vm8, %v4514_v45, %v3228_v13  ;;  %v3272_v45 = vand.u32 2147483647, %v3262_v7  ;;  %vm3270_vm14 = vmor %vm3268_vm13, %vm3269_vm12  ;;  %v6820_v7 = vld [vmem:[#allocation9 + $0x3c0] sm:$0xff]  ;;  %v6824_v13 = vld [vmem:[#allocation9 + $0x3d8] sm:$0xff] }
 0x889   :  { %v3237_v38 = vsel %vm3234_vm10, %v3236_v11, %v3232_v50  ;;  %v3251_v52 = vsel %vm3250_vm9, %v4516_v3, %v3247_v56  ;;  %v3265_v43 = vsub.f32 1.0, %v3264_v21  ;;  %v6829_v11 = vld [vmem:[#allocation9 + $0x3a0] sm:$0xff]  ;;  %v6831_v56 = vld [vmem:[#allocation9 + $0x3a8] sm:$0xff]  ;;  %v7494_v50 = vld [vmem:[#allocation23_spill] sm:$0xff] }
 0x88a   :  { %v3256_v51 = vsel %vm3253_vm11, %v3255_v22, %v3251_v52  ;;  %v3279_v59 = vmul.f32 %v4520_v42, %v3237_v38  ;;  %vm3273_vm15 = vcmp.eq.f32.partialorder %v3272_v45, 8.507059e+37  ;;  %v7492_v21 = vld [vmem:[#allocation41_spill] sm:$0xff]  ;;  %v7493_v22 = vld [vmem:[#allocation36_spill] sm:$0xff] }
 0x88b   :  { %v3278_v27 = vmul.f32 %v3256_v51, %v6736_v10  ;;  %v3266_v63 = vmul.f32 %v4518_v24, %v3265_v43  ;;  %v6813_v10 = vld [vmem:[#allocation9 + $0x3e8] sm:$0xff] }
 0x88c   :  { %3588 = vmatpush.msra.mxu1 %v6813_v10 }
 0x88d   :  { %v6802_v41 = vadd.f32 %v3279_v59, %v3278_v27  ;;  %v3267_v35 = vadd.f32 %v4518_v24, %v3266_v63  ;;  %v6811_v27 = vld [vmem:[#allocation9 + $0x3e0] sm:$0xff]  ;;  %v6815_v59 = vld [vmem:[#allocation9 + $0x3f8] sm:$0xff] }
 0x88e   :  { %3568 = vmatpush.msra.mxu0 %v6811_v27  ;;  %3628 = vmatpush.msrb.mxu3 %v6815_v59 }
 0x88f   :  { %4521 = vtanh.f32 %v6802_v41  ;;  %v3271_v62 = vsel %vm3270_vm14, %v4518_v24, %v3267_v35  ;;  %v6822_v24 = vld [vmem:[#allocation9 + $0x3c8] sm:$0xff] }
 0x890   :  { %v3276_v44 = vsel %vm3273_vm15, %v3275_v0, %v3271_v62  ;;  %3569 = vmatpush.msra.mxu0 %v6820_v7  ;;  %3589 = vmatpush.msra.mxu1 %v6822_v24 }
 0x891   :  { %3629 = vmatpush.msrb.mxu3 %v6824_v13 }
 0x892   :  { %3570 = vmatpush.msra.mxu0 %v6829_v11  ;;  %3590 = vmatpush.msra.mxu1 %v6831_v56 }
 0x893   :  { %3630 = vmatpush.msrb.mxu3 %v6505_v32  ;;  %v7495_v32 = vld [vmem:[#allocation28_spill] sm:$0xff] }
 0x894   :  { %3571 = vmatpush.msra.mxu0 %v6509_v28  ;;  %3591 = vmatpush.msra.mxu1 %v6511_v49  ;;  %v7496_v28 = vld [vmem:[#allocation27_spill] sm:$0xff] }
 0x895   :  { %v4522_v3 = vpop.eup %4521  ;;  %3631 = vmatpush.msrb.mxu3 %v6517_v61  ;;  %v7497_v49 = vld [vmem:[#allocation39_spill] sm:$0xff] }
 0x896   :  { %v6805_v19 = vmul.f32 %v4522_v3, %v3276_v44  ;;  %3572 = vmatpush.msra.mxu0 %v6521_v5  ;;  %3592 = vmatpush.msra.mxu1 %v6523_v6  ;;  %v2253_v61 = vadd.f32 %v7497_v49, %v7484_v12  ;;  %v7498_v5 = vld [vmem:[#allocation42_spill] sm:$0xff] }
 0x897   :  { %3632 = vmatpush.msrb.mxu3 %v7492_v21  ;;  %v2294_v6 = vadd.f32 %v7498_v5, %v7486_v60 }
 0x898   :  { %7491 = vst [vmem:[#allocation18_spill] sm:$0xff] %v6805_v19  ;;  %3368 = vmatmul.f32.vlgmr.msrb.gmra.mxu0 %v6805_v19  ;;  %3388 = vmatmul.f32.vlgmr.msrb.gmra.mxu1 %v6805_v19 }
 0x899   :  { %3408 = vmatmul.f32.vlgmr.msrb.gmra.mxu2 %v6805_v19  ;;  %3428 = vmatmul.f32.vlgmr.msra.gmra.mxu3 %v6805_v19  ;;  %v7041_v19 = vld [vmem:[#allocation9 + $0x250] sm:$0xff] }
 0x89a   :  { %3573 = vmatpush.msra.mxu0 %v6533_v58  ;;  %3593 = vmatpush.msra.mxu1 %v7493_v22 }
 0x89b   :  { %3633 = vmatpush.msrb.mxu3 %v6541_v1 }
 0x89c   :  { %3574 = vmatpush.msra.mxu0 %v7494_v50  ;;  %3594 = vmatpush.msra.mxu1 %v7495_v32 }
 0x89d   :  { %3634 = vmatpush.msrb.mxu3 %v7496_v28 }
 0x89e   :  { %3575 = vmatpush.msra.mxu0 %v6557_v14  ;;  %3595 = vmatpush.msra.mxu1 %v6559_v23 }
 0x89f   :  { %3635 = vmatpush.msrb.mxu3 %v6565_v18 }
 0x8a0   :  { %3576 = vmatpush.msra.mxu0 %v6569_v54  ;;  %3596 = vmatpush.msra.mxu1 %v6571_v48  ;;  %v7499_v54 = vld [vmem:[#allocation22_spill] sm:$0xff] }
 0x8a1   :  { %3636 = vmatpush.msrb.mxu3 %v6581_v20  ;;  %v2376_v48 = vadd.f32 %v7499_v54, %v7488_v34 }
 0x8a2   :  { %3577 = vmatpush.msra.mxu0 %v6585_v31  ;;  %3597 = vmatpush.msra.mxu1 %v6587_v37 }
 0x8a3   :  { %3637 = vmatpush.msrb.mxu3 %v6593_v8 }
 0x8a4   :  { %3578 = vmatpush.msra.mxu0 %v6597_v16  ;;  %3598 = vmatpush.msra.mxu1 %v6599_v29 }
 0x8a5   :  { %3638 = vmatpush.msrb.mxu3 %v6605_v4 }
 0x8a6   :  { %3579 = vmatpush.msra.mxu0 %v6609_v53  ;;  %3599 = vmatpush.msra.mxu1 %v6611_v39  ;;  %v7500_v53 = vld [vmem:[#allocation54_spill] sm:$0xff]  ;;  %v7501_v39 = vld [vmem:[#allocation40_spill] sm:$0xff] }
 0x8a7   :  { %3639 = vmatpush.msrb.mxu3 %v7475_v25 }
 0x8a8   :  { %3580 = vmatpush.msra.mxu0 %v7476_v15  ;;  %3600 = vmatpush.msra.mxu1 %v7477_v36 }
 0x8a9   :  { %3640 = vmatpush.msrb.mxu3 %v7479_v26 }
 0x8aa   :  { %3581 = vmatpush.msra.mxu0 %v7480_v55  ;;  %3601 = vmatpush.msra.mxu1 %v7481_v9 }
 0x8ab   :  { %3641 = vmatpush.msrb.mxu3 %v6639_v17 }
 0x8ac   :  { %3582 = vmatpush.msra.mxu0 %v6643_v2  ;;  %3602 = vmatpush.msra.mxu1 %v6645_v47 }
 0x8ad   :  { %3642 = vmatpush.msrb.mxu3 %v6651_v30  ;;  %v2335_v30 = vadd.f32 %v7501_v39, %v7500_v53  ;;  %v6933_v39 = vld [vmem:[#allocation9 + $0x378] sm:$0xff] }
 0x8ae   :  { %3583 = vmatpush.msra.mxu0 %v6655_v33  ;;  %3603 = vmatpush.msra.mxu1 %v6657_v46 }
 0x8af   :  { %3643 = vmatpush.msrb.mxu3 %v6663_v40 }
 0x8b0   :  { %3784 = vmatpush.msrb.mxu0 %v6811_v27  ;;  %3804 = vmatpush.msrb.mxu1 %v6813_v10 }
 0x8b1   :  { %3844 = vmatpush.msra.mxu3 %v6815_v59 }
 0x8b2   :  { %3785 = vmatpush.msrb.mxu0 %v6820_v7  ;;  %3805 = vmatpush.msrb.mxu1 %v6822_v24 }
 0x8b3   :  { %3845 = vmatpush.msra.mxu3 %v6824_v13 }
 0x8b4   :  { %3786 = vmatpush.msrb.mxu0 %v6829_v11  ;;  %3806 = vmatpush.msrb.mxu1 %v6831_v56 }
 0x915   :  { %v3369_v58 = vpop.f32.mrf.mxu0  ;;  %v3389_v1 = vpop.f32.mrf.mxu1 }
 0x916   :  { %v3432_v42 = vadd.f32 %v3369_v58, %v2253_v61  ;;  %v3433_v14 = vadd.f32 %v3389_v1, %v2294_v6 }
 0x918   :  { %v4289_v23 = vmul.f32 -1.442695, %v3432_v42  ;;  %v4290_v18 = vmul.f32 -1.442695, %v3433_v14 }
 0x91a   :  { %4523 = vpow2.f32 %v4289_v23 }
 0x91b   :  { %4525 = vpow2.f32 %v4290_v18 }
 0x91c   :  { %v3429_v20 = vpop.f32.mrf.mxu3  ;;  %v3409_v2 = vpop.f32.mrf.mxu2 }
 0x91d   :  { %v3435_v31 = vadd.f32 %v3429_v20, %v2376_v48  ;;  %v3434_v33 = vadd.f32 %v3409_v2, %v2335_v30  ;;  %v6904_v48 = vld [vmem:[#allocation9 + $0x3d0] sm:$0xff]  ;;  %v6927_v2 = vld [vmem:[#allocation9 + $0x368] sm:$0xff]  ;;  %v6937_v30 = vld [vmem:[#allocation9 + $0x340] sm:$0xff] }
 0x91e   :  { %v6907_v20 = vld [vmem:[#allocation9 + $0x3b0] sm:$0xff] }
 0x91f   :  { %v4291_v37 = vmul.f32 -1.442695, %v3435_v31  ;;  %v6909_v31 = vld [vmem:[#allocation9 + $0x3b8] sm:$0xff] }
 0x920   :  { %v4524_v8 = vpop.eup %4523  ;;  %3846 = vmatpush.msra.mxu3 %v6909_v31 }
 0x921   :  { %v4526_v16 = vpop.eup %4525  ;;  %v3439_v29 = vadd.f32 1.0, %v4524_v8  ;;  %4527 = vpow2.f32 %v4291_v37  ;;  %v6913_v37 = vld [vmem:[#allocation9 + $0x380] sm:$0xff]  ;;  %v6915_v8 = vld [vmem:[#allocation9 + $0x388] sm:$0xff] }
 0x922   :  { %v3458_v4 = vadd.f32 1.0, %v4526_v16  ;;  %v6917_v16 = vld [vmem:[#allocation9 + $0x390] sm:$0xff]  ;;  %3787 = vmatpush.msrb.mxu0 %v6913_v37  ;;  %3807 = vmatpush.msrb.mxu1 %v6915_v8 }
 0x923   :  { %4529 = vrcp.f32 %v3439_v29  ;;  %v3451_v55 = vand.u32 2147483648, %v3439_v29  ;;  %v3449_v52 = vand.u32 2147483647, %v3439_v29  ;;  %vm3445_vm2 = vweird.f32 %v3439_v29 }
 0x924   :  { %4531 = vrcp.f32 %v3458_v4  ;;  %v3470_v9 = vand.u32 2147483648, %v3458_v4  ;;  %v3468_v51 = vand.u32 2147483647, %v3458_v4  ;;  %vm3464_vm3 = vweird.f32 %v3458_v4  ;;  %3808 = vmatpush.msrb.mxu1 %v6927_v2 }
 0x925   :  { %v3452_v57 = vor.u32 1.1754944e-38, %v3451_v55  ;;  %vm3450_vm6 = vcmp.eq.f32.partialorder %v3449_v52, 8.507059e+37  ;;  %v6963_v55 = vld [vmem:[#allocation9 + $0x308] sm:$0xff]  ;;  %v6973_v52 = vld [vmem:[#allocation9 + $0x2e0] sm:$0xff] }
 0x926   :  { %v3471_v0 = vor.u32 1.1754944e-38, %v3470_v9  ;;  %vm3469_vm7 = vcmp.eq.f32.partialorder %v3468_v51, 8.507059e+37  ;;  %v6965_v9 = vld [vmem:[#allocation9 + $0x310] sm:$0xff] }
 0x927   :  { %v4528_v47 = vpop.eup %4527  ;;  %v6977_v51 = vld [vmem:[#allocation9 + $0x2f0] sm:$0xff] }
 0x928   :  { %v3478_v40 = vadd.f32 1.0, %v4528_v47  ;;  %v6929_v47 = vld [vmem:[#allocation9 + $0x370] sm:$0xff] }
 0x929   :  { %v4530_v17 = vpop.eup %4529 }
 0x92a   :  { %v4532_v46 = vpop.eup %4531  ;;  %v3441_v25 = vmul.f32 %v4530_v17, %v3439_v29  ;;  %4533 = vrcp.f32 %v3478_v40  ;;  %vm3446_vm0 = vweird.f32 %v4530_v17  ;;  %v3490_v58 = vand.u32 2147483648, %v3478_v40  ;;  %v6921_v29 = vld [vmem:[#allocation9 + $0x398] sm:$0xff] }
 0x92b   :  { %v3460_v15 = vmul.f32 %v4532_v46, %v3458_v4  ;;  %4535 = vtanh.f32 %v3434_v33  ;;  %vm3465_vm1 = vweird.f32 %v4532_v46  ;;  %vm3447_vm4 = vmor %vm3445_vm2, %vm3446_vm0  ;;  %vm3484_vm9 = vweird.f32 %v3478_v40  ;;  %3847 = vmatpush.msra.mxu3 %v6921_v29  ;;  %v6925_v4 = vld [vmem:[#allocation9 + $0x360] sm:$0xff]  ;;  %v6945_v33 = vld [vmem:[#allocation9 + $0x358] sm:$0xff] }
 0x92c   :  { %v3442_v36 = vsub.f32 1.0, %v3441_v25  ;;  %vm3466_vm5 = vmor %vm3464_vm3, %vm3465_vm1  ;;  %v3488_v1 = vand.u32 2147483647, %v3478_v40  ;;  %v3491_v14 = vor.u32 1.1754944e-38, %v3490_v58  ;;  %3788 = vmatpush.msrb.mxu0 %v6925_v4  ;;  %v6951_v25 = vld [vmem:[#allocation9 + $0x328] sm:$0xff] }
 0x92d   :  { %v3461_v26 = vsub.f32 1.0, %v3460_v15  ;;  %3848 = vmatpush.msra.mxu3 %v6933_v39  ;;  %v6953_v15 = vld [vmem:[#allocation9 + $0x330] sm:$0xff] }
 0x92e   :  { %v3443_v38 = vmul.f32 %v4530_v17, %v3442_v36  ;;  %vm3489_vm11 = vcmp.eq.f32.partialorder %v3488_v1, 8.507059e+37  ;;  %3789 = vmatpush.msrb.mxu0 %v6937_v30  ;;  %v6957_v36 = vld [vmem:[#allocation9 + $0x338] sm:$0xff] }
 0x92f   :  { %v3462_v43 = vmul.f32 %v4532_v46, %v3461_v26  ;;  %3849 = vmatpush.msra.mxu3 %v6945_v33  ;;  %v6961_v26 = vld [vmem:[#allocation9 + $0x300] sm:$0xff] }
 0x930   :  { %v4534_v63 = vpop.eup %4533  ;;  %v3444_v35 = vadd.f32 %v4530_v17, %v3443_v38  ;;  %v6969_v38 = vld [vmem:[#allocation9 + $0x318] sm:$0xff] }
 0x931   :  { %v3463_v45 = vadd.f32 %v4532_v46, %v3462_v43  ;;  %v3480_v62 = vmul.f32 %v4534_v63, %v3478_v40  ;;  %v4536_v44 = vpop.eup %4535  ;;  %vm3485_vm8 = vweird.f32 %v4534_v63  ;;  %v6939_v40 = vld [vmem:[#allocation9 + $0x348] sm:$0xff]  ;;  %3850 = vmatpush.msra.mxu3 %v6957_v36 }
 0x932   :  { %v3448_v3 = vsel %vm3447_vm4, %v4530_v17, %v3444_v35  ;;  %vm3486_vm10 = vmor %vm3484_vm9, %vm3485_vm8  ;;  %v6941_v17 = vld [vmem:[#allocation9 + $0x350] sm:$0xff]  ;;  %3809 = vmatpush.msrb.mxu1 %v6939_v40  ;;  %v6975_v43 = vld [vmem:[#allocation9 + $0x2e8] sm:$0xff] }
 0x933   :  { %v3453_v21 = vsel %vm3450_vm6, %v3452_v57, %v3448_v3  ;;  %v3467_v22 = vsel %vm3466_vm5, %v4532_v46, %v3463_v45  ;;  %v3481_v50 = vsub.f32 1.0, %v3480_v62  ;;  %v6949_v46 = vld [vmem:[#allocation9 + $0x320] sm:$0xff]  ;;  %3851 = vmatpush.msra.mxu3 %v6969_v38  ;;  %v6985_v62 = vld [vmem:[#allocation9 + $0x2f8] sm:$0xff] }
 0x934   :  { %v3472_v32 = vsel %vm3469_vm7, %v3471_v0, %v3467_v22  ;;  %v3495_v28 = vmul.f32 %v4536_v44, %v3453_v21  ;;  %3790 = vmatpush.msrb.mxu0 %v6949_v46  ;;  %3810 = vmatpush.msrb.mxu1 %v6951_v25  ;;  %v7504_v57 = vld [vmem:[#allocation33_spill] sm:$0xff]  ;;  %v6991_v21 = vld [vmem:[#allocation9 + $0x2c8] sm:$0xff]  ;;  %v6993_v22 = vld [vmem:[#allocation9 + $0x2d0] sm:$0xff] }
 0x935   :  { %v3494_v49 = vmul.f32 %v3472_v32, %v6802_v41  ;;  %v3482_v61 = vmul.f32 %v4534_v63, %v3481_v50  ;;  %v6901_v41 = vld [vmem:[#allocation9 + $0x3f0] sm:$0xff]  ;;  %v2297_v45 = vadd.f32 %v7504_v57, %v7486_v60  ;;  %3852 = vmatpush.msra.mxu3 %v6985_v62  ;;  %v6989_v44 = vld [vmem:[#allocation9 + $0x2c0] sm:$0xff]  ;;  %v7025_v57 = vld [vmem:[#allocation9 + $0x268] sm:$0xff] }
 0x936   :  { %3824 = vmatpush.msrb.mxu2 %v6901_v41  ;;  %3791 = vmatpush.msrb.mxu0 %v6961_v26  ;;  %7507 = vst [vmem:[#allocation19_spill] sm:$0xff] %v7025_v57  ;;  %v7049_v60 = vld [vmem:[#allocation9 + $0x228] sm:$0xff] }
 0x937   :  { %v6892_v5 = vadd.f32 %v3495_v28, %v3494_v49  ;;  %v3483_v6 = vadd.f32 %v4534_v63, %v3482_v61  ;;  %3811 = vmatpush.msrb.mxu1 %v6963_v55  ;;  %v6997_v28 = vld [vmem:[#allocation9 + $0x2d8] sm:$0xff]  ;;  %v7001_v49 = vld [vmem:[#allocation9 + $0x2a0] sm:$0xff]  ;;  %v7003_v61 = vld [vmem:[#allocation9 + $0x2a8] sm:$0xff] }
 0x938   :  { %3825 = vmatpush.msrb.mxu2 %v6904_v48  ;;  %3792 = vmatpush.msrb.mxu0 %v6973_v52 }
 0x939   :  { %4537 = vtanh.f32 %v6892_v5  ;;  %v3487_v42 = vsel %vm3486_vm10, %v4534_v63, %v3483_v6  ;;  %v7503_v63 = vld [vmem:[#allocation37_spill] sm:$0xff]  ;;  %3812 = vmatpush.msrb.mxu1 %v6975_v43  ;;  %3853 = vmatpush.msra.mxu3 %v6997_v28  ;;  %v7005_v6 = vld [vmem:[#allocation9 + $0x2b0] sm:$0xff] }
 0x93a   :  { %v3492_v18 = vsel %vm3489_vm11, %v3491_v14, %v3487_v42  ;;  %3826 = vmatpush.msrb.mxu2 %v6907_v20  ;;  %v2256_v35 = vadd.f32 %v7503_v63, %v7484_v12  ;;  %3793 = vmatpush.msrb.mxu0 %v6989_v44  ;;  %v7009_v42 = vld [vmem:[#allocation9 + $0x2b8] sm:$0xff]  ;;  %v7013_v14 = vld [vmem:[#allocation9 + $0x280] sm:$0xff]  ;;  %v7053_v12 = vld [vmem:[#allocation9 + $0x230] sm:$0xff] }
 0x93b   :  { %3813 = vmatpush.msrb.mxu1 %v6991_v21  ;;  %3854 = vmatpush.msra.mxu3 %v7009_v42  ;;  %v7021_v63 = vld [vmem:[#allocation9 + $0x298] sm:$0xff] }
 0x93c   :  { %3827 = vmatpush.msrb.mxu2 %v6917_v16  ;;  %3794 = vmatpush.msrb.mxu0 %v7001_v49  ;;  %7505 = vst [vmem:[#allocation32_spill] sm:$0xff] %v7021_v63 }
 0x93d   :  { %3814 = vmatpush.msrb.mxu1 %v7003_v61  ;;  %3855 = vmatpush.msra.mxu3 %v7021_v63 }
 0x93e   :  { %3828 = vmatpush.msrb.mxu2 %v6929_v47  ;;  %3795 = vmatpush.msrb.mxu0 %v7013_v14 }
 0x93f   :  { %v4538_v23 = vpop.eup %4537 }
 0x940   :  { %v6895_v54 = vmul.f32 %v4538_v23, %v3492_v18  ;;  %3829 = vmatpush.msrb.mxu2 %v6941_v17  ;;  %v7015_v23 = vld [vmem:[#allocation9 + $0x288] sm:$0xff]  ;;  %v7017_v18 = vld [vmem:[#allocation9 + $0x290] sm:$0xff] }
 0x941   :  { %3815 = vmatpush.msrb.mxu1 %v7015_v23 }
 0x942   :  { %7502 = vst [vmem:[#allocation24_spill] sm:$0xff] %v6895_v54  ;;  %3584 = vmatmul.f32.vlgmr.msra.gmra.mxu0 %v6895_v54  ;;  %3604 = vmatmul.f32.vlgmr.msra.gmra.mxu1 %v6895_v54 }
 0x943   :  { %3624 = vmatmul.f32.vlgmr.msra.gmra.mxu2 %v6895_v54  ;;  %3644 = vmatmul.f32.vlgmr.msrb.gmra.mxu3 %v6895_v54  ;;  %v7039_v54 = vld [vmem:[#allocation9 + $0x248] sm:$0xff] }
 0x944   :  { %3830 = vmatpush.msrb.mxu2 %v6953_v15  ;;  %3816 = vmatpush.msrb.mxu1 %v7025_v57  ;;  %7512 = vst [vmem:[#allocation35_spill] sm:$0xff] %v7039_v54  ;;  %v7055_v57 = vld [vmem:[#allocation9 + $0x238] sm:$0xff] }
 0x946   :  { %3831 = vmatpush.msrb.mxu2 %v6965_v9  ;;  %3817 = vmatpush.msrb.mxu1 %v7039_v54  ;;  %v7067_v54 = vld [vmem:[#allocation9 + $0x218] sm:$0xff] }
 0x948   :  { %3832 = vmatpush.msrb.mxu2 %v6977_v51  ;;  %3818 = vmatpush.msrb.mxu1 %v7049_v60 }
 0x94a   :  { %3833 = vmatpush.msrb.mxu2 %v6993_v22 }
 0x94c   :  { %3834 = vmatpush.msrb.mxu2 %v7005_v6 }
 0x94e   :  { %3835 = vmatpush.msrb.mxu2 %v7017_v18 }
 0x9bf   :  { %v3585_v0 = vpop.f32.mrf.mxu0  ;;  %v3605_v3 = vpop.f32.mrf.mxu1 }
 0x9c0   :  { %v3648_v50 = vadd.f32 %v3585_v0, %v2256_v35  ;;  %v3649_v32 = vadd.f32 %v3605_v3, %v2297_v45  ;;  %v7023_v35 = vld [vmem:[#allocation9 + $0x260] sm:$0xff]  ;;  %v7508_v45 = vld [vmem:[#allocation44_spill] sm:$0xff]  ;;  %v7031_v3 = vld [vmem:[#allocation9 + $0x270] sm:$0xff] }
 0x9c1   :  { %7506 = vst [vmem:[#allocation31_spill] sm:$0xff] %v7023_v35  ;;  %v2379_v0 = vadd.f32 %v7508_v45, %v7488_v34  ;;  %3796 = vmatpush.msrb.mxu0 %v7023_v35  ;;  %3836 = vmatpush.msrb.mxu2 %v7031_v3  ;;  %v7047_v34 = vld [vmem:[#allocation9 + $0x220] sm:$0xff] }
 0x9c2   :  { %v4292_v58 = vmul.f32 -1.442695, %v3648_v50  ;;  %v4293_v1 = vmul.f32 -1.442695, %v3649_v32  ;;  %7509 = vst [vmem:[#allocation25_spill] sm:$0xff] %v7031_v3  ;;  %v7033_v50 = vld [vmem:[#allocation9 + $0x278] sm:$0xff] }
 0x9c3   :  { %7510 = vst [vmem:[#allocation56_spill] sm:$0xff] %v7033_v50  ;;  %v7035_v32 = vld [vmem:[#allocation9 + $0x240] sm:$0xff]  ;;  %3856 = vmatpush.msra.mxu3 %v7033_v50  ;;  %3837 = vmatpush.msrb.mxu2 %v7041_v19 }
 0x9c4   :  { %4539 = vpow2.f32 %v4292_v58  ;;  %7511 = vst [vmem:[#allocation57_spill] sm:$0xff] %v7035_v32  ;;  %3797 = vmatpush.msrb.mxu0 %v7035_v32  ;;  %v7065_v32 = vld [vmem:[#allocation9 + $0x210] sm:$0xff] }
 0x9c5   :  { %4541 = vpow2.f32 %v4293_v1  ;;  %v7043_v1 = vld [vmem:[#allocation9 + $0x258] sm:$0xff]  ;;  %7513 = vst [vmem:[#allocation20_spill] sm:$0xff] %v7065_v32  ;;  %3838 = vmatpush.msrb.mxu2 %v7053_v12 }
 0x9c6   :  { %v3645_v58 = vpop.f32.mrf.mxu3  ;;  %3857 = vmatpush.msra.mxu3 %v7043_v1  ;;  %3798 = vmatpush.msrb.mxu0 %v7047_v34 }
 0x9c7   :  { %v3651_v45 = vadd.f32 %v3645_v58, %v2379_v0  ;;  %v7059_v0 = vld [vmem:[#allocation9 + $0x200] sm:$0xff]  ;;  %v7061_v58 = vld [vmem:[#allocation9 + $0x208] sm:$0xff]  ;;  %3839 = vmatpush.msrb.mxu2 %v7065_v32 }
 0x9c8   :  { %3858 = vmatpush.msra.mxu3 %v7055_v57  ;;  %3799 = vmatpush.msrb.mxu0 %v7059_v0 }
 0x9c9   :  { %v4294_v35 = vmul.f32 -1.442695, %v3651_v45  ;;  %3819 = vmatpush.msrb.mxu1 %v7061_v58  ;;  %4040 = vmatpush.msra.mxu2 %v6901_v41 }
 0x9ca   :  { %v4540_v50 = vpop.eup %4539  ;;  %3859 = vmatpush.msra.mxu3 %v7067_v54  ;;  %4000 = vmatpush.msra.mxu0 %v6811_v27 }
 0x9cb   :  { %v4542_v3 = vpop.eup %4541  ;;  %v7069_v63 = vadd.f32 1.0, %v4540_v50  ;;  %4543 = vpow2.f32 %v4294_v35  ;;  %4020 = vmatpush.msra.mxu1 %v6813_v10  ;;  %v3625_v35 = vpop.f32.mrf.mxu2  ;;  %v7514_v50 = vld [vmem:[#allocation46_spill] sm:$0xff]  ;;  %4041 = vmatpush.msra.mxu2 %v6904_v48 }
 0x9cc   :  { %v7073_v45 = vadd.f32 1.0, %v4542_v3  ;;  %4060 = vmatpush.msrb.mxu3 %v6815_v59  ;;  %4001 = vmatpush.msra.mxu0 %v6820_v7  ;;  %v2338_v32 = vadd.f32 %v7514_v50, %v7500_v53  ;;  %v4165_v50 = vld [vmem:[#allocation12 + $0x48] sm:$0xff] }
 0x9cd   :  { %4545 = vrcp.f32 %v7069_v63  ;;  %4021 = vmatpush.msra.mxu1 %v6822_v24  ;;  %4042 = vmatpush.msra.mxu2 %v6907_v20  ;;  %v3667_v41 = vand.u32 2147483648, %v7069_v63  ;;  %vm3661_vm14 = vweird.f32 %v7069_v63 }
 0x9ce   :  { %4547 = vrcp.f32 %v7073_v45  ;;  %4061 = vmatpush.msrb.mxu3 %v6824_v13  ;;  %4002 = vmatpush.msra.mxu0 %v6829_v11  ;;  %v3650_v59 = vadd.f32 %v3625_v35, %v2338_v32  ;;  %v3686_v48 = vand.u32 2147483648, %v7073_v45  ;;  %vm3680_vm15 = vweird.f32 %v7073_v45  ;;  %v7525_v32 = vld [vmem:[#allocation49_spill] sm:$0xff]  ;;  %v4166_v35 = vld [vmem:[#allocation12 + $0x50] sm:$0xff] }
 0x9cf   :  { %4022 = vmatpush.msra.mxu1 %v6831_v56  ;;  %4043 = vmatpush.msra.mxu2 %v6917_v16 }
 0x9d0   :  { %4062 = vmatpush.msrb.mxu3 %v6909_v31  ;;  %4003 = vmatpush.msra.mxu0 %v6913_v37  ;;  %v3665_v31 = vand.u32 2147483647, %v7069_v63 }
 0x9d1   :  { %v4544_v3 = vpop.eup %4543  ;;  %4023 = vmatpush.msra.mxu1 %v6915_v8  ;;  %4044 = vmatpush.msra.mxu2 %v6929_v47  ;;  %v3684_v8 = vand.u32 2147483647, %v7073_v45 }
 0x9d2   :  { %v7091_v27 = vadd.f32 1.0, %v4544_v3  ;;  %4063 = vmatpush.msrb.mxu3 %v6921_v29  ;;  %4004 = vmatpush.msra.mxu0 %v6925_v4  ;;  %v3668_v4 = vor.u32 1.1754944e-38, %v3667_v41  ;;  %vm3666_vm2 = vcmp.eq.f32.partialorder %v3665_v31, 8.507059e+37 }
 0x9d3   :  { %v4546_v10 = vpop.eup %4545  ;;  %4024 = vmatpush.msra.mxu1 %v6927_v2  ;;  %4045 = vmatpush.msra.mxu2 %v6941_v17  ;;  %vm3685_vm3 = vcmp.eq.f32.partialorder %v3684_v8, 8.507059e+37 }
 0x9d4   :  { %v4548_v7 = vpop.eup %4547  ;;  %v3657_v24 = vmul.f32 %v4546_v10, %v7069_v63  ;;  %4549 = vrcp.f32 %v7091_v27  ;;  %4064 = vmatpush.msrb.mxu3 %v6933_v39  ;;  %vm3662_vm12 = vweird.f32 %v4546_v10  ;;  %4005 = vmatpush.msra.mxu0 %v6937_v30  ;;  %v3687_v39 = vor.u32 1.1754944e-38, %v3686_v48  ;;  %v7524_v63 = vld [vmem:[#allocation45_spill] sm:$0xff] }
 0x9d5   :  { %v3676_v13 = vmul.f32 %v4548_v7, %v7073_v45  ;;  %4551 = vtanh.f32 %v3650_v59  ;;  %4025 = vmatpush.msra.mxu1 %v6939_v40  ;;  %vm3681_vm13 = vweird.f32 %v4548_v7  ;;  %vm3663_vm0 = vmor %vm3661_vm14, %vm3662_vm12  ;;  %4046 = vmatpush.msra.mxu2 %v6953_v15  ;;  %vm3700_vm5 = vweird.f32 %v7091_v27  ;;  %v4164_v59 = vld [vmem:[#allocation12 + $0x40] sm:$0xff] }
 0x9d6   :  { %v3658_v11 = vsub.f32 1.0, %v3657_v24  ;;  %4065 = vmatpush.msrb.mxu3 %v6945_v33  ;;  %4006 = vmatpush.msra.mxu0 %v6949_v46  ;;  %vm3682_vm1 = vmor %vm3680_vm15, %vm3681_vm13  ;;  %v7527_v24 = vld [vmem:[#allocation52_spill] sm:$0xff] }
 0x9d7   :  { %v3677_v56 = vsub.f32 1.0, %v3676_v13  ;;  %4026 = vmatpush.msra.mxu1 %v6951_v25  ;;  %4047 = vmatpush.msra.mxu2 %v6965_v9  ;;  %v3706_v9 = vand.u32 2147483648, %v7091_v27  ;;  %v7528_v13 = vld [vmem:[#allocation47_spill] sm:$0xff] }
 0x9d8   :  { %v3659_v20 = vmul.f32 %v4546_v10, %v3658_v11  ;;  %4066 = vmatpush.msrb.mxu3 %v6957_v36  ;;  %4007 = vmatpush.msra.mxu0 %v6961_v26  ;;  %v2382_v11 = vadd.f32 %v7528_v13, %v7527_v24  ;;  %v7531_v13 = vld [vmem:[#allocation38_spill] sm:$0xff] }
 0x9d9   :  { %v3678_v37 = vmul.f32 %v4548_v7, %v3677_v56  ;;  %4027 = vmatpush.msra.mxu1 %v6963_v55  ;;  %4048 = vmatpush.msra.mxu2 %v6977_v51  ;;  %v7516_v51 = vld [vmem:[#allocation31_spill] sm:$0xff]  ;;  %v4162_v56 = vld [vmem:[#allocation12 + $0x30] sm:$0xff] }
 0x9da   :  { %v7116_v16 = vpop.eup %4549  ;;  %v3660_v29 = vadd.f32 %v4546_v10, %v3659_v20  ;;  %4067 = vmatpush.msrb.mxu3 %v6969_v38  ;;  %4008 = vmatpush.msra.mxu0 %v6973_v52  ;;  %v3704_v38 = vand.u32 2147483647, %v7091_v27  ;;  %v7515_v52 = vld [vmem:[#allocation32_spill] sm:$0xff]  ;;  %v4161_v20 = vld [vmem:[#allocation12 + $0x28] sm:$0xff] }
 0x9db   :  { %v3679_v2 = vadd.f32 %v4548_v7, %v3678_v37  ;;  %v3696_v47 = vmul.f32 %v7116_v16, %v7091_v27  ;;  %v4552_v40 = vpop.eup %4551  ;;  %4028 = vmatpush.msra.mxu1 %v6975_v43  ;;  %4049 = vmatpush.msra.mxu2 %v6993_v22  ;;  %vm3701_vm4 = vweird.f32 %v7116_v16  ;;  %v7519_v22 = vld [vmem:[#allocation56_spill] sm:$0xff]  ;;  %v4160_v37 = vld [vmem:[#allocation12 + $0x20] sm:$0xff] }
 0x9dc   :  { %v3664_v30 = vsel %vm3663_vm0, %v4546_v10, %v3660_v29  ;;  %4068 = vmatpush.msrb.mxu3 %v6985_v62  ;;  %4009 = vmatpush.msra.mxu0 %v6989_v44  ;;  %vm3702_vm6 = vmor %vm3700_vm5, %vm3701_vm4  ;;  %v7517_v62 = vld [vmem:[#allocation19_spill] sm:$0xff]  ;;  %v3707_v44 = vor.u32 1.1754944e-38, %v3706_v9  ;;  %vm3705_vm7 = vcmp.eq.f32.partialorder %v3704_v38, 8.507059e+37 }
 0x9dd   :  { %v3669_v17 = vsel %vm3666_vm2, %v3668_v4, %v3664_v30  ;;  %v3683_v33 = vsel %vm3682_vm1, %v4548_v7, %v3679_v2  ;;  %v3697_v46 = vsub.f32 1.0, %v3696_v47  ;;  %4029 = vmatpush.msra.mxu1 %v6991_v21  ;;  %4050 = vmatpush.msra.mxu2 %v7005_v6  ;;  %v7518_v21 = vld [vmem:[#allocation25_spill] sm:$0xff]  ;;  %v4158_v47 = vld [vmem:[#allocation12 + $0x10] sm:$0xff] }
 0x9de   :  { %v3688_v25 = vsel %vm3685_vm3, %v3687_v39, %v3683_v33  ;;  %v3711_v15 = vmul.f32 %v4552_v40, %v3669_v17  ;;  %4069 = vmatpush.msrb.mxu3 %v6997_v28  ;;  %4010 = vmatpush.msra.mxu0 %v7001_v49  ;;  %v7520_v28 = vld [vmem:[#allocation57_spill] sm:$0xff]  ;;  %v7521_v49 = vld [vmem:[#allocation35_spill] sm:$0xff]  ;;  %v7529_v17 = vld [vmem:[#allocation50_spill] sm:$0xff] }
 0x9df   :  { %v3710_v36 = vmul.f32 %v3688_v25, %v6892_v5  ;;  %v3698_v26 = vmul.f32 %v7116_v16, %v3697_v46  ;;  %4030 = vmatpush.msra.mxu1 %v7003_v61  ;;  %4051 = vmatpush.msra.mxu2 %v7017_v18  ;;  %v7523_v18 = vld [vmem:[#allocation48_spill] sm:$0xff]  ;;  %v4163_v7 = vld [vmem:[#allocation12 + $0x38] sm:$0xff]  ;;  %v4157_v39 = vld [vmem:[#allocation12 + $0x8] sm:$0xff]  ;;  %v2341_v33 = vadd.f32 %v7529_v17, %v7500_v53 }
 0x9e0   :  { %4070 = vmatpush.msrb.mxu3 %v7009_v42  ;;  %4011 = vmatpush.msra.mxu0 %v7013_v14  ;;  %v4168_v14 = vld [vmem:[#allocation12 + $0x60] sm:$0xff]  ;;  %v4159_v2 = vld [vmem:[#allocation12 + $0x18] sm:$0xff] }
 0x9e1   :  { %v7140_v55 = vadd.f32 %v3711_v15, %v3710_v36  ;;  %v3699_v5 = vadd.f32 %v7116_v16, %v3698_v26  ;;  %4031 = vmatpush.msra.mxu1 %v7015_v23  ;;  %4052 = vmatpush.msra.mxu2 %v7518_v21  ;;  %v4167_v23 = vld [vmem:[#allocation12 + $0x58] sm:$0xff]  ;;  %v4156_v46 = vld [vmem:[#allocation12] sm:$0xff] }
 0x9e2   :  { %4071 = vmatpush.msrb.mxu3 %v7515_v52  ;;  %4012 = vmatpush.msra.mxu0 %v7516_v51 }
 0x9e3   :  { %4553 = vtanh.f32 %v7140_v55  ;;  %v3703_v43 = vsel %vm3702_vm6, %v7116_v16, %v3699_v5  ;;  %4032 = vmatpush.msra.mxu1 %v7517_v62  ;;  %4053 = vmatpush.msra.mxu2 %v7041_v19  ;;  %v7522_v19 = vld [vmem:[#allocation20_spill] sm:$0xff] }
 0x9e4   :  { %4072 = vmatpush.msrb.mxu3 %v7519_v22  ;;  %4013 = vmatpush.msra.mxu0 %v7520_v28  ;;  %v3708_v6 = vsel %vm3705_vm7, %v3707_v44, %v3703_v43 }
 0x9e5   :  { %4033 = vmatpush.msra.mxu1 %v7521_v49  ;;  %4054 = vmatpush.msra.mxu2 %v7053_v12  ;;  %v4170_v12 = vld [vmem:[#allocation12 + $0x70] sm:$0xff] }
 0x9e6   :  { %4073 = vmatpush.msrb.mxu3 %v7043_v1  ;;  %4014 = vmatpush.msra.mxu0 %v7047_v34  ;;  %v4169_v34 = vld [vmem:[#allocation12 + $0x68] sm:$0xff]  ;;  %v7526_v1 = vld [vmem:[#allocation26_spill] sm:$0xff] }
 0x9e7   :  { %4034 = vmatpush.msra.mxu1 %v7049_v60  ;;  %4055 = vmatpush.msra.mxu2 %v7522_v19  ;;  %v4171_v60 = vld [vmem:[#allocation12 + $0x78] sm:$0xff] }
 0x9e8   :  { %4074 = vmatpush.msrb.mxu3 %v7055_v57  ;;  %4015 = vmatpush.msra.mxu0 %v7059_v0  ;;  %v2259_v57 = vadd.f32 %v7524_v63, %v7523_v18  ;;  %v2300_v0 = vadd.f32 %v7526_v1, %v7525_v32 }
 0x9e9   :  { %v4554_v61 = vpop.eup %4553  ;;  %4035 = vmatpush.msra.mxu1 %v7061_v58 }
 0x9ea   :  { %v7167_v42 = vmul.f32 %v4554_v61, %v3708_v6  ;;  %4075 = vmatpush.msrb.mxu3 %v7067_v54 }
 0x9ec   :  { %3800 = vmatmul.f32.vlgmr.msrb.gmra.mxu0 %v7167_v42  ;;  %3820 = vmatmul.f32.vlgmr.msrb.gmra.mxu1 %v7167_v42 }
 0x9ed   :  { %3840 = vmatmul.f32.vlgmr.msrb.gmra.mxu2 %v7167_v42  ;;  %3860 = vmatmul.f32.vlgmr.msra.gmra.mxu3 %v7167_v42 }
 0x9ee   :  { %4176 = vmatpush.msrb.mxu0 %v4171_v60 }
 0x9f0   :  { %4177 = vmatpush.msrb.mxu0 %v4170_v12 }
 0x9f2   :  { %4178 = vmatpush.msrb.mxu0 %v4169_v34 }
 0x9f4   :  { %4179 = vmatpush.msrb.mxu0 %v4168_v14 }
 0x9f6   :  { %4180 = vmatpush.msrb.mxu0 %v4167_v23 }
 0x9f8   :  { %4181 = vmatpush.msrb.mxu0 %v4166_v35 }
 0x9fa   :  { %4182 = vmatpush.msrb.mxu0 %v4165_v50 }
 0x9fc   :  { %4183 = vmatpush.msrb.mxu0 %v4164_v59 }
 0x9fe   :  { %4184 = vmatpush.msrb.mxu0 %v4163_v7 }
 0xa00   :  { %4185 = vmatpush.msrb.mxu0 %v4162_v56  ;;  %v7533_v56 = vld [vmem:[#allocation18_spill] sm:$0xff] }
 0xa02   :  { %4186 = vmatpush.msrb.mxu0 %v4161_v20 }
 0xa04   :  { %4187 = vmatpush.msrb.mxu0 %v4160_v37 }
 0xa06   :  { %4188 = vmatpush.msrb.mxu0 %v4159_v2 }
 0xa08   :  { %4189 = vmatpush.msrb.mxu0 %v4158_v47 }
 0xa0a   :  { %4190 = vmatpush.msrb.mxu0 %v4157_v39  ;;  %v7206_v39 = vld [vmem:[%s7232_s5] ss:$0 sm:$0xff]  ;;  %s4751_s5 = smov [#allocation13]  }
 0xa0b   :  { %s4229_s25 = sshll.u32 %s4751_s5, 4  ;;  %s4230_s25 = int_to_ptr.vmem [resolvable:$true] %s4229_s25 }
 0xa0c   :  { %4191 = vmatpush.msrb.mxu0 %v4156_v46 }
 0xa69   :  { %v3801_v58 = vpop.f32.mrf.mxu0  ;;  %v3821_v45 = vpop.f32.mrf.mxu1 }
 0xa6a   :  { %v3864_v54 = vadd.f32 %v3801_v58, %v2259_v57  ;;  %v3865_v3 = vadd.f32 %v3821_v45, %v2300_v0 }
 0xa6c   :  { %v4295_v27 = vmul.f32 -1.442695, %v3864_v54  ;;  %v4296_v10 = vmul.f32 -1.442695, %v3865_v3 }
 0xa6e   :  { %4555 = vpow2.f32 %v4295_v27 }
 0xa6f   :  { %4557 = vpow2.f32 %v4296_v10 }
 0xa70   :  { %v3861_v41 = vpop.f32.mrf.mxu3  ;;  %v3841_v30 = vpop.f32.mrf.mxu2 }
 0xa71   :  { %v3867_v48 = vadd.f32 %v3861_v41, %v2382_v11  ;;  %v3866_v36 = vadd.f32 %v3841_v30, %v2341_v33  ;;  %v7532_v11 = vld [vmem:[#allocation34_spill] sm:$0xff]  ;;  %v7534_v41 = vld [vmem:[#allocation24_spill] sm:$0xff] }
 0xa73   :  { %v4297_v31 = vmul.f32 -1.442695, %v3867_v48  ;;  %v7535_v48 = vld [vmem:[#allocation30_spill] sm:$0xff] }
 0xa74   :  { %v4556_v8 = vpop.eup %4555  ;;  %v2262_v20 = vadd.f32 %v7535_v48, %v7523_v18 }
 0xa75   :  { %v4558_v16 = vpop.eup %4557  ;;  %v3871_v29 = vadd.f32 1.0, %v4556_v8  ;;  %4559 = vpow2.f32 %v4297_v31  ;;  %v7536_v31 = vld [vmem:[#allocation21_spill] sm:$0xff] }
 0xa76   :  { %v3890_v4 = vadd.f32 1.0, %v4558_v16  ;;  %v2303_v37 = vadd.f32 %v7536_v31, %v7525_v32 }
 0xa77   :  { %4561 = vrcp.f32 %v3871_v29  ;;  %v3883_v43 = vand.u32 2147483648, %v3871_v29  ;;  %v3881_v44 = vand.u32 2147483647, %v3871_v29  ;;  %vm3877_vm10 = vweird.f32 %v3871_v29 }
 0xa78   :  { %4563 = vrcp.f32 %v3890_v4  ;;  %v3902_v51 = vand.u32 2147483648, %v3890_v4  ;;  %v3900_v22 = vand.u32 2147483647, %v3890_v4  ;;  %vm3896_vm11 = vweird.f32 %v3890_v4 }
 0xa79   :  { %v3884_v61 = vor.u32 1.1754944e-38, %v3883_v43  ;;  %vm3882_vm14 = vcmp.eq.f32.partialorder %v3881_v44, 8.507059e+37 }
 0xa7a   :  { %v3903_v60 = vor.u32 1.1754944e-38, %v3902_v51  ;;  %vm3901_vm15 = vcmp.eq.f32.partialorder %v3900_v22, 8.507059e+37 }
 0xa7b   :  { %v4560_v40 = vpop.eup %4559 }
 0xa7c   :  { %v3910_v25 = vadd.f32 1.0, %v4560_v40 }
 0xa7d   :  { %v4562_v15 = vpop.eup %4561 }
 0xa7e   :  { %v4564_v26 = vpop.eup %4563  ;;  %v3873_v5 = vmul.f32 %v4562_v15, %v3871_v29  ;;  %4565 = vrcp.f32 %v3910_v25  ;;  %vm3878_vm8 = vweird.f32 %v4562_v15  ;;  %v3922_v54 = vand.u32 2147483648, %v3910_v25 }
 0xa7f   :  { %v3892_v9 = vmul.f32 %v4564_v26, %v3890_v4  ;;  %4567 = vtanh.f32 %v3866_v36  ;;  %vm3897_vm9 = vweird.f32 %v4564_v26  ;;  %vm3879_vm12 = vmor %vm3877_vm10, %vm3878_vm8  ;;  %vm3916_vm1 = vweird.f32 %v3910_v25 }
 0xa80   :  { %v3874_v38 = vsub.f32 1.0, %v3873_v5  ;;  %vm3898_vm13 = vmor %vm3896_vm11, %vm3897_vm9  ;;  %v3920_v3 = vand.u32 2147483647, %v3910_v25  ;;  %v3923_v27 = vor.u32 1.1754944e-38, %v3922_v54 }
 0xa81   :  { %v3893_v52 = vsub.f32 1.0, %v3892_v9 }
 0xa82   :  { %v3875_v62 = vmul.f32 %v4562_v15, %v3874_v38  ;;  %vm3921_vm3 = vcmp.eq.f32.partialorder %v3920_v3, 8.507059e+37  ;;  %v7538_v38 = vld [vmem:[#allocation53_spill] sm:$0xff] }
 0xa83   :  { %v3894_v21 = vmul.f32 %v4564_v26, %v3893_v52  ;;  %v2344_v52 = vadd.f32 %v7538_v38, %v7500_v53 }
 0xa84   :  { %v4566_v28 = vpop.eup %4565  ;;  %v3876_v49 = vadd.f32 %v4562_v15, %v3875_v62 }
 0xa85   :  { %v3895_v6 = vadd.f32 %v4564_v26, %v3894_v21  ;;  %v3912_v19 = vmul.f32 %v4566_v28, %v3910_v25  ;;  %v4568_v34 = vpop.eup %4567  ;;  %vm3917_vm0 = vweird.f32 %v4566_v28 }
 0xa86   :  { %v3880_v12 = vsel %vm3879_vm12, %v4562_v15, %v3876_v49  ;;  %vm3918_vm2 = vmor %vm3916_vm1, %vm3917_vm0 }
 0xa87   :  { %v3885_v14 = vsel %vm3882_vm14, %v3884_v61, %v3880_v12  ;;  %v3899_v23 = vsel %vm3898_vm13, %v4564_v26, %v3895_v6  ;;  %v3913_v63 = vsub.f32 1.0, %v3912_v19 }
 0xa88   :  { %v3904_v57 = vsel %vm3901_vm15, %v3903_v60, %v3899_v23  ;;  %v3927_v1 = vmul.f32 %v4568_v34, %v3885_v14 }
 0xa89   :  { %v3926_v0 = vmul.f32 %v3904_v57, %v7140_v55  ;;  %v3914_v58 = vmul.f32 %v4566_v28, %v3913_v63  ;;  %v7530_v55 = vld [vmem:[#allocation55_spill] sm:$0xff] }
 0xa8b   :  { %v7190_v45 = vadd.f32 %v3927_v1, %v3926_v0  ;;  %v3915_v35 = vadd.f32 %v4566_v28, %v3914_v58 }
 0xa8d   :  { %4569 = vtanh.f32 %v7190_v45  ;;  %v3919_v50 = vsel %vm3918_vm2, %v4566_v28, %v3915_v35 }
 0xa8e   :  { %v3924_v59 = vsel %vm3921_vm3, %v3923_v27, %v3919_v50 }
 0xa93   :  { %v4570_v10 = vpop.eup %4569 }
 0xa94   :  { %v3930_v7 = vmul.f32 %v4570_v10, %v3924_v59 }
 0xa96   :  { %4016 = vmatmul.f32.vlgmr.msra.gmra.mxu0 %v3930_v7  ;;  %4036 = vmatmul.f32.vlgmr.msra.gmra.mxu1 %v3930_v7 }
 0xa97   :  { %4056 = vmatmul.f32.vlgmr.msra.gmra.mxu2 %v3930_v7  ;;  %4076 = vmatmul.f32.vlgmr.msrb.gmra.mxu3 %v3930_v7 }
 0xa9e   :  { %4192 = vmatmul.f32.vlgmr.msrb.gmra.mxu0 %v7530_v55 }
 0xaa6   :  { %4195 = vmatmul.f32.gmra.mxu0 %v7531_v13 }
 0xaae   :  { %4198 = vmatmul.f32.gmra.mxu0 %v7532_v11 }
 0xab6   :  { %4201 = vmatmul.f32.gmra.mxu0 %v7533_v56 }
 0xabe   :  { %4204 = vmatmul.f32.gmra.mxu0 %v7534_v41 }
 0xac6   :  { %4207 = vmatmul.f32.gmra.mxu0 %v7167_v42  ;;  %v7537_v42 = vld [vmem:[#allocation51_spill] sm:$0xff] }
 0xac7   :  { %v2385_v30 = vadd.f32 %v7537_v42, %v7527_v24 }
 0xace   :  { %4210 = vmatmul.f32.gmra.mxu0 %v3930_v7 }
 0xb13   :  { %v4017_v8 = vpop.f32.mrf.mxu0  ;;  %v4037_v16 = vpop.f32.mrf.mxu1 }
 0xb14   :  { %v4080_v29 = vadd.f32 %v4017_v8, %v2262_v20  ;;  %v4081_v4 = vadd.f32 %v4037_v16, %v2303_v37 }
 0xb16   :  { %v4298_v2 = vmul.f32 -1.442695, %v4080_v29  ;;  %v4299_v47 = vmul.f32 -1.442695, %v4081_v4 }
 0xb18   :  { %4571 = vpow2.f32 %v4298_v2 }
 0xb19   :  { %4573 = vpow2.f32 %v4299_v47 }
 0xb1a   :  { %v4077_v18 = vpop.f32.mrf.mxu3  ;;  %v4057_v5 = vpop.f32.mrf.mxu2 }
 0xb1b   :  { %v4083_v40 = vadd.f32 %v4077_v18, %v2385_v30  ;;  %v4193_v17 = vpop.f32.mrf.mxu0  ;;  %v4082_v62 = vadd.f32 %v4057_v5, %v2344_v52 }
 0xb1c   :  { %v4194_v32 = vadd.f32 %v7206_v39, %v4193_v17 }
 0xb1d   :  { %v4300_v33 = vmul.f32 -1.442695, %v4083_v40 }
 0xb1e   :  { %v4572_v46 = vpop.eup %4571  ;;  %4217 = vst [vmem:[#allocation13] sm:$0xff] %v4194_v32 }
 0xb1f   :  { %v4574_v25 = vpop.eup %4573  ;;  %v4087_v15 = vadd.f32 1.0, %v4572_v46  ;;  %4575 = vpow2.f32 %v4300_v33 }
 0xb20   :  { %v4106_v36 = vadd.f32 1.0, %v4574_v25 }
 0xb21   :  { %4577 = vrcp.f32 %v4087_v15  ;;  %v4097_v61 = vand.u32 2147483647, %v4087_v15  ;;  %v4099_v6 = vand.u32 2147483648, %v4087_v15  ;;  %vm4093_vm6 = vweird.f32 %v4087_v15 }
 0xb22   :  { %4579 = vrcp.f32 %v4106_v36  ;;  %v4118_v60 = vand.u32 2147483648, %v4106_v36  ;;  %v4116_v14 = vand.u32 2147483647, %v4106_v36  ;;  %vm4112_vm7 = vweird.f32 %v4106_v36 }
 0xb23   :  { %v4196_v26 = vpop.f32.mrf.mxu0  ;;  %v4100_v57 = vor.u32 1.1754944e-38, %v4099_v6  ;;  %vm4098_vm10 = vcmp.eq.f32.partialorder %v4097_v61, 8.507059e+37 }
 0xb24   :  { %v4197_v9 = vadd.f32 %v7206_v39, %v4196_v26  ;;  %v4119_v58 = vor.u32 1.1754944e-38, %v4118_v60  ;;  %vm4117_vm11 = vcmp.eq.f32.partialorder %v4116_v14, 8.507059e+37 }
 0xb25   :  { %v4576_v24 = vpop.eup %4575 }
 0xb26   :  { %v4126_v43 = vadd.f32 1.0, %v4576_v24  ;;  %4218 = vst [vmem:[#allocation13 + $0x8] sm:$0xff] %v4197_v9 }
 0xb27   :  { %v4578_v51 = vpop.eup %4577 }
 0xb28   :  { %v4580_v44 = vpop.eup %4579  ;;  %v4089_v21 = vmul.f32 %v4578_v51, %v4087_v15  ;;  %4581 = vrcp.f32 %v4126_v43  ;;  %vm4094_vm4 = vweird.f32 %v4578_v51  ;;  %v4138_v48 = vand.u32 2147483648, %v4126_v43 }
 0xb29   :  { %v4108_v22 = vmul.f32 %v4580_v44, %v4106_v36  ;;  %4583 = vtanh.f32 %v4082_v62  ;;  %vm4113_vm5 = vweird.f32 %v4580_v44  ;;  %vm4095_vm8 = vmor %vm4093_vm6, %vm4094_vm4  ;;  %vm4132_vm13 = vweird.f32 %v4126_v43 }
 0xb2a   :  { %v4090_v28 = vsub.f32 1.0, %v4089_v21  ;;  %vm4114_vm9 = vmor %vm4112_vm7, %vm4113_vm5  ;;  %v4136_v20 = vand.u32 2147483647, %v4126_v43  ;;  %v4139_v8 = vor.u32 1.1754944e-38, %v4138_v48 }
 0xb2b   :  { %v4109_v49 = vsub.f32 1.0, %v4108_v22  ;;  %v4199_v19 = vpop.f32.mrf.mxu0 }
 0xb2c   :  { %v4091_v12 = vmul.f32 %v4578_v51, %v4090_v28  ;;  %v4200_v34 = vadd.f32 %v7206_v39, %v4199_v19  ;;  %vm4137_vm15 = vcmp.eq.f32.partialorder %v4136_v20, 8.507059e+37 }
 0xb2d   :  { %v4110_v53 = vmul.f32 %v4580_v44, %v4109_v49 }
 0xb2e   :  { %v4582_v23 = vpop.eup %4581  ;;  %v4092_v63 = vadd.f32 %v4578_v51, %v4091_v12  ;;  %4219 = vst [vmem:[#allocation13 + $0x10] sm:$0xff] %v4200_v34 }
 0xb2f   :  { %v4111_v1 = vadd.f32 %v4580_v44, %v4110_v53  ;;  %v4128_v0 = vmul.f32 %v4582_v23, %v4126_v43  ;;  %v4584_v54 = vpop.eup %4583  ;;  %vm4133_vm12 = vweird.f32 %v4582_v23 }
 0xb30   :  { %v4096_v35 = vsel %vm4095_vm8, %v4578_v51, %v4092_v63  ;;  %vm4134_vm14 = vmor %vm4132_vm13, %vm4133_vm12 }
 0xb31   :  { %v4101_v3 = vsel %vm4098_vm10, %v4100_v57, %v4096_v35  ;;  %v4115_v50 = vsel %vm4114_vm9, %v4580_v44, %v4111_v1  ;;  %v4129_v27 = vsub.f32 1.0, %v4128_v0 }
 0xb32   :  { %v4120_v10 = vsel %vm4117_vm11, %v4119_v58, %v4115_v50  ;;  %v4143_v59 = vmul.f32 %v4584_v54, %v4101_v3 }
 0xb33   :  { %v4142_v7 = vmul.f32 %v4120_v10, %v7190_v45  ;;  %v4202_v55 = vpop.f32.mrf.mxu0  ;;  %v4130_v13 = vmul.f32 %v4582_v23, %v4129_v27 }
 0xb34   :  { %v4203_v11 = vadd.f32 %v7206_v39, %v4202_v55 }
 0xb35   :  { %v4144_v56 = vadd.f32 %v4143_v59, %v4142_v7  ;;  %v4131_v41 = vadd.f32 %v4582_v23, %v4130_v13 }
 0xb36   :  { %4220 = vst [vmem:[#allocation13 + $0x18] sm:$0xff] %v4203_v11 }
 0xb37   :  { %4585 = vtanh.f32 %v4144_v56  ;;  %v4135_v31 = vsel %vm4134_vm14, %v4582_v23, %v4131_v41 }
 0xb38   :  { %v4140_v29 = vsel %vm4137_vm15, %v4139_v8, %v4135_v31 }
 0xb3b   :  { %v4205_v37 = vpop.f32.mrf.mxu0 }
 0xb3c   :  { %v4206_v16 = vadd.f32 %v7206_v39, %v4205_v37 }
 0xb3d   :  { %v4586_v45 = vpop.eup %4585 }
 0xb3e   :  { %4221 = vst [vmem:[#allocation13 + $0x20] sm:$0xff] %v4206_v16  ;;  %v4146_v4 = vmul.f32 %v4586_v45, %v4140_v29 }
 0xb40   :  { %4213 = vmatmul.f32.gmra.mxu0 %v4146_v4 }
 0xb43   :  { %v4208_v2 = vpop.f32.mrf.mxu0 }
 0xb44   :  { %v4209_v47 = vadd.f32 %v7206_v39, %v4208_v2 }
 0xb46   :  { %4222 = vst [vmem:[#allocation13 + $0x28] sm:$0xff] %v4209_v47 }
 0xb4b   :  { %v4211_v42 = vpop.f32.mrf.mxu0 }
 0xb4c   :  { %v4212_v30 = vadd.f32 %v7206_v39, %v4211_v42 }
 0xb4e   :  { %4223 = vst [vmem:[#allocation13 + $0x30] sm:$0xff] %v4212_v30 }
 0xbbd   :  { %v4214_v18 = vpop.f32.mrf.mxu0 }
 0xbbe   :  { %v4215_v40 = vadd.f32 %v7206_v39, %v4214_v18 }
 0xbc0   :  { %4224 = vst [vmem:[#allocation13 + $0x38] sm:$0xff] %v4215_v40 }
 0xbc1   :  { %4237 = dma.vmem_to_hbm [thread:$0]  %s4230_s25, 1024, %s4232_s28, [#allocation6], %s4746_s17, %s4746_s17, %s4747_s18  }
 0xbc2   :  { %4737 = dma.done.wait [#allocation6], 1024  }
 0xbc3   :  { %4738 = vsyncadd [#allocation6], 4294966272 }
 0xbc4   :  { %4242 = vsyncpa [#allocation5], 1 }
 0xbc5   :  { %4243 = vsyncpa [#allocation8], 1 }
 0xbc6   :  { %4244 = vsyncpa [#allocation11], 1 }
 0xbc7   :  { %4245 = vsyncpa [#allocation6], 1 }

</bundles_post_ra>
